<compile_context>
chip_gen: v7x
topology: tpu7x:2x2x1
jax: 0.10.0
libtpu: 0.0.40
codegen_flags: <defaults>
</compile_context>

<pallas_src>
import functools

import jax
import jax.numpy as jnp
from jax.experimental import pallas as pl
from jax.experimental.pallas import tpu as pltpu

_NEG_LARGE = -1e30  # finite stand-in for -inf (padded bias / running-max init)


def _round_up(x: int, m: int) -> int:
    return ((x + m - 1) // m) * m


def _make_mlp_lse_kernel(n_tile: int, out_dim: int, grid_n: int):
    """Build the fused MLP + log-softmax kernel; static sizes closed over."""

    def kernel(x_ref, w1_ref, b1_ref, w2_ref, b2_ref, w3_ref, b3_ref,
               out_ref,                     # (B, out_dim) f32, UNPADDED
               logits_ref, h2_ref, m_ref, l_ref):   # VMEM scratch
        j = pl.program_id(0)

        # Layers 1-2 are tiny: compute once on the first N-tile, keep h2
        # resident (bf16) for every subsequent tile.  Also init the LSE state.
        @pl.when(j == 0)
        def _():
            h1 = jnp.dot(x_ref[...], w1_ref[...],
                         preferred_element_type=jnp.float32) + b1_ref[...]
            h1 = jnp.maximum(h1, 0.0)
            h2 = jnp.dot(h1, w2_ref[...],
                         preferred_element_type=jnp.float32) + b2_ref[...]
            # bf16 so layer 3 is a native bf16 x bf16 MXU matmul.
            h2_ref[...] = jnp.maximum(h2, 0.0).astype(h2_ref.dtype)
            m_ref[...] = jnp.full_like(m_ref, _NEG_LARGE)
            l_ref[...] = jnp.zeros_like(l_ref)

        # Layer 3 against the streamed bf16 w3 tile; f32 MXU accumulation.
        logits = jnp.dot(h2_ref[...], w3_ref[...],
                         preferred_element_type=jnp.float32) + b3_ref[...]

        # Stash raw logits for this tile (dynamic index on the LEADING axis
        # only -- no dynamic lane-dim slicing needed).
        logits_ref[j] = logits

        # Online logsumexp update.  NOTE: the padding is TRAILING and carries
        # a -1e30 bias, so padded lanes never win the max and exp() underflows
        # to exactly 0 -- they contribute nothing to l.  (A leading all-pad
        # tile would break this; keep padding trailing.)
        m_prev = m_ref[...]
        m_new = jnp.maximum(m_prev, jnp.max(logits, axis=-1, keepdims=True))
        l_ref[...] = (l_ref[...] * jnp.exp(m_prev - m_new)
                      + jnp.sum(jnp.exp(logits - m_new), axis=-1,
                                keepdims=True))
        m_ref[...] = m_new

        # Epilogue: normalise in-kernel and emit the unpadded output.  All
        # slices below are static (grid_n / n_tile / out_dim are Python ints).
        @pl.when(j == grid_n - 1)
        def _():
            lse = m_ref[...] + jnp.log(l_ref[...])
            for t in range(grid_n):                        # static unroll
                w = min(n_tile, out_dim - t * n_tile)      # tail width static
                out_ref[:, t * n_tile:t * n_tile + w] = (
                    logits_ref[t, :, :w] - lse)

    return kernel


def prepare_params(params, *, n_tile: int = 6144):
    """Pad w3/b3 along out_dim to a multiple of the lane-dense N tile and
    cast w3 to bf16.  Done ONCE at init so the per-call path never re-copies
    or re-casts the large w3.  Returns (padded_params, n_tile); the returned
    n_tile MUST be the one passed to network_forward.
    """
    w1, b1, w2, b2, w3, b3 = params
    out_dim = w3.shape[1]
    n_tile = min(n_tile, _round_up(out_dim, 128))
    n_pad = _round_up(out_dim, n_tile)
    pad = n_pad - out_dim
    if pad:
        # Padding MUST be trailing (see the -1e30 note in the kernel).
        w3 = jnp.pad(w3, ((0, 0), (0, pad)))                      # zero cols
        b3 = jnp.pad(b3, ((0, 0), (0, pad)),
                     constant_values=_NEG_LARGE)                  # mask logits
    # bf16 weight stream (halves HBM bytes); accumulation stays f32 in-kernel.
    w3 = w3.astype(jnp.bfloat16)
    return (w1, b1, w2, b2, w3, b3), n_tile


def network_forward(x, padded_params, out_dim, *, n_tile):
    """x: (B, in_dim) f32 -> (B*out_dim//(60*201), 60, 201) f32 log-probs."""
    w1, b1, w2, b2, w3, b3 = padded_params
    B, in_dim = x.shape
    h1_dim = w1.shape[1]
    h2_dim = w2.shape[1]
    n_pad = w3.shape[1]
    # n_tile must be the value returned by prepare_params for these params.
    assert n_pad % n_tile == 0, (n_pad, n_tile)
    grid_n = n_pad // n_tile

    kernel = _make_mlp_lse_kernel(n_tile, out_dim, grid_n)

    # Advisory cost hint: this op is bandwidth-heavy, FLOP-light.
    bytes_accessed = int(
        w3.size * w3.dtype.itemsize            # dominant bf16 w3 stream
        + (w1.size + w2.size + b1.size + b2.size + b3.size + x.size) * 4
        + B * out_dim * 4)                     # output writeback
    flops = int(2 * B * (in_dim * h1_dim + h1_dim * h2_dim + h2_dim * n_pad))
    cost = pl.CostEstimate(flops=flops,
                           transcendentals=int(B * n_pad),
                           bytes_accessed=bytes_accessed)

    out2d = pl.pallas_call(
        kernel,
        out_shape=jax.ShapeDtypeStruct((B, out_dim), jnp.float32),
        grid_spec=pltpu.PrefetchScalarGridSpec(
            num_scalar_prefetch=0,
            grid=(grid_n,),
            in_specs=[
                # Small operands: constant index_map -> loaded once, resident.
                pl.BlockSpec((B, in_dim), lambda j: (0, 0)),
                pl.BlockSpec((in_dim, h1_dim), lambda j: (0, 0)),
                pl.BlockSpec((1, h1_dim), lambda j: (0, 0)),
                pl.BlockSpec((h1_dim, h2_dim), lambda j: (0, 0)),
                pl.BlockSpec((1, h2_dim), lambda j: (0, 0)),
                # Large w3 (bf16) / b3 (f32): streamed tile-by-tile along the
                # padded out_dim; BlockSpec double-buffers the DMA.
                pl.BlockSpec((h2_dim, n_tile), lambda j: (0, j)),
                pl.BlockSpec((1, n_tile), lambda j: (0, j)),
            ],
            # Unpadded output, resident across the reduction axis; written to
            # HBM once after the last grid step.
            out_specs=pl.BlockSpec((B, out_dim), lambda j: (0, 0)),
            scratch_shapes=[
                pltpu.VMEM((grid_n, B, n_tile), jnp.float32),  # raw logits
                pltpu.VMEM((B, h2_dim), jnp.bfloat16),         # h2 (resident)
                pltpu.VMEM((B, 1), jnp.float32),               # running max m
                pltpu.VMEM((B, 1), jnp.float32),               # running sum l
            ],
        ),
        compiler_params=pltpu.CompilerParams(
            dimension_semantics=("arbitrary",)),  # N axis carries the LSE
        cost_estimate=cost,
    )(x, w1, b1, w2, b2, w3, b3)

    # Contiguous reshape only -- no extra elementwise / slice pass.
    return out2d.reshape(-1, 60, 201)


def init_params(key, in_dim, out_dim):
    """Deterministic PyTorch-style uniform(-1/sqrt(fan_in), 1/sqrt(fan_in))."""
    ks = jax.random.split(key, 6)

    def lin(kw, kb, fan_in, fan_out):
        bound = 1.0 / jnp.sqrt(fan_in)
        w = jax.random.uniform(kw, (fan_in, fan_out), jnp.float32,
                               -bound, bound)
        b = jax.random.uniform(kb, (1, fan_out), jnp.float32, -bound, bound)
        return w, b

    w1, b1 = lin(ks[0], ks[1], in_dim, 512)
    w2, b2 = lin(ks[2], ks[3], 512, 256)
    w3, b3 = lin(ks[4], ks[5], 256, out_dim)
    return (w1, b1, w2, b2, w3, b3)


def _reference_f32(x, params):
    """Spec-faithful f32 reference (matches the PyTorch module)."""
    w1, b1, w2, b2, w3, b3 = params
    h1 = jnp.maximum(x @ w1 + b1, 0.0)
    h2 = jnp.maximum(h1 @ w2 + b2, 0.0)
    logits = h2 @ w3 + b3
    return jax.nn.log_softmax(logits, axis=-1).reshape(-1, 60, 201)


def _reference_matched(x, padded_params, out_dim):
    """Reference applying the same bf16 quantisation as the kernel."""
    w1, b1, w2, b2, w3, b3 = padded_params
    h1 = jnp.maximum(
        jnp.dot(x, w1, preferred_element_type=jnp.float32) + b1, 0.0)
    h2 = jnp.maximum(
        jnp.dot(h1, w2, preferred_element_type=jnp.float32) + b2, 0.0)
    logits = jnp.dot(h2.astype(jnp.bfloat16), w3,
                     preferred_element_type=jnp.float32) + b3
    out = jax.nn.log_softmax(logits, axis=-1)
    return out[:, :out_dim].reshape(-1, 60, 201)


if __name__ == "__main__":
    key = jax.random.PRNGKey(0)
    kx, kp = jax.random.split(key)

    B = 2
    in_dim = 32
    out_dim = 60 * 201  # required so reshape(-1, 60, 201) is exact

    x = jax.random.normal(kx, (B, in_dim), jnp.float32)
    params = init_params(kp, in_dim, out_dim)

    padded_params, n_tile = prepare_params(params)
    fwd = jax.jit(functools.partial(network_forward,
                                    out_dim=out_dim, n_tile=n_tile))

    out = jax.block_until_ready(fwd(x, padded_params))
    assert out.shape == (B, 60, 201), out.shape

    # Tight check vs. a reference with the same bf16 w3 / bf16 h2 quantisation.
    ref_q = jax.block_until_ready(_reference_matched(x, padded_params, out_dim))
    assert jnp.allclose(out, ref_q, atol=5e-3, rtol=5e-3), \
        "mismatch vs matched (bf16-w3) reference"

    # Loose sanity check vs. the pure f32 spec (expected bf16 precision delta).
    ref = jax.block_until_ready(_reference_f32(x, params))
    assert jnp.allclose(out, ref, atol=2e-2, rtol=2e-3), \
        "mismatch vs f32 reference"

    print("KERNEL_OK")
</pallas_src>

<mosaic_0001>
module attributes {stable_mosaic.version = 11 : i64} {
  func.func @kernel(%arg0: i32, %arg1: memref<2x32xf32, #tpu.memory_space<vmem>>, %arg2: memref<32x512xf32, #tpu.memory_space<vmem>>, %arg3: memref<1x512xf32, #tpu.memory_space<vmem>>, %arg4: memref<512x256xf32, #tpu.memory_space<vmem>>, %arg5: memref<1x256xf32, #tpu.memory_space<vmem>>, %arg6: memref<256x6144xbf16, #tpu.memory_space<vmem>>, %arg7: memref<1x6144xf32, #tpu.memory_space<vmem>>, %arg8: memref<2x12060xf32, #tpu.memory_space<vmem>>, %arg9: memref<2x2x6144xf32, #tpu.memory_space<vmem>>, %arg10: memref<2x256xbf16, #tpu.memory_space<vmem>>, %arg11: memref<2x1xf32, #tpu.memory_space<vmem>>, %arg12: memref<2x1xf32, #tpu.memory_space<vmem>>) attributes {dimension_semantics = [#tpu.dimension_semantics<arbitrary>], iteration_bounds = array<i64: 2>, scalar_prefetch = 0 : i64, scratch_operands = 4 : i64, tpu.core_type = #tpu.core_type<tc>, window_params = [{pipeline_mode = #tpu.pipeline_mode<synchronous>, transform_indices = @transform_0, window_bounds = array<i64: 2, 32>}, {pipeline_mode = #tpu.pipeline_mode<synchronous>, transform_indices = @transform_1, window_bounds = array<i64: 32, 512>}, {pipeline_mode = #tpu.pipeline_mode<synchronous>, transform_indices = @transform_2, window_bounds = array<i64: 1, 512>}, {pipeline_mode = #tpu.pipeline_mode<synchronous>, transform_indices = @transform_3, window_bounds = array<i64: 512, 256>}, {pipeline_mode = #tpu.pipeline_mode<synchronous>, transform_indices = @transform_4, window_bounds = array<i64: 1, 256>}, {transform_indices = @transform_5, window_bounds = array<i64: 256, 6144>}, {transform_indices = @transform_6, window_bounds = array<i64: 1, 6144>}, {pipeline_mode = #tpu.pipeline_mode<synchronous>, transform_indices = @transform_7, window_bounds = array<i64: 2, 12060>}]} {
    %c0_i32 = arith.constant 0 : i32
    %0 = arith.cmpi eq, %arg0, %c0_i32 : i32
    %1 = arith.extui %0 : i1 to i32
    %c0_i32_0 = arith.constant 0 : i32
    %2 = arith.cmpi ne, %1, %c0_i32_0 : i32
    scf.if %2 {
      %c0_19 = arith.constant 0 : index
      %c0_20 = arith.constant 0 : index
      %32 = vector.load %arg1[%c0_19, %c0_20] : memref<2x32xf32, #tpu.memory_space<vmem>>, vector<2x32xf32>
      %c0_21 = arith.constant 0 : index
      %c0_22 = arith.constant 0 : index
      %33 = vector.load %arg2[%c0_21, %c0_22] : memref<32x512xf32, #tpu.memory_space<vmem>>, vector<32x512xf32>
      %cst_23 = arith.constant dense<0.000000e+00> : vector<2x512xf32>
      %34 = tpu.matmul %32, %33, %cst_23 {dimension_numbers = #tpu.dot_dimension_numbers<[1], [0], [0], [1], [0, 0, 1, 1], [], []>} : vector<2x32xf32>, vector<32x512xf32>, vector<2x512xf32> -> vector<2x512xf32>
      %c0_24 = arith.constant 0 : index
      %c0_25 = arith.constant 0 : index
      %35 = vector.load %arg3[%c0_24, %c0_25] : memref<1x512xf32, #tpu.memory_space<vmem>>, vector<1x512xf32>
      %36 = vector.broadcast %35 : vector<1x512xf32> to vector<2x512xf32>
      %37 = arith.addf %34, %36 : vector<2x512xf32>
      %cst_26 = arith.constant 0.000000e+00 : f32
      %38 = vector.broadcast %cst_26 : f32 to vector<2x512xf32>
      %39 = arith.maximumf %37, %38 : vector<2x512xf32>
      %c0_27 = arith.constant 0 : index
      %c0_28 = arith.constant 0 : index
      %40 = vector.load %arg4[%c0_27, %c0_28] : memref<512x256xf32, #tpu.memory_space<vmem>>, vector<512x256xf32>
      %cst_29 = arith.constant dense<0.000000e+00> : vector<2x256xf32>
      %41 = tpu.matmul %39, %40, %cst_29 {dimension_numbers = #tpu.dot_dimension_numbers<[1], [0], [0], [1], [0, 0, 1, 1], [], []>} : vector<2x512xf32>, vector<512x256xf32>, vector<2x256xf32> -> vector<2x256xf32>
      %c0_30 = arith.constant 0 : index
      %c0_31 = arith.constant 0 : index
      %42 = vector.load %arg5[%c0_30, %c0_31] : memref<1x256xf32, #tpu.memory_space<vmem>>, vector<1x256xf32>
      %43 = vector.broadcast %42 : vector<1x256xf32> to vector<2x256xf32>
      %44 = arith.addf %41, %43 : vector<2x256xf32>
      %cst_32 = arith.constant 0.000000e+00 : f32
      %45 = vector.broadcast %cst_32 : f32 to vector<2x256xf32>
      %46 = arith.maximumf %44, %45 : vector<2x256xf32>
      %47 = arith.truncf %46 : vector<2x256xf32> to vector<2x256xbf16>
      %c0_33 = arith.constant 0 : index
      %c0_34 = arith.constant 0 : index
      %48 = vector.load %arg10[%c0_33, %c0_34] : memref<2x256xbf16, #tpu.memory_space<vmem>>, vector<2x256xbf16>
      tpu.vector_store %arg10[%c0_33, %c0_34], %47 {strides = array<i32>} : memref<2x256xbf16, #tpu.memory_space<vmem>>, vector<2x256xbf16>,
      %cst_35 = arith.constant -1.000000e+30 : f32
      %49 = vector.broadcast %cst_35 : f32 to vector<2x1xf32>
      %c0_36 = arith.constant 0 : index
      %c0_37 = arith.constant 0 : index
      %50 = vector.load %arg11[%c0_36, %c0_37] : memref<2x1xf32, #tpu.memory_space<vmem>>, vector<2x1xf32>
      tpu.vector_store %arg11[%c0_36, %c0_37], %49 {strides = array<i32>} : memref<2x1xf32, #tpu.memory_space<vmem>>, vector<2x1xf32>,
      %cst_38 = arith.constant 0.000000e+00 : f32
      %51 = vector.broadcast %cst_38 : f32 to vector<2x1xf32>
      %c0_39 = arith.constant 0 : index
      %c0_40 = arith.constant 0 : index
      %52 = vector.load %arg12[%c0_39, %c0_40] : memref<2x1xf32, #tpu.memory_space<vmem>>, vector<2x1xf32>
      tpu.vector_store %arg12[%c0_39, %c0_40], %51 {strides = array<i32>} : memref<2x1xf32, #tpu.memory_space<vmem>>, vector<2x1xf32>,
    } else {
    }
    %c0 = arith.constant 0 : index
    %c0_1 = arith.constant 0 : index
    %3 = vector.load %arg10[%c0, %c0_1] : memref<2x256xbf16, #tpu.memory_space<vmem>>, vector<2x256xbf16>
    %c0_2 = arith.constant 0 : index
    %c0_3 = arith.constant 0 : index
    %4 = vector.load %arg6[%c0_2, %c0_3] : memref<256x6144xbf16, #tpu.memory_space<vmem>>, vector<256x6144xbf16>
    %cst = arith.constant dense<0.000000e+00> : vector<2x6144xf32>
    %5 = tpu.matmul %3, %4, %cst {dimension_numbers = #tpu.dot_dimension_numbers<[1], [0], [0], [1], [0, 0, 1, 1], [], []>} : vector<2x256xbf16>, vector<256x6144xbf16>, vector<2x6144xf32> -> vector<2x6144xf32>
    %c0_4 = arith.constant 0 : index
    %c0_5 = arith.constant 0 : index
    %6 = vector.load %arg7[%c0_4, %c0_5] : memref<1x6144xf32, #tpu.memory_space<vmem>>, vector<1x6144xf32>
    %7 = vector.broadcast %6 : vector<1x6144xf32> to vector<2x6144xf32>
    %8 = arith.addf %5, %7 : vector<2x6144xf32>
    %9 = arith.index_cast %arg0 : i32 to index
    %c0_6 = arith.constant 0 : index
    %c0_7 = arith.constant 0 : index
    %10 = vector.load %arg9[%9, %c0_6, %c0_7] : memref<2x2x6144xf32, #tpu.memory_space<vmem>>, vector<1x2x6144xf32>
    %11 = vector.shape_cast %10 : vector<1x2x6144xf32> to vector<2x6144xf32>
    %12 = vector.shape_cast %8 : vector<2x6144xf32> to vector<1x2x6144xf32>
    tpu.vector_store %arg9[%9, %c0_6, %c0_7], %12 {strides = array<i32>} : memref<2x2x6144xf32, #tpu.memory_space<vmem>>, vector<1x2x6144xf32>,
    %c0_8 = arith.constant 0 : index
    %c0_9 = arith.constant 0 : index
    %13 = vector.load %arg11[%c0_8, %c0_9] : memref<2x1xf32, #tpu.memory_space<vmem>>, vector<2x1xf32>
    %cst_10 = arith.constant dense<0xFF800000> : vector<2xf32>
    %14 = vector.multi_reduction <maximumf>, %8, %cst_10 [1] : vector<2x6144xf32> to vector<2xf32>
    %15 = vector.shape_cast %14 : vector<2xf32> to vector<2x1xf32>
    %16 = arith.maximumf %13, %15 : vector<2x1xf32>
    %c0_11 = arith.constant 0 : index
    %c0_12 = arith.constant 0 : index
    %17 = vector.load %arg12[%c0_11, %c0_12] : memref<2x1xf32, #tpu.memory_space<vmem>>, vector<2x1xf32>
    %18 = arith.subf %13, %16 : vector<2x1xf32>
    %19 = math.exp %18 : vector<2x1xf32>
    %20 = arith.mulf %17, %19 : vector<2x1xf32>
    %21 = vector.broadcast %16 : vector<2x1xf32> to vector<2x6144xf32>
    %22 = arith.subf %8, %21 : vector<2x6144xf32>
    %23 = math.exp %22 : vector<2x6144xf32>
    %cst_13 = arith.constant dense<0.000000e+00> : vector<2xf32>
    %24 = vector.multi_reduction <add>, %23, %cst_13 [1] : vector<2x6144xf32> to vector<2xf32>
    %25 = vector.shape_cast %24 : vector<2xf32> to vector<2x1xf32>
    %26 = arith.addf %20, %25 : vector<2x1xf32>
    %c0_14 = arith.constant 0 : index
    %c0_15 = arith.constant 0 : index
    %27 = vector.load %arg12[%c0_14, %c0_15] : memref<2x1xf32, #tpu.memory_space<vmem>>, vector<2x1xf32>
    tpu.vector_store %arg12[%c0_14, %c0_15], %26 {strides = array<i32>} : memref<2x1xf32, #tpu.memory_space<vmem>>, vector<2x1xf32>,
    %c0_16 = arith.constant 0 : index
    %c0_17 = arith.constant 0 : index
    %28 = vector.load %arg11[%c0_16, %c0_17] : memref<2x1xf32, #tpu.memory_space<vmem>>, vector<2x1xf32>
    tpu.vector_store %arg11[%c0_16, %c0_17], %16 {strides = array<i32>} : memref<2x1xf32, #tpu.memory_space<vmem>>, vector<2x1xf32>,
    %c1_i32 = arith.constant 1 : i32
    %29 = arith.cmpi eq, %arg0, %c1_i32 : i32
    %30 = arith.extui %29 : i1 to i32
    %c0_i32_18 = arith.constant 0 : i32
    %31 = arith.cmpi ne, %30, %c0_i32_18 : i32
    scf.if %31 {
      %c0_19 = arith.constant 0 : index
      %c0_20 = arith.constant 0 : index
      %32 = vector.load %arg11[%c0_19, %c0_20] : memref<2x1xf32, #tpu.memory_space<vmem>>, vector<2x1xf32>
      %c0_21 = arith.constant 0 : index
      %c0_22 = arith.constant 0 : index
      %33 = vector.load %arg12[%c0_21, %c0_22] : memref<2x1xf32, #tpu.memory_space<vmem>>, vector<2x1xf32>
      %34 = math.log %33 : vector<2x1xf32>
      %35 = arith.addf %32, %34 : vector<2x1xf32>
      %c0_23 = arith.constant 0 : index
      %c0_24 = arith.constant 0 : index
      %c0_25 = arith.constant 0 : index
      %36 = vector.load %arg9[%c0_23, %c0_24, %c0_25] : memref<2x2x6144xf32, #tpu.memory_space<vmem>>, vector<1x2x6144xf32>
      %37 = vector.shape_cast %36 : vector<1x2x6144xf32> to vector<2x6144xf32>
      %38 = vector.broadcast %35 : vector<2x1xf32> to vector<2x6144xf32>
      %39 = arith.subf %37, %38 : vector<2x6144xf32>
      %c0_26 = arith.constant 0 : index
      %c0_27 = arith.constant 0 : index
      %40 = vector.load %arg8[%c0_26, %c0_27] : memref<2x12060xf32, #tpu.memory_space<vmem>>, vector<2x6144xf32>
      tpu.vector_store %arg8[%c0_26, %c0_27], %39 {strides = array<i32>} : memref<2x12060xf32, #tpu.memory_space<vmem>>, vector<2x6144xf32>,
      %c1 = arith.constant 1 : index
      %c0_28 = arith.constant 0 : index
      %c0_29 = arith.constant 0 : index
      %41 = vector.load %arg9[%c1, %c0_28, %c0_29] : memref<2x2x6144xf32, #tpu.memory_space<vmem>>, vector<1x2x5916xf32>
      %42 = vector.shape_cast %41 : vector<1x2x5916xf32> to vector<2x5916xf32>
      %43 = vector.broadcast %35 : vector<2x1xf32> to vector<2x5916xf32>
      %44 = arith.subf %42, %43 : vector<2x5916xf32>
      %c0_30 = arith.constant 0 : index
      %c6144 = arith.constant 6144 : index
      %45 = vector.load %arg8[%c0_30, %c6144] : memref<2x12060xf32, #tpu.memory_space<vmem>>, vector<2x5916xf32>
      tpu.vector_store %arg8[%c0_30, %c6144], %44 {strides = array<i32>} : memref<2x12060xf32, #tpu.memory_space<vmem>>, vector<2x5916xf32>,
    } else {
    }
    return
  }
  func.func @transform_0(%arg0: i32) -> (i32, i32) {
    %c0_i32 = arith.constant 0 : i32
    %c0_i32_0 = arith.constant 0 : i32
    %c0_i32_1 = arith.constant 0 : i32
    return %c0_i32, %c0_i32_0 : i32, i32
  }
  func.func @transform_1(%arg0: i32) -> (i32, i32) {
    %c0_i32 = arith.constant 0 : i32
    %c0_i32_0 = arith.constant 0 : i32
    %c0_i32_1 = arith.constant 0 : i32
    return %c0_i32, %c0_i32_0 : i32, i32
  }
  func.func @transform_2(%arg0: i32) -> (i32, i32) {
    %c0_i32 = arith.constant 0 : i32
    %c0_i32_0 = arith.constant 0 : i32
    %c0_i32_1 = arith.constant 0 : i32
    return %c0_i32, %c0_i32_0 : i32, i32
  }
  func.func @transform_3(%arg0: i32) -> (i32, i32) {
    %c0_i32 = arith.constant 0 : i32
    %c0_i32_0 = arith.constant 0 : i32
    %c0_i32_1 = arith.constant 0 : i32
    return %c0_i32, %c0_i32_0 : i32, i32
  }
  func.func @transform_4(%arg0: i32) -> (i32, i32) {
    %c0_i32 = arith.constant 0 : i32
    %c0_i32_0 = arith.constant 0 : i32
    %c0_i32_1 = arith.constant 0 : i32
    return %c0_i32, %c0_i32_0 : i32, i32
  }
  func.func @transform_5(%arg0: i32) -> (i32, i32) {
    %c0_i32 = arith.constant 0 : i32
    %c0_i32_0 = arith.constant 0 : i32
    return %c0_i32, %arg0 : i32, i32
  }
  func.func @transform_6(%arg0: i32) -> (i32, i32) {
    %c0_i32 = arith.constant 0 : i32
    %c0_i32_0 = arith.constant 0 : i32
    return %c0_i32, %arg0 : i32, i32
  }
  func.func @transform_7(%arg0: i32) -> (i32, i32) {
    %c0_i32 = arith.constant 0 : i32
    %c0_i32_0 = arith.constant 0 : i32
    %c0_i32_1 = arith.constant 0 : i32
    return %c0_i32, %c0_i32_0 : i32, i32
  }
}

</mosaic_0001>

<bundles_post_ra>
// kernel: network_forward.1
= control target key start
LH: loop header
LB: loop body
LE: loop exit
PB: predicated region body
PF: predicated region fallthrough
CT: control target
= control target key end

     0   :  { %s10870_s0 = inlined_call_operand.hbm [shape: f32[2,32], index: 0, kind: input, shape index: {}]   ;;  %s10871_s1 = inlined_call_operand.hbm [shape: f32[32,512], index: 1, kind: input, shape index: {}]   ;;  %s10872_s2 = inlined_call_operand.hbm [shape: f32[1,512], index: 2, kind: input, shape index: {}]   ;;  %s10873_s3 = inlined_call_operand.hbm [shape: f32[512,256], index: 3, kind: input, shape index: {}]   ;;  %s10874_s4 = inlined_call_operand.hbm [shape: f32[1,256], index: 4, kind: input, shape index: {}]   ;;  %s10875_s5 = inlined_call_operand.hbm [shape: bf16[256,12288], index: 5, kind: input, shape index: {}]   ;;  %s10876_s6 = inlined_call_operand.hbm [shape: f32[1,12288], index: 6, kind: input, shape index: {}]   ;;  %s10877_s7 = inlined_call_operand.vmem [shape: f32[2,12060], index: 7, kind: output, shape index: {}]  }
   0x1   :  { %10895 = sst [smem:[#allocation27_spill]] %s10871_s1 }
   0x2   :  { %10896 = sst [smem:[#allocation28_spill]] %s10873_s3 }
   0x3   :  { %10897 = sst [smem:[#allocation29_spill]] %s10875_s5 }
   0x4   :  { %12 = vsyncpa [#allocation7], 0 }
   0x5   :  { %13 = vsyncpa [#allocation9], 0 }
   0x6   :  { %14 = vsyncpa [#allocation12], 0 }
   0x7   :  { %15 = vsyncpa [#allocation15], 0 }
   0x8   :  { %17 = vsyncpa [#allocation15 + $0x1], 0  ;;  %s9073_s24 = smov 0   ;;  %s9075_s25 = smov 0  }
   0x9   :  { %s9077_s26 = smov 0   ;;  %s9079_s27 = smov 0  }
   0xa LB: > { %s9092_s28 = sadd.s32 4294967295, %s9009_s27   ;;  %p148_p0 = scmp.ne.s32.totalorder %s9001_s25, %s8997_s24  ;;  %s9009_s27 = sphi %s9079_s27, %s10941_s27   ;;  %s9005_s26 = sphi %s9077_s26, %s10940_s26   ;;  %s9001_s25 = sphi %s9075_s25, %s10939_s25   ;;  %s8997_s24 = sphi %s9073_s24, %s10938_s24  }
   0xb   : > { %p10878_p1 = scmp.eq.s32.totalorder %s9092_s28, 0  ;;  %p7603_p2 = scmp.ge.s32.totalorder %s9009_s27, 1 }
   0xc   : > { %p206_p3 = scmp.lt.s32.totalorder %s9009_s27, 3  ;;  %s9011_s8 = smov [#allocation8]  }
   0xd   : > { %p9101_p5 = por %p10878_p1, %p148_p0  ;;  %s229_s9 = sshll.u32 %s9011_s8, 4  ;;  %s230_s9 = int_to_ptr.vmem [resolvable:$true] %s229_s9 }
   0xe   : > { %p9105_p6 = pnand %p7603_p2, %p206_p3  ;;  %s9012_s11 = smov [#allocation11]  }
   0xf   : > { %s10898_s29 = scalar_select %p9101_p5, 1, 0 }
  0x10   : > { %s10899_s30 = scalar_select %p9105_p6, 1, 0 }
  0x11   : > { %p8575_p7 = pneg %p9105_p6  ;;  %s253_s12 = sshll.u32 %s9012_s11, 4  ;;  %s9117_s12 = int_to_ptr.vmem [resolvable:$true] %s253_s12 }
  0x12   : > { %s10901_s1 = sld [smem:[#allocation27_spill]] }
  0x13   : > { %p9113_p8 = pnand %p8575_p7, %p10878_p1 }
  0x15   : > { %s10900_s10 = scalar_select %p9113_p8, 1, 0 }
  0x16   : > { %p9127_p10 = pneg %p9113_p8 }
  0x18   : > { %s8763_s15 = scalar_lea.hbm %s10901_s1, 2048 }
  0x19   : > { %p8764_p9 = scmp.ne.s32.totalorder %s10901_s1, %s8763_s15  ;;  %p8770_p13 = scmp.lt.u32.totalorder %s8763_s15, %s10901_s1 }
  0x1b   : > { %p8766_p11 = pnand %p9127_p10, %p8764_p9 }
  0x1d   : > { %p8767_p12 = pneg %p8766_p11 }
  0x1f   : > { %p8772_p0 = pnand %p8770_p13, %p8767_p12 }
  0x21   : > { %8775 = shalt.err (!%p8772_p0)
}
  0x22   : > { %s8776_s21 = scalar_lea.vmem %s230_s9, 2048  ;;  %p8784_p4 = scmp.lt.s32.totalorder %s230_s9, %s230_s9 }
  0x23   : > { %p8777_p2 = scmp.ne.s32.totalorder %s230_s9, %s8776_s21  ;;  %p8785_p1 = scmp.lt.s32.totalorder %s8776_s21, %s8776_s21 }
  0x25   : > { %p8779_p3 = pnand %p8777_p2, %p9127_p10  ;;  %p8786_p5 = por %p8785_p1, %p8784_p4 }
  0x27   : > { %p8780_p7 = pneg %p8779_p3 }
  0x29   : > { %p8787_p6 = pnand %p8786_p5, %p8780_p7 }
  0x2b   : > { %8790 = shalt.err (!%p8787_p6)
}
  0x2c   : > { %s9013_s22 = smov 512   ;;  %s9014_s23 = smov 32  }
  0x2d   : > { %8581 = dma.hbm_to_vmem [thread:$0]  (!%p9113_p8), %s10901_s1, 2048, %s230_s9, [#allocation9], %s9013_s22, %s9013_s22, %s9014_s23  }
  0x2e   : > { %s10903_s3 = sld [smem:[#allocation28_spill]] }
  0x34   : > { %s8791_s14 = scalar_lea.hbm %s10903_s3, 16384 }
  0x35   : > { %p8792_p9 = scmp.ne.s32.totalorder %s10903_s3, %s8791_s14  ;;  %p8798_p5 = scmp.lt.u32.totalorder %s8791_s14, %s10903_s3 }
  0x37   : > { %p8794_p1 = pnand %p8792_p9, %p9127_p10 }
  0x39   : > { %p8795_p4 = pneg %p8794_p1 }
  0x3b   : > { %p8800_p6 = pnand %p8798_p5, %p8795_p4 }
  0x3d   : > { %8803 = shalt.err (!%p8800_p6)
}
  0x3e   : > { %s8804_s9 = scalar_lea.vmem %s9117_s12, 16384  ;;  %p8812_p0 = scmp.lt.s32.totalorder %s9117_s12, %s9117_s12 }
  0x3f   : > { %p8805_p11 = scmp.ne.s32.totalorder %s9117_s12, %s8804_s9  ;;  %p8813_p2 = scmp.lt.s32.totalorder %s8804_s9, %s8804_s9 }
  0x41   : > { %p8807_p12 = pnand %p8805_p11, %p9127_p10  ;;  %p8814_p3 = por %p8813_p2, %p8812_p0 }
  0x43   : > { %p8808_p13 = pneg %p8807_p12 }
  0x45   : > { %p8815_p7 = pnand %p8814_p3, %p8808_p13 }
  0x47   : > { %8818 = shalt.err (!%p8815_p7)
}
  0x48   : > { %s9015_s20 = smov 256   ;;  %s9016_s21 = smov 16  }
  0x49   : > { %8587 = dma.hbm_to_vmem [thread:$0]  (!%p9113_p8), %s10903_s3, 16384, %s9117_s12, [#allocation12], %s9015_s20, %s9015_s20, %s9016_s21  }
  0x4a   : > { %s9167_s24 = sadd.s32 1, %s9009_s27   ;;  %s135_s11 = sadd.s32 1, %s9005_s26 }
  0x4b   : > { %s132_s8 = ssub.s32 %s9009_s27, %s9167_s24  ;;  %p142_p1 = scmp.ne.s32.totalorder %s9005_s26, %s9001_s25 }
  0x4c   : > { %p133_p9 = scmp.eq.s32.totalorder %s132_s8, 0  ;;  %p143_p4 = scmp.eq.s32.totalorder %s9009_s27, 0 }
  0x4d   : > { %p8603_p6 = scmp.lt.s32.totalorder %s9009_s27, 2  ;;  %s278_s14 = sand.u32 1, %s9009_s27  }
  0x4e   : > { %s9176_s13 = scalar_select %p133_p9, %s9005_s26, %s135_s11  }
  0x4f   : > { %p144_p5 = por %p143_p4, %p142_p1  ;;  %s10881_s15 = sand.u32 1, %s9005_s26  }
  0x50   : > { %10904 = sst [smem:[#allocation21_spill]] %s9176_s13  ;;  %s8547_s16 = smul.u32 6144, %s10881_s15 }
  0x51   : > { %s8396_s17 = smul.u32 3072, %s9009_s27  ;;  %p9184_p11 = pnand %p8603_p6, %p144_p5 }
  0x52   : > { %s10906_s5 = sld [smem:[#allocation29_spill]]  ;;  %s282_s21 = scalar_lea.vmem [#allocation14], %s8547_s16 }
  0x53   : > { %s10905_s19 = scalar_select %p9184_p11, 1, 0 }
  0x54   : > { %s289_s22 = sshll.u32 %s282_s21, 4  ;;  %s9195_s23 = scalar_lea.sflag [#allocation15], %s278_s14  ;;  %s9193_s22 = int_to_ptr.vmem [resolvable:$true] %s289_s22 }
  0x55   : > { %p10884_p13 = pneg %p9184_p11 }
  0x58   : > { %s9191_s20 = scalar_lea.hbm %s10906_s5, %s8396_s17  ;;  %s8824_s12 = scalar_lea.hbm %s10906_s5, 196608 }
  0x59   : > { %s8819_s8 = scalar_lea.hbm %s9191_s20, 98304  ;;  %p8825_p3 = scmp.lt.u32.totalorder %s9191_s20, %s10906_s5 }
  0x5a   : > { %p8820_p12 = scmp.ne.s32.totalorder %s9191_s20, %s8819_s8  ;;  %p8826_p7 = scmp.lt.u32.totalorder %s8824_s12, %s8819_s8 }
  0x5b   : > { %p8828_p1 = scmp.lt.u32.totalorder %s8819_s8, %s9191_s20 }
  0x5c   : > { %p8822_p0 = pnand %p10884_p13, %p8820_p12  ;;  %p8827_p9 = por %p8826_p7, %p8825_p3 }
  0x5e   : > { %p8823_p2 = pneg %p8822_p0  ;;  %p8829_p4 = por %p8828_p1, %p8827_p9 }
  0x60   : > { %p8830_p5 = pnand %p8829_p4, %p8823_p2 }
  0x62   : > { %8833 = shalt.err (!%p8830_p5)
}
  0x63   : > { %s8834_s14 = scalar_lea.vmem %s9193_s22, 98304  ;;  %s9017_s16 = smov [#allocation14]  }
  0x64   : > { %p8835_p6 = scmp.ne.s32.totalorder %s9193_s22, %s8834_s14  ;;  %s8839_s21 = sshll.u32 %s9017_s16, 4  ;;  %s8840_s21 = int_to_ptr.vmem [resolvable:$false] %s8839_s21 }
  0x65   : > { %s8841_s15 = scalar_lea.vmem %s8840_s21, 196608  ;;  %p8842_p8 = scmp.lt.s32.totalorder %s9193_s22, %s8840_s21 }
  0x66   : > { %p8837_p12 = pnand %p8835_p6, %p10884_p13  ;;  %p8843_p3 = scmp.lt.s32.totalorder %s8841_s15, %s8834_s14 }
  0x68   : > { %p8838_p0 = pneg %p8837_p12  ;;  %p8844_p7 = por %p8843_p3, %p8842_p8 }
  0x6a   : > { %p8845_p9 = pnand %p8844_p7, %p8838_p0 }
  0x6c   : > { %8848 = shalt.err (!%p8845_p9)
}
  0x6d   : > { %s9018_s8 = smov 6144   ;;  %s9019_s11 = smov 3072  }
  0x6e   : > { %s9020_s17 = smov 192   ;;  %s9021_s12 = smov [#allocation6]  }
  0x6f   : > { %8594 = dma.hbm_to_vmem [thread:$0]  (!%p9184_p11), %s9191_s20, 98304, %s9193_s22, %s9195_s23, %s9018_s8, %s9019_s11, %s9020_s17  }
  0x70   : > { %s219_s9 = sshll.u32 %s9021_s12, 4  ;;  %s9022_s16 = smov [#allocation10]   ;;  %s220_s9 = int_to_ptr.vmem [resolvable:$true] %s219_s9 }
  0x71   : > { %s243_s1 = sshll.u32 %s9022_s16, 4  ;;  %s8849_s15 = scalar_lea.hbm %s10870_s0, 32  ;;  %s9223_s1 = int_to_ptr.vmem [resolvable:$true] %s243_s1 }
  0x72   : > { %p8850_p8 = scmp.ne.s32.totalorder %s10870_s0, %s8849_s15  ;;  %p8856_p4 = scmp.lt.u32.totalorder %s8849_s15, %s10870_s0 }
  0x74   : > { %p8852_p2 = pnand %p8850_p8, %p9127_p10 }
  0x76   : > { %p8853_p1 = pneg %p8852_p2 }
  0x78   : > { %p8858_p5 = pnand %p8856_p4, %p8853_p1 }
  0x7a   : > { %8861 = shalt.err (!%p8858_p5)
}
  0x7b   : > { %s8862_s22 = scalar_lea.vmem %s220_s9, 32  ;;  %p8870_p3 = scmp.lt.s32.totalorder %s220_s9, %s220_s9 }
  0x7c   : > { %p8863_p6 = scmp.ne.s32.totalorder %s220_s9, %s8862_s22  ;;  %p8871_p7 = scmp.lt.s32.totalorder %s8862_s22, %s8862_s22 }
  0x7e   : > { %p8865_p12 = pnand %p8863_p6, %p9127_p10  ;;  %p8872_p9 = por %p8871_p7, %p8870_p3 }
  0x80   : > { %p8866_p0 = pneg %p8865_p12 }
  0x82   : > { %p8873_p13 = pnand %p8872_p9, %p8866_p0 }
  0x84   : > { %8876 = shalt.err (!%p8873_p13)
}
  0x85   : > { %p10907_p8 = scmp.ne.s32.totalorder %s10900_s10, 0  ;;  %s8877_s11 = scalar_lea.hbm %s10872_s2, 64 }
  0x86   : > { %p8878_p2 = scmp.ne.s32.totalorder %s10872_s2, %s8877_s11  ;;  %p8884_p13 = scmp.lt.u32.totalorder %s8877_s11, %s10872_s2 }
  0x87   : > { %8578 = dma.hbm_to_vmem [thread:$0]  (!%p10907_p8), %s10870_s0, 32, %s220_s9, [#allocation7]  }
  0x88   : > { %p8880_p1 = pnand %p8878_p2, %p9127_p10 }
  0x8a   : > { %p8881_p4 = pneg %p8880_p1 }
  0x8c   : > { %p8886_p5 = pnand %p8884_p13, %p8881_p4 }
  0x8e   : > { %8889 = shalt.err (!%p8886_p5)
}
  0x8f   : > { %s8890_s9 = scalar_lea.vmem %s9223_s1, 64  ;;  %p8898_p3 = scmp.lt.s32.totalorder %s9223_s1, %s9223_s1 }
  0x90   : > { %p8891_p6 = scmp.ne.s32.totalorder %s9223_s1, %s8890_s9  ;;  %p8899_p7 = scmp.lt.s32.totalorder %s8890_s9, %s8890_s9 }
  0x92   : > { %p8893_p12 = pnand %p8891_p6, %p9127_p10  ;;  %p8900_p9 = por %p8899_p7, %p8898_p3 }
  0x94   : > { %p8894_p0 = pneg %p8893_p12 }
  0x96   : > { %p8901_p2 = pnand %p8900_p9, %p8894_p0 }
  0x98   : > { %8904 = shalt.err (!%p8901_p2)
}
  0x99   : > { %8584 = dma.hbm_to_vmem [thread:$0]  (!%p10907_p8), %s10872_s2, 64, %s9223_s1, [#allocation9]  }
  0x9a   : > { %s10908_s20 = sand.u32 1, %s9005_s26   ;;  %s9023_s3 = smov [#allocation13]  }
  0x9b   : > { %s8548_s22 = smul.u32 48, %s10908_s20  ;;  %s267_s5 = sshll.u32 %s9023_s3, 4  ;;  %s268_s5 = int_to_ptr.vmem [resolvable:$true] %s267_s5 }
  0x9c   : > { %s8397_s13 = smul.u32 768, %s9009_s27  ;;  %s8905_s17 = scalar_lea.hbm %s10874_s4, 32 }
  0x9d   : > { %p8906_p1 = scmp.ne.s32.totalorder %s10874_s4, %s8905_s17  ;;  %p8912_p5 = scmp.lt.u32.totalorder %s8905_s17, %s10874_s4 }
  0x9f   : > { %p8908_p4 = pnand %p8906_p1, %p9127_p10 }
  0xa1   : > { %p8909_p13 = pneg %p8908_p4 }
  0xa3   : > { %p8914_p6 = pnand %p8912_p5, %p8909_p13 }
  0xa5   : > { %8917 = shalt.err (!%p8914_p6)
}
  0xa6   : > { %s8918_s1 = scalar_lea.vmem %s268_s5, 32  ;;  %p8926_p7 = scmp.lt.s32.totalorder %s268_s5, %s268_s5 }
  0xa7   : > { %p8919_p12 = scmp.ne.s32.totalorder %s268_s5, %s8918_s1  ;;  %p8927_p9 = scmp.lt.s32.totalorder %s8918_s1, %s8918_s1 }
  0xa9   : > { %p8921_p0 = pnand %p8919_p12, %p9127_p10  ;;  %p8928_p2 = por %p8927_p9, %p8926_p7 }
  0xab   : > { %p8922_p3 = pneg %p8921_p0 }
  0xad   : > { %p8929_p11 = pnand %p8928_p2, %p8922_p3 }
  0xaf   : > { %8932 = shalt.err (!%p8929_p11)
}
  0xb0   : > { %8590 = dma.hbm_to_vmem [thread:$0]  (!%p10907_p8), %s10874_s4, 32, %s268_s5, [#allocation12]  }
  0xb1   : > { %s9290_s3 = scalar_lea.hbm %s10876_s6, %s8397_s13  ;;  %s303_s18 = scalar_lea.vmem [#allocation16], %s8548_s22 }
  0xb2   : > { %s311_s8 = sshll.u32 %s303_s18, 4  ;;  %s8933_s11 = scalar_lea.hbm %s9290_s3, 768  ;;  %s312_s8 = int_to_ptr.vmem [resolvable:$true] %s311_s8 }
  0xb3   : > { %p8934_p10 = scmp.ne.s32.totalorder %s9290_s3, %s8933_s11  ;;  %p10909_p11 = scmp.ne.s32.totalorder %s10905_s19, 0 }
  0xb4   : > { %s8938_s17 = scalar_lea.hbm %s10876_s6, 1536  ;;  %p8939_p8 = scmp.lt.u32.totalorder %s9290_s3, %s10876_s6 }
  0xb5   : > { %p10910_p1 = pneg %p10909_p11  ;;  %p8940_p5 = scmp.lt.u32.totalorder %s8938_s17, %s8933_s11 }
  0xb6   : > { %p8942_p12 = scmp.lt.u32.totalorder %s8933_s11, %s9290_s3 }
  0xb7   : > { %p8936_p4 = pnand %p8934_p10, %p10910_p1  ;;  %p8941_p6 = por %p8940_p5, %p8939_p8 }
  0xb9   : > { %p8937_p13 = pneg %p8936_p4  ;;  %p8943_p0 = por %p8942_p12, %p8941_p6 }
  0xbb   : > { %p8944_p3 = pnand %p8943_p0, %p8937_p13 }
  0xbd   : > { %8947 = shalt.err (!%p8944_p3)
}
  0xbe   : > { %s8948_s22 = scalar_lea.vmem %s312_s8, 768  ;;  %p10911_p9 = pmov %p10910_p1 }
  0xbf   : > { %p8949_p7 = scmp.ne.s32.totalorder %s312_s8, %s8948_s22  ;;  %s9024_s16 = smov [#allocation16]  }
  0xc0   : > { %s8953_s14 = sshll.u32 %s9024_s16, 4  ;;  %s8954_s14 = int_to_ptr.vmem [resolvable:$false] %s8953_s14 }
  0xc1   : > { %p8951_p2 = pnand %p8949_p7, %p10911_p9  ;;  %s8955_s9 = scalar_lea.vmem %s8954_s14, 1536 }
  0xc2   : > { %p8956_p1 = scmp.lt.s32.totalorder %s312_s8, %s8954_s14  ;;  %p8957_p4 = scmp.lt.s32.totalorder %s8955_s9, %s8948_s22 }
  0xc3   : > { %p8952_p10 = pneg %p8951_p2 }
  0xc4   : > { %p8958_p5 = por %p8957_p4, %p8956_p1 }
  0xc6   : > { %p8959_p8 = pnand %p8958_p5, %p8952_p10 }
  0xc8   : > { %8962 = shalt.err (!%p8959_p8)
}
  0xc9   : > { %8597 = dma.hbm_to_vmem [thread:$0]  (!%p10909_p11), %s9290_s3, 768, %s312_s8, %s9195_s23  }
  0xca   : > { %p10912_p13 = scmp.ne.s32.totalorder %s10899_s30, 0 }
  0xcc   : > { %320 = sbr.rel (%p10912_p13) target bundleno = 2370 (0x942), region = 48 }
  0xd3   : > { %p10913_p6 = scmp.eq.s32.totalorder %s9092_s28, 0 }
  0xd5   : > { %8980 = dma.done.wait (%p10913_p6), [#allocation7], 32   ;;  %p10914_p12 = pmov %p10913_p6 }
  0xd6   : > { %p10915_p0 = pmov %p10913_p6 }
  0xd7   : > { %8982 = vsyncadd (%p10914_p12), [#allocation7], 4294967264 }
  0xd8   : > { %8984 = dma.done.wait (%p10915_p0), [#allocation9], 2112   ;;  %p10916_p3 = pmov %p10915_p0 }
  0xd9   : > { %p10917_p7 = pmov %p10915_p0 }
  0xda   : > { %8986 = vsyncadd (%p10916_p3), [#allocation9], 4294965184 }
  0xdb   : > { %8988 = dma.done.wait (%p10917_p7), [#allocation12], 16416   ;;  %p10918_p11 = pmov %p10915_p0 }
  0xdc   : > { %s342_s30 = sand.u32 1, %s9092_s28   ;;  %s344_s19 = sand.u32 1, %s9001_s25  }
  0xdd   : > { %8990 = vsyncadd (%p10918_p11), [#allocation12], 4294950880  ;;  %s8549_s23 = smul.u32 6144, %s344_s19  ;;  %s343_s1 = scalar_lea.sflag [#allocation15], %s342_s30 }
  0xde   : > { %p10919_p9 = scmp.ne.s32.totalorder %s10898_s29, 0 }
  0xdf   : > { %s9328_s27 = scalar_lea.vmem [#allocation14], %s8549_s23 }
  0xe0   : > { %8992 = dma.done.wait (%p10919_p9), %s343_s1, 99072  }
  0xe1   : > { %8994 = vsyncadd (%p10919_p9), %s343_s1, 4294868224  ;;  %s8550_s21 = smul.u32 48, %s344_s19  ;;  %p10920_p2 = scmp.ne.s32.totalorder %s9092_s28, 0 }
  0xe2   : > { %v394_v0 = vld [vmem:[#allocation8 + $0x8] sm:$0xff] (!%p10920_p2)  ;;  %v396_v2 = vld [vmem:[#allocation8 + $0x18] sm:$0xff] (!%p10920_p2)  ;;  %vm886_vm0 = vcmask (!%p10920_p2), 1024   ;;  %v393_v5 = vld [vmem:[#allocation8] sm:$0xff] (!%p10920_p2)  ;;  %v9025_v7 = vmov (!%p10920_p2), 0.0   ;;  %vm431_vm1 = vcmask (!%p10920_p2), 261120  }
  0xe3   : > { %s9334_s15 = scalar_lea.vmem [#allocation16], %s8550_s21  ;;  %391 = sbr.rel (%p10920_p2) target bundleno = 680 (0x2a8), region = 80  ;;  %v398_v1 = vld [vmem:[#allocation8 + $0x28] sm:$0xff] (!%p10920_p2)  ;;  %v400_v4 = vld [vmem:[#allocation8 + $0x38] sm:$0xff] (!%p10920_p2)  ;;  %v397_v6 = vld [vmem:[#allocation8 + $0x20] sm:$0xff] (!%p10920_p2)  ;;  %499 = vmatprep.mubr.f32.mxu0 (!%p10920_p2), %v9025_v7  ;;  %570 = vmatprep.mubr.f32.mxu1 (!%p10920_p2), %v9025_v7 }
  0xe4   : > { %v8399_v3 = vpack.c.bf16 (!%p10920_p2), %v398_v1, %v394_v0  ;;  %888 = vst.msk [vmem:[#allocation5] sm:$0x3] (!%p10920_p2), %vm886_vm0, %v9025_v7  ;;  %v8407_v8 = vpack.c.bf16 (!%p10920_p2), %v400_v4, %v396_v2  ;;  %v8401_v9 = vpack.c.bf16 (!%p10920_p2), %v397_v6, %v393_v5  ;;  %v395_v10 = vld [vmem:[#allocation8 + $0x10] sm:$0xff] (!%p10920_p2)  ;;  %v402_v12 = vld [vmem:[#allocation8 + $0x48] sm:$0xff] (!%p10920_p2)  ;;  %v9026_v13 = vmov (!%p10920_p2), -1e+30  }
  0xe5   : > { %v399_v11 = vld [vmem:[#allocation8 + $0x30] sm:$0xff] (!%p10920_p2)  ;;  %887 = vst.msk [vmem:[#allocation4] sm:$0x3] (!%p10920_p2), %vm886_vm0, %v9026_v13  ;;  %v406_v15 = vld [vmem:[#allocation8 + $0x68] sm:$0xff] (!%p10920_p2)  ;;  %v404_v16 = vld [vmem:[#allocation8 + $0x58] sm:$0xff] (!%p10920_p2) }
  0xe6   : > { %8400 = vmatprep.subr.bf16.mxu0 (!%p10920_p2), %v8399_v3  ;;  %v8409_v14 = vpack.c.bf16 (!%p10920_p2), %v399_v11, %v395_v10  ;;  %v408_v17 = vld [vmem:[#allocation8 + $0x78] sm:$0xff] (!%p10920_p2)  ;;  %8408 = vmatprep.subr.bf16.mxu1 (!%p10920_p2), %v8407_v8  ;;  %v8403_v18 = vpack.c.bf16 (!%p10920_p2), %v406_v15, %v402_v12  ;;  %v401_v20 = vld [vmem:[#allocation8 + $0x40] sm:$0xff] (!%p10920_p2)  ;;  %v403_v22 = vld [vmem:[#allocation8 + $0x50] sm:$0xff] (!%p10920_p2) }
  0xe7   : > { %8402 = vmatpush1.bf16.msra.mxu0 (!%p10920_p2), %v8401_v9  ;;  %v8411_v19 = vpack.c.bf16 (!%p10920_p2), %v408_v17, %v404_v16  ;;  %v405_v21 = vld [vmem:[#allocation8 + $0x60] sm:$0xff] (!%p10920_p2)  ;;  %v407_v24 = vld [vmem:[#allocation8 + $0x70] sm:$0xff] (!%p10920_p2)  ;;  %v392_v27 = vld [vmem:[#allocation6] sm:$0x3] (!%p10920_p2) }
  0xe8   : > { %8410 = vmatpush1.bf16.msra.mxu1 (!%p10920_p2), %v8409_v14  ;;  %v8405_v23 = vpack.c.bf16 (!%p10920_p2), %v405_v21, %v401_v20  ;;  %v582_v25 = vld [vmem:[#allocation11 + $0x8] sm:$0xff] (!%p10920_p2)  ;;  %8404 = vmatprep.subr.bf16.mxu0 (!%p10920_p2), %v8403_v18  ;;  %v8413_v26 = vpack.c.bf16 (!%p10920_p2), %v407_v24, %v403_v22  ;;  %v584_v28 = vld [vmem:[#allocation11 + $0x18] sm:$0xff] (!%p10920_p2)  ;;  %v581_v33 = vld [vmem:[#allocation11] sm:$0xff] (!%p10920_p2) }
  0xe9   : > { %8412 = vmatprep.subr.bf16.mxu1 (!%p10920_p2), %v8411_v19  ;;  %v646_v29 = vld [vmem:[#allocation11 + $0x208] sm:$0xff] (!%p10920_p2)  ;;  %v648_v30 = vld [vmem:[#allocation11 + $0x218] sm:$0xff] (!%p10920_p2)  ;;  %v8415_v31 = vpack.c.bf16 (!%p10920_p2), %v584_v28, %v582_v25  ;;  %v583_v34 = vld [vmem:[#allocation11 + $0x10] sm:$0xff] (!%p10920_p2) }
  0xea   : > { %v8479_v32 = vpack.c.bf16 %v648_v30, %v646_v29  ;;  %v645_v35 = vld [vmem:[#allocation11 + $0x200] sm:$0xff]  ;;  %v647_v36 = vld [vmem:[#allocation11 + $0x210] sm:$0xff]  ;;  %v586_v37 = vld [vmem:[#allocation11 + $0x28] sm:$0xff]  ;;  %v8417_v39 = vpack.c.bf16 %v583_v34, %v581_v33 }
  0xeb   : > { %8406 = vmatpush1.bf16.msra.mxu0 %v8405_v23  ;;  %v588_v38 = vld [vmem:[#allocation11 + $0x38] sm:$0xff]  ;;  %v8481_v40 = vpack.c.bf16 %v647_v36, %v645_v35  ;;  %v650_v41 = vld [vmem:[#allocation11 + $0x228] sm:$0xff]  ;;  %v585_v43 = vld [vmem:[#allocation11 + $0x20] sm:$0xff] }
  0xec   : > { %8414 = vmatpush1.bf16.msra.mxu1 %v8413_v26  ;;  %8480 = vmatprep.subr.bf16.mxu0 %v8479_v32  ;;  %v652_v42 = vld [vmem:[#allocation11 + $0x238] sm:$0xff]  ;;  %v8419_v44 = vpack.c.bf16 %v588_v38, %v586_v37  ;;  %v587_v46 = vld [vmem:[#allocation11 + $0x30] sm:$0xff]  ;;  %v649_v47 = vld [vmem:[#allocation11 + $0x220] sm:$0xff] }
  0xed   : > { %8416 = vmatprep.subr.bf16.mxu1 %v8415_v31  ;;  %v8483_v45 = vpack.c.bf16 %v652_v42, %v650_v41  ;;  %v651_v48 = vld [vmem:[#allocation11 + $0x230] sm:$0xff]  ;;  %v590_v49 = vld [vmem:[#allocation11 + $0x48] sm:$0xff]  ;;  %v592_v50 = vld [vmem:[#allocation11 + $0x58] sm:$0xff]  ;;  %v8421_v54 = vpack.c.bf16 %v587_v46, %v585_v43 }
  0xee   : > { %7619 = vmatmul.mubr.msk.f32.vlgmr.msra.gmra.mrb[0].mxu0 %vm431_vm1, %v392_v27  ;;  %v654_v51 = vld [vmem:[#allocation11 + $0x248] sm:$0xff]  ;;  %v8485_v52 = vpack.c.bf16 %v651_v48, %v649_v47  ;;  %v656_v53 = vld [vmem:[#allocation11 + $0x258] sm:$0xff]  ;;  %v589_v56 = vld [vmem:[#allocation11 + $0x40] sm:$0xff]  ;;  %v8423_v59 = vpack.c.bf16 %v592_v50, %v590_v49 }
  0xef   : > { %7620 = vmatmul.mubr.msk.f32.vlgmr.msra.gmra.mrb[0].mxu1 %vm431_vm1, %v392_v27  ;;  %8482 = vmatpush1.bf16.msra.mxu0 %v8481_v40  ;;  %v8487_v55 = vpack.c.bf16 %v656_v53, %v654_v51  ;;  %v653_v57 = vld [vmem:[#allocation11 + $0x240] sm:$0xff]  ;;  %v655_v58 = vld [vmem:[#allocation11 + $0x250] sm:$0xff]  ;;  %v658_v61 = vld [vmem:[#allocation11 + $0x268] sm:$0xff] }
  0xf0   : > { %8418 = vmatpush1.bf16.msra.mxu1 %v8417_v39  ;;  %8484 = vmatprep.subr.bf16.mxu0 %v8483_v45  ;;  %v591_v60 = vld [vmem:[#allocation11 + $0x50] sm:$0xff]  ;;  %v660_v62 = vld [vmem:[#allocation11 + $0x278] sm:$0xff]  ;;  %v594_v63 = vld [vmem:[#allocation11 + $0x68] sm:$0xff]  ;;  %v8489_v1 = vpack.c.bf16 %v655_v58, %v653_v57 }
  0xf1   : > { %8420 = vmatprep.subr.bf16.mxu1 %v8419_v44  ;;  %v596_v0 = vld [vmem:[#allocation11 + $0x78] sm:$0xff]  ;;  %v8425_v2 = vpack.c.bf16 %v591_v60, %v589_v56  ;;  %v8491_v3 = vpack.c.bf16 %v660_v62, %v658_v61  ;;  %v593_v4 = vld [vmem:[#allocation11 + $0x60] sm:$0xff]  ;;  %v659_v6 = vld [vmem:[#allocation11 + $0x270] sm:$0xff] }
  0xf2   : > { %v657_v5 = vld [vmem:[#allocation11 + $0x260] sm:$0xff]  ;;  %v8427_v7 = vpack.c.bf16 %v596_v0, %v594_v63  ;;  %v595_v8 = vld [vmem:[#allocation11 + $0x70] sm:$0xff]  ;;  %v662_v9 = vld [vmem:[#allocation11 + $0x288] sm:$0xff] }
  0xf3   : > { %8486 = vmatpush1.bf16.msra.mxu0 %v8485_v52  ;;  %v664_v10 = vld [vmem:[#allocation11 + $0x298] sm:$0xff]  ;;  %v598_v11 = vld [vmem:[#allocation11 + $0x88] sm:$0xff]  ;;  %v8493_v13 = vpack.c.bf16 %v659_v6, %v657_v5  ;;  %v8429_v14 = vpack.c.bf16 %v595_v8, %v593_v4  ;;  %v597_v16 = vld [vmem:[#allocation11 + $0x80] sm:$0xff] }
  0xf4   : > { %8422 = vmatpush1.bf16.msra.mxu1 %v8421_v54  ;;  %8488 = vmatprep.subr.bf16.mxu0 %v8487_v55  ;;  %v600_v12 = vld [vmem:[#allocation11 + $0x98] sm:$0xff]  ;;  %v8495_v15 = vpack.c.bf16 %v664_v10, %v662_v9  ;;  %v661_v17 = vld [vmem:[#allocation11 + $0x280] sm:$0xff]  ;;  %v663_v18 = vld [vmem:[#allocation11 + $0x290] sm:$0xff] }
  0xf5   : > { %8424 = vmatprep.subr.bf16.mxu1 %v8423_v59  ;;  %v8431_v19 = vpack.c.bf16 %v600_v12, %v598_v11  ;;  %v599_v20 = vld [vmem:[#allocation11 + $0x90] sm:$0xff]  ;;  %v666_v21 = vld [vmem:[#allocation11 + $0x2a8] sm:$0xff]  ;;  %v668_v22 = vld [vmem:[#allocation11 + $0x2b8] sm:$0xff]  ;;  %v8497_v25 = vpack.c.bf16 %v663_v18, %v661_v17 }
  0xf6   : > { %v602_v23 = vld [vmem:[#allocation11 + $0xa8] sm:$0xff]  ;;  %v604_v24 = vld [vmem:[#allocation11 + $0xb8] sm:$0xff]  ;;  %v8433_v26 = vpack.c.bf16 %v599_v20, %v597_v16  ;;  %v8499_v27 = vpack.c.bf16 %v668_v22, %v666_v21  ;;  %v601_v28 = vld [vmem:[#allocation11 + $0xa0] sm:$0xff] }
  0xf7   : > { %8490 = vmatpush1.bf16.msra.mxu0 %v8489_v1  ;;  %v665_v29 = vld [vmem:[#allocation11 + $0x2a0] sm:$0xff]  ;;  %v667_v30 = vld [vmem:[#allocation11 + $0x2b0] sm:$0xff]  ;;  %v8435_v31 = vpack.c.bf16 %v604_v24, %v602_v23  ;;  %v670_v33 = vld [vmem:[#allocation11 + $0x2c8] sm:$0xff] }
  0xf8   : > { %8426 = vmatpush1.bf16.msra.mxu1 %v8425_v2  ;;  %8492 = vmatprep.subr.bf16.mxu0 %v8491_v3  ;;  %v603_v32 = vld [vmem:[#allocation11 + $0xb0] sm:$0xff]  ;;  %v672_v34 = vld [vmem:[#allocation11 + $0x2d8] sm:$0xff]  ;;  %v606_v35 = vld [vmem:[#allocation11 + $0xc8] sm:$0xff]  ;;  %v8501_v37 = vpack.c.bf16 %v667_v30, %v665_v29 }
  0xf9   : > { %8428 = vmatprep.subr.bf16.mxu1 %v8427_v7  ;;  %v608_v36 = vld [vmem:[#allocation11 + $0xd8] sm:$0xff]  ;;  %v8437_v38 = vpack.c.bf16 %v603_v32, %v601_v28  ;;  %v8503_v39 = vpack.c.bf16 %v672_v34, %v670_v33  ;;  %v605_v40 = vld [vmem:[#allocation11 + $0xc0] sm:$0xff]  ;;  %v671_v42 = vld [vmem:[#allocation11 + $0x2d0] sm:$0xff] }
  0xfa   : > { %v669_v41 = vld [vmem:[#allocation11 + $0x2c0] sm:$0xff]  ;;  %v8439_v43 = vpack.c.bf16 %v608_v36, %v606_v35  ;;  %v607_v44 = vld [vmem:[#allocation11 + $0xd0] sm:$0xff]  ;;  %v674_v45 = vld [vmem:[#allocation11 + $0x2e8] sm:$0xff] }
  0xfb   : > { %8494 = vmatpush1.bf16.msra.mxu0 %v8493_v13  ;;  %v676_v46 = vld [vmem:[#allocation11 + $0x2f8] sm:$0xff]  ;;  %v610_v47 = vld [vmem:[#allocation11 + $0xe8] sm:$0xff]  ;;  %v8505_v49 = vpack.c.bf16 %v671_v42, %v669_v41  ;;  %v8441_v50 = vpack.c.bf16 %v607_v44, %v605_v40  ;;  %v609_v52 = vld [vmem:[#allocation11 + $0xe0] sm:$0xff] }
  0xfc   : > { %8430 = vmatpush1.bf16.msra.mxu1 %v8429_v14  ;;  %8496 = vmatprep.subr.bf16.mxu0 %v8495_v15  ;;  %v612_v48 = vld [vmem:[#allocation11 + $0xf8] sm:$0xff]  ;;  %v8507_v51 = vpack.c.bf16 %v676_v46, %v674_v45  ;;  %v673_v53 = vld [vmem:[#allocation11 + $0x2e0] sm:$0xff]  ;;  %v675_v54 = vld [vmem:[#allocation11 + $0x2f0] sm:$0xff] }
  0xfd   : > { %8432 = vmatprep.subr.bf16.mxu1 %v8431_v19  ;;  %v8443_v55 = vpack.c.bf16 %v612_v48, %v610_v47  ;;  %v611_v56 = vld [vmem:[#allocation11 + $0xf0] sm:$0xff]  ;;  %v678_v57 = vld [vmem:[#allocation11 + $0x308] sm:$0xff]  ;;  %v680_v58 = vld [vmem:[#allocation11 + $0x318] sm:$0xff]  ;;  %v8509_v61 = vpack.c.bf16 %v675_v54, %v673_v53 }
  0xfe   : > { %v614_v59 = vld [vmem:[#allocation11 + $0x108] sm:$0xff]  ;;  %v616_v60 = vld [vmem:[#allocation11 + $0x118] sm:$0xff]  ;;  %v8445_v62 = vpack.c.bf16 %v611_v56, %v609_v52  ;;  %v8511_v63 = vpack.c.bf16 %v680_v58, %v678_v57  ;;  %v613_v0 = vld [vmem:[#allocation11 + $0x100] sm:$0xff] }
  0xff   : > { %8498 = vmatpush1.bf16.msra.mxu0 %v8497_v25  ;;  %v677_v1 = vld [vmem:[#allocation11 + $0x300] sm:$0xff]  ;;  %v679_v2 = vld [vmem:[#allocation11 + $0x310] sm:$0xff]  ;;  %v8447_v3 = vpack.c.bf16 %v616_v60, %v614_v59  ;;  %v682_v5 = vld [vmem:[#allocation11 + $0x328] sm:$0xff] }
 0x100   : > { %8434 = vmatpush1.bf16.msra.mxu1 %v8433_v26  ;;  %8500 = vmatprep.subr.bf16.mxu0 %v8499_v27  ;;  %v615_v4 = vld [vmem:[#allocation11 + $0x110] sm:$0xff]  ;;  %v684_v6 = vld [vmem:[#allocation11 + $0x338] sm:$0xff]  ;;  %v618_v7 = vld [vmem:[#allocation11 + $0x128] sm:$0xff]  ;;  %v8513_v9 = vpack.c.bf16 %v679_v2, %v677_v1 }
 0x101   : > { %8436 = vmatprep.subr.bf16.mxu1 %v8435_v31  ;;  %v620_v8 = vld [vmem:[#allocation11 + $0x138] sm:$0xff]  ;;  %v8449_v10 = vpack.c.bf16 %v615_v4, %v613_v0  ;;  %v8515_v11 = vpack.c.bf16 %v684_v6, %v682_v5  ;;  %v617_v12 = vld [vmem:[#allocation11 + $0x120] sm:$0xff]  ;;  %v683_v14 = vld [vmem:[#allocation11 + $0x330] sm:$0xff] }
 0x102   : > { %v681_v13 = vld [vmem:[#allocation11 + $0x320] sm:$0xff]  ;;  %v8451_v15 = vpack.c.bf16 %v620_v8, %v618_v7  ;;  %v619_v16 = vld [vmem:[#allocation11 + $0x130] sm:$0xff]  ;;  %v686_v17 = vld [vmem:[#allocation11 + $0x348] sm:$0xff] }
 0x103   : > { %8502 = vmatpush1.bf16.msra.mxu0 %v8501_v37  ;;  %v688_v18 = vld [vmem:[#allocation11 + $0x358] sm:$0xff]  ;;  %v622_v19 = vld [vmem:[#allocation11 + $0x148] sm:$0xff]  ;;  %v8517_v21 = vpack.c.bf16 %v683_v14, %v681_v13  ;;  %v8453_v22 = vpack.c.bf16 %v619_v16, %v617_v12  ;;  %v621_v24 = vld [vmem:[#allocation11 + $0x140] sm:$0xff] }
 0x104   : > { %8438 = vmatpush1.bf16.msra.mxu1 %v8437_v38  ;;  %8504 = vmatprep.subr.bf16.mxu0 %v8503_v39  ;;  %v624_v20 = vld [vmem:[#allocation11 + $0x158] sm:$0xff]  ;;  %v8519_v23 = vpack.c.bf16 %v688_v18, %v686_v17  ;;  %v685_v25 = vld [vmem:[#allocation11 + $0x340] sm:$0xff]  ;;  %v687_v26 = vld [vmem:[#allocation11 + $0x350] sm:$0xff] }
 0x105   : > { %8440 = vmatprep.subr.bf16.mxu1 %v8439_v43  ;;  %v8455_v27 = vpack.c.bf16 %v624_v20, %v622_v19  ;;  %v623_v28 = vld [vmem:[#allocation11 + $0x150] sm:$0xff]  ;;  %v690_v29 = vld [vmem:[#allocation11 + $0x368] sm:$0xff]  ;;  %v692_v30 = vld [vmem:[#allocation11 + $0x378] sm:$0xff]  ;;  %v8521_v33 = vpack.c.bf16 %v687_v26, %v685_v25 }
 0x106   : > { %v626_v31 = vld [vmem:[#allocation11 + $0x168] sm:$0xff]  ;;  %v628_v32 = vld [vmem:[#allocation11 + $0x178] sm:$0xff]  ;;  %v8457_v34 = vpack.c.bf16 %v623_v28, %v621_v24  ;;  %v8523_v35 = vpack.c.bf16 %v692_v30, %v690_v29  ;;  %v625_v36 = vld [vmem:[#allocation11 + $0x160] sm:$0xff] }
 0x107   : > { %8506 = vmatpush1.bf16.msra.mxu0 %v8505_v49  ;;  %v689_v37 = vld [vmem:[#allocation11 + $0x360] sm:$0xff]  ;;  %v691_v38 = vld [vmem:[#allocation11 + $0x370] sm:$0xff]  ;;  %v8459_v39 = vpack.c.bf16 %v628_v32, %v626_v31  ;;  %v694_v41 = vld [vmem:[#allocation11 + $0x388] sm:$0xff] }
 0x108   : > { %8442 = vmatpush1.bf16.msra.mxu1 %v8441_v50  ;;  %8508 = vmatprep.subr.bf16.mxu0 %v8507_v51  ;;  %v627_v40 = vld [vmem:[#allocation11 + $0x170] sm:$0xff]  ;;  %v696_v42 = vld [vmem:[#allocation11 + $0x398] sm:$0xff]  ;;  %v630_v43 = vld [vmem:[#allocation11 + $0x188] sm:$0xff]  ;;  %v8525_v45 = vpack.c.bf16 %v691_v38, %v689_v37 }
 0x109   : > { %8444 = vmatprep.subr.bf16.mxu1 %v8443_v55  ;;  %v632_v44 = vld [vmem:[#allocation11 + $0x198] sm:$0xff]  ;;  %v8461_v46 = vpack.c.bf16 %v627_v40, %v625_v36  ;;  %v8527_v47 = vpack.c.bf16 %v696_v42, %v694_v41  ;;  %v629_v48 = vld [vmem:[#allocation11 + $0x180] sm:$0xff]  ;;  %v695_v50 = vld [vmem:[#allocation11 + $0x390] sm:$0xff] }
 0x10a   : > { %v693_v49 = vld [vmem:[#allocation11 + $0x380] sm:$0xff]  ;;  %v8463_v51 = vpack.c.bf16 %v632_v44, %v630_v43  ;;  %v631_v52 = vld [vmem:[#allocation11 + $0x190] sm:$0xff]  ;;  %v698_v53 = vld [vmem:[#allocation11 + $0x3a8] sm:$0xff] }
 0x10b   : > { %8510 = vmatpush1.bf16.msra.mxu0 %v8509_v61  ;;  %v700_v54 = vld [vmem:[#allocation11 + $0x3b8] sm:$0xff]  ;;  %v634_v55 = vld [vmem:[#allocation11 + $0x1a8] sm:$0xff]  ;;  %v8529_v57 = vpack.c.bf16 %v695_v50, %v693_v49  ;;  %v8465_v58 = vpack.c.bf16 %v631_v52, %v629_v48  ;;  %v633_v60 = vld [vmem:[#allocation11 + $0x1a0] sm:$0xff] }
 0x10c   : > { %8446 = vmatpush1.bf16.msra.mxu1 %v8445_v62  ;;  %8512 = vmatprep.subr.bf16.mxu0 %v8511_v63  ;;  %v636_v56 = vld [vmem:[#allocation11 + $0x1b8] sm:$0xff]  ;;  %v8531_v59 = vpack.c.bf16 %v700_v54, %v698_v53  ;;  %v697_v61 = vld [vmem:[#allocation11 + $0x3a0] sm:$0xff]  ;;  %v699_v62 = vld [vmem:[#allocation11 + $0x3b0] sm:$0xff]  ;;  %v9027_v53 = vmov 1966171168  }
 0x10d   : > { %8448 = vmatprep.subr.bf16.mxu1 %v8447_v3  ;;  %v8467_v63 = vpack.c.bf16 %v636_v56, %v634_v55  ;;  %v635_v0 = vld [vmem:[#allocation11 + $0x1b0] sm:$0xff]  ;;  %v702_v1 = vld [vmem:[#allocation11 + $0x3c8] sm:$0xff]  ;;  %v704_v2 = vld [vmem:[#allocation11 + $0x3d8] sm:$0xff]  ;;  %v8533_v5 = vpack.c.bf16 %v699_v62, %v697_v61  ;;  %v871_v54 = vunpack.c.l.s4 %v9027_v53 }
 0x10e   : > { %v638_v3 = vld [vmem:[#allocation11 + $0x1c8] sm:$0xff]  ;;  %v640_v4 = vld [vmem:[#allocation11 + $0x1d8] sm:$0xff]  ;;  %v8469_v6 = vpack.c.bf16 %v635_v0, %v633_v60  ;;  %v8535_v7 = vpack.c.bf16 %v704_v2, %v702_v1  ;;  %v703_v13 = vld [vmem:[#allocation11 + $0x3d0] sm:$0xff] }
 0x10f   : > { %8514 = vmatpush1.bf16.msra.mxu0 %v8513_v9  ;;  %v8471_v8 = vpack.c.bf16 %v640_v4, %v638_v3  ;;  %v637_v9 = vld [vmem:[#allocation11 + $0x1c0] sm:$0xff]  ;;  %v644_v16 = vld [vmem:[#allocation11 + $0x1f8] sm:$0xff]  ;;  %v706_v17 = vld [vmem:[#allocation11 + $0x3e8] sm:$0xff]  ;;  %v872_v61 = vunpack.c.0.s8 %v871_v54 }
 0x110   : > { %8450 = vmatpush1.bf16.msra.mxu1 %v8449_v10  ;;  %8516 = vmatprep.subr.bf16.mxu0 %v8515_v11  ;;  %v639_v10 = vld [vmem:[#allocation11 + $0x1d0] sm:$0xff]  ;;  %v701_v11 = vld [vmem:[#allocation11 + $0x3c0] sm:$0xff]  ;;  %v708_v19 = vld [vmem:[#allocation11 + $0x3f8] sm:$0xff] }
 0x111   : > { %8452 = vmatprep.subr.bf16.mxu1 %v8451_v15  ;;  %v8473_v12 = vpack.c.bf16 %v639_v10, %v637_v9  ;;  %v8537_v14 = vpack.c.bf16 %v703_v13, %v701_v11  ;;  %v642_v15 = vld [vmem:[#allocation11 + $0x1e8] sm:$0xff]  ;;  %v641_v20 = vld [vmem:[#allocation11 + $0x1e0] sm:$0xff]  ;;  %v707_v25 = vld [vmem:[#allocation11 + $0x3f0] sm:$0xff] }
 0x112   : > { %v8475_v18 = vpack.c.bf16 %v644_v16, %v642_v15  ;;  %v705_v24 = vld [vmem:[#allocation11 + $0x3e0] sm:$0xff]  ;;  %v409_v30 = vld [vmem:[#allocation10] sm:$0xf] }
 0x113   : > { %8518 = vmatpush1.bf16.msra.mxu0 %v8517_v21  ;;  %v643_v21 = vld [vmem:[#allocation11 + $0x1f0] sm:$0xff]  ;;  %v8541_v26 = vpack.c.bf16 %v707_v25, %v705_v24  ;;  %v709_v50 = vld [vmem:[#allocation13] sm:$0x3] }
 0x114   : > { %8454 = vmatpush1.bf16.msra.mxu1 %v8453_v22  ;;  %8520 = vmatprep.subr.bf16.mxu0 %v8519_v23  ;;  %v8539_v22 = vpack.c.bf16 %v708_v19, %v706_v17  ;;  %v8477_v23 = vpack.c.bf16 %v643_v21, %v641_v20 }
 0x115   : > { %8456 = vmatprep.subr.bf16.mxu1 %v8455_v27  ;;  %v411_v27 = vlaneseq }
 0x117   : > { %8522 = vmatpush1.bf16.msra.mxu0 %v8521_v33  ;;  %v412_v28 = vshrl.u32 %v411_v27, 7 }
 0x118   : > { %8458 = vmatpush1.bf16.msra.mxu1 %v8457_v34  ;;  %8524 = vmatprep.subr.bf16.mxu0 %v8523_v35 }
 0x119   : > { %8460 = vmatprep.subr.bf16.mxu1 %v8459_v39  ;;  %v413_v29 = vsub.s32 0, %v412_v28  ;;  %v421_v31 = vsub.s32 2, %v412_v28  ;;  %v417_v32 = vsub.s32 1, %v412_v28  ;;  %v425_v33 = vsub.s32 3, %v412_v28 }
 0x11a   : > { %v875_v2 = vsub.s32 %v872_v61, %v412_v28 }
 0x11b   : > { %8526 = vmatpush1.bf16.msra.mxu0 %v8525_v45  ;;  %v414_v34 = vrot.slane %v409_v30, %v413_v29  ;;  %v422_v35 = vrot.slane %v409_v30, %v421_v31  ;;  %v418_v36 = vrot.slane %v409_v30, %v417_v32  ;;  %v426_v37 = vrot.slane %v409_v30, %v425_v33 }
 0x11c   : > { %8462 = vmatpush1.bf16.msra.mxu1 %v8461_v46  ;;  %8528 = vmatprep.subr.bf16.mxu0 %v8527_v47  ;;  %v718_v52 = vrot.slane %v709_v50, %v417_v32 }
 0x11d   : > { %8464 = vmatprep.subr.bf16.mxu1 %v8463_v51  ;;  %v714_v51 = vrot.slane %v709_v50, %v413_v29 }
 0x11f   : > { %8530 = vmatpush1.bf16.msra.mxu0 %v8529_v57 }
 0x120   : > { %8466 = vmatpush1.bf16.msra.mxu1 %v8465_v58  ;;  %8532 = vmatprep.subr.bf16.mxu0 %v8531_v59 }
 0x121   : > { %8468 = vmatprep.subr.bf16.mxu1 %v8467_v63 }
 0x123   : > { %8534 = vmatpush1.bf16.msra.mxu0 %v8533_v5 }
 0x124   : > { %8470 = vmatpush1.bf16.msra.mxu1 %v8469_v6  ;;  %8536 = vmatprep.subr.bf16.mxu0 %v8535_v7 }
 0x125   : > { %8472 = vmatprep.subr.bf16.mxu1 %v8471_v8 }
 0x127   : > { %8538 = vmatpush1.bf16.msra.mxu0 %v8537_v14 }
 0x128   : > { %8474 = vmatpush1.bf16.msra.mxu1 %v8473_v12  ;;  %8540 = vmatprep.subr.bf16.mxu0 %v8539_v22 }
 0x129   : > { %8476 = vmatprep.subr.bf16.mxu1 %v8475_v18 }
 0x12b   : > { %8542 = vmatpush1.bf16.msra.mxu0 %v8541_v26 }
 0x12c   : > { %8478 = vmatpush1.bf16.msra.mxu1 %v8477_v23 }
 0x1c1   : > { %v501_v38 = vpop.f32.mrb[0].mxu0 }
 0x1c2   : > { %v502_v39 = vadd.f32 %v501_v38, %v414_v34  ;;  %v572_v40 = vpop.f32.mrb[0].mxu1  ;;  %v503_v41 = vpop.f32.mrb[1].mxu0 }
 0x1c3   : > { %v573_v42 = vadd.f32 %v572_v40, %v422_v35  ;;  %v504_v43 = vadd.f32 %v503_v41, %v418_v36  ;;  %v574_v44 = vpop.f32.mrb[1].mxu1 }
 0x1c4   : > { %v575_v45 = vadd.f32 %v574_v44, %v426_v37  ;;  %v577_v48 = vmax.f32 %v502_v39, 0.0 }
 0x1c5   : > { %v579_v46 = vmax.f32 %v573_v42, 0.0  ;;  %v578_v47 = vmax.f32 %v504_v43, 0.0 }
 0x1c6   : > { %v580_v49 = vmax.f32 %v575_v45, 0.0 }
 0x1c7   : > { %785 = vmatprep.mubr.f32.mxu1 %v578_v47 }
 0x1c8   : > { %856 = vmatprep.mubr.f32.mxu0 %v580_v49  ;;  %786 = vmatmul.mubr.f32.vlgmr.msra.gmra.mrb[2].mxu1 %v577_v48 }
 0x1c9   : > { %857 = vmatmul.mubr.f32.vlgmr.msra.gmra.mrb[2].mxu0 %v579_v46 }
 0x29b   : > { %v787_v55 = vpop.f32.mrb[2].mxu1 }
 0x29c   : > { %v788_v56 = vadd.f32 %v787_v55, %v714_v51  ;;  %v858_v57 = vpop.f32.mrb[2].mxu0  ;;  %v789_v58 = vpop.f32.mrb[3].mxu1 }
 0x29d   : > { %v790_v59 = vadd.f32 %v789_v58, %v718_v52  ;;  %v860_v60 = vpop.f32.mrb[3].mxu0 }
 0x29e   : > { %v859_v62 = vadd.f32 %v858_v57, %v788_v56 }
 0x29f   : > { %v861_v63 = vadd.f32 %v860_v60, %v790_v59 }
 0x2a0   : > { %v863_v0 = vmax.f32 %v859_v62, 0.0 }
 0x2a1   : > { %v864_v1 = vmax.f32 %v861_v63, 0.0 }
 0x2a3   : > { %v7621_v3 = vpack.c.bf16 %v864_v1, %v863_v0 }
 0x2a5   : > { %v876_v4 = vrot.slane %v7621_v3, %v875_v2 }
 0x2a7   : > { %7622 = vst.sshfl [vmem:[#allocation3] sm:$0x5 pattern:$0x73625140] %v876_v4 }
 0x2a8 PF: > { %v890_v5 = vld [vmem:[%s9328_s27] sm:$0xff]  ;;  %v891_v7 = vld [vmem:[%s9328_s27 + $0x8] sm:$0xff]  ;;  %v1670_v40 = vlaneseq  ;;  %v9028_v41 = vmov 1966171168   ;;  %s8398_s29 = smul.u32 96, %s9092_s28  ;;  %vm7039_vm2 = vcmask 1041408  }
 0x2a9   : > { %v914_v6 = vld [vmem:[%s9328_s27 + $0xc0] sm:$0xff]  ;;  %v915_v9 = vld [vmem:[%s9328_s27 + $0xc8] sm:$0xff]  ;;  %v1920_v42 = vunpack.c.l.s4 %v9028_v41  ;;  %vm7390_vm3 = vcmask 1024   ;;  %p8393_p10 = scmp.ne.s32.totalorder %s9092_s28, 1 }
 0x2aa   : > { %v7625_v8 = vcombine.high %v890_v5, %v914_v6  ;;  %v7624_v10 = vcombine.low %v890_v5, %v914_v6  ;;  %v938_v11 = vld [vmem:[%s9328_s27 + $0x180] sm:$0xff]  ;;  %v7627_v13 = vcombine.high %v891_v7, %v915_v9  ;;  %v7626_v14 = vcombine.low %v891_v7, %v915_v9  ;;  %v939_v16 = vld [vmem:[%s9328_s27 + $0x188] sm:$0xff]  ;;  %s9711_s20 = scalar_lea.vmem [#allocation2], %s8398_s29 }
 0x2ab   : > { %v962_v12 = vld [vmem:[%s9328_s27 + $0x240] sm:$0xff]  ;;  %v963_v17 = vld [vmem:[%s9328_s27 + $0x248] sm:$0xff]  ;;  %v9364_v51 = vshrl.u32 %v1670_v40, 7  ;;  %v1921_v52 = vunpack.c.0.s8 %v1920_v42  ;;  %vm7486_vm4 = vcmask (!%p8393_p10), 1043458   ;;  %vm7488_vm5 = vcmask (!%p8393_p10), 226308  }
 0x2ac   : > { %v7673_v15 = vcombine.high %v938_v11, %v962_v12  ;;  %v986_v18 = vld [vmem:[%s9328_s27 + $0x300] sm:$0xff]  ;;  %5775 = vmatprep.subr.bf16.mxu0 %v7625_v8  ;;  %v7675_v19 = vcombine.high %v939_v16, %v963_v17  ;;  %v987_v21 = vld [vmem:[%s9328_s27 + $0x308] sm:$0xff]  ;;  %5816 = vmatprep.subr.bf16.mxu1 %v7627_v13  ;;  %v7672_v23 = vcombine.low %v938_v11, %v962_v12  ;;  %vm10752_vm6 = vmor (!%p8393_p10), %vm7486_vm4, %vm7039_vm2 }
 0x2ad   : > { %v1010_v20 = vld [vmem:[%s9328_s27 + $0x3c0] sm:$0xff]  ;;  %v1011_v22 = vld [vmem:[%s9328_s27 + $0x3c8] sm:$0xff]  ;;  %5776 = vmatpush1.bf16.msra.mxu0 %v7624_v10  ;;  %5817 = vmatpush1.bf16.msra.mxu1 %v7626_v14  ;;  %v7674_v24 = vcombine.low %v939_v16, %v963_v17  ;;  %10921 = vst [vmem:[#allocation22_spill] sm:$0xff] %v9364_v51  ;;  %v9371_v61 = vsub.s32 %v1921_v52, %v9364_v51  ;;  %vm10795_vm7 = vmor (!%p8393_p10), %vm7488_vm5, %vm10752_vm6 }
 0x2ae   : > { %5777 = vmatprep.subr.bf16.mxu0 %v7673_v15  ;;  %v7721_v25 = vcombine.high %v986_v18, %v1010_v20  ;;  %5818 = vmatprep.subr.bf16.mxu1 %v7675_v19  ;;  %v7723_v26 = vcombine.high %v987_v21, %v1011_v22  ;;  %v1034_v27 = vld [vmem:[%s9328_s27 + $0x480] sm:$0xff]  ;;  %v1035_v29 = vld [vmem:[%s9328_s27 + $0x488] sm:$0xff]  ;;  %v7720_v31 = vcombine.low %v986_v18, %v1010_v20  ;;  %v9373_v0 = vld.sshfl [vmem:[#allocation3] sm:$0x11 pattern:$0x75316420] }
 0x2af   : > { %v1058_v28 = vld [vmem:[%s9328_s27 + $0x540] sm:$0xff]  ;;  %v1059_v30 = vld [vmem:[%s9328_s27 + $0x548] sm:$0xff]  ;;  %v7722_v32 = vcombine.low %v987_v21, %v1011_v22  ;;  %v1918_v4 = vcombine.high %v9373_v0, %v9373_v0 }
 0x2b0   : > { %v7769_v33 = vcombine.high %v1034_v27, %v1058_v28  ;;  %v7771_v34 = vcombine.high %v1035_v29, %v1059_v30  ;;  %v1082_v35 = vld [vmem:[%s9328_s27 + $0x600] sm:$0xff]  ;;  %v1083_v37 = vld [vmem:[%s9328_s27 + $0x608] sm:$0xff]  ;;  %v7768_v39 = vcombine.low %v1034_v27, %v1058_v28  ;;  %v7770_v43 = vcombine.low %v1035_v29, %v1059_v30 }
 0x2b1   : > { %5778 = vmatpush1.bf16.msra.mxu0 %v7672_v23  ;;  %5819 = vmatpush1.bf16.msra.mxu1 %v7674_v24  ;;  %v1106_v36 = vld [vmem:[%s9328_s27 + $0x6c0] sm:$0xff]  ;;  %v1107_v38 = vld [vmem:[%s9328_s27 + $0x6c8] sm:$0xff]  ;;  %v9382_v8 = vrot.slane %v1918_v4, %v9371_v61 }
 0x2b2   : > { %5779 = vmatprep.subr.bf16.mxu0 %v7721_v25  ;;  %5820 = vmatprep.subr.bf16.mxu1 %v7723_v26  ;;  %v7817_v44 = vcombine.high %v1082_v35, %v1106_v36  ;;  %v7819_v45 = vcombine.high %v1083_v37, %v1107_v38  ;;  %v1130_v46 = vld [vmem:[%s9328_s27 + $0x780] sm:$0xff]  ;;  %v1131_v48 = vld [vmem:[%s9328_s27 + $0x788] sm:$0xff]  ;;  %v7816_v50 = vcombine.low %v1082_v35, %v1106_v36 }
 0x2b3   : > { %v1154_v47 = vld [vmem:[%s9328_s27 + $0x840] sm:$0xff]  ;;  %v1155_v49 = vld [vmem:[%s9328_s27 + $0x848] sm:$0xff]  ;;  %v7818_v53 = vcombine.low %v1083_v37, %v1107_v38  ;;  %5807 = vmatprep.mubr.bf16.mxu0 %v9382_v8  ;;  %5848 = vmatprep.mubr.bf16.mxu1 %v9382_v8 }
 0x2b4   : > { %v7865_v54 = vcombine.high %v1130_v46, %v1154_v47  ;;  %v7867_v55 = vcombine.high %v1131_v48, %v1155_v49  ;;  %v1178_v56 = vld [vmem:[%s9328_s27 + $0x900] sm:$0xff]  ;;  %v1179_v58 = vld [vmem:[%s9328_s27 + $0x908] sm:$0xff]  ;;  %v7864_v60 = vcombine.low %v1130_v46, %v1154_v47  ;;  %v7866_v62 = vcombine.low %v1131_v48, %v1155_v49 }
 0x2b5   : > { %5780 = vmatpush1.bf16.msra.mxu0 %v7720_v31  ;;  %5821 = vmatpush1.bf16.msra.mxu1 %v7722_v32  ;;  %v1202_v57 = vld [vmem:[%s9328_s27 + $0x9c0] sm:$0xff]  ;;  %v1203_v59 = vld [vmem:[%s9328_s27 + $0x9c8] sm:$0xff] }
 0x2b6   : > { %5781 = vmatprep.subr.bf16.mxu0 %v7769_v33  ;;  %5822 = vmatprep.subr.bf16.mxu1 %v7771_v34  ;;  %v7913_v63 = vcombine.high %v1178_v56, %v1202_v57  ;;  %v7915_v1 = vcombine.high %v1179_v58, %v1203_v59  ;;  %v1226_v2 = vld [vmem:[%s9328_s27 + $0xa80] sm:$0xff]  ;;  %v1227_v5 = vld [vmem:[%s9328_s27 + $0xa88] sm:$0xff]  ;;  %v7912_v7 = vcombine.low %v1178_v56, %v1202_v57 }
 0x2b7   : > { %v1250_v3 = vld [vmem:[%s9328_s27 + $0xb40] sm:$0xff]  ;;  %v1251_v6 = vld [vmem:[%s9328_s27 + $0xb48] sm:$0xff]  ;;  %v7914_v9 = vcombine.low %v1179_v58, %v1203_v59 }
 0x2b8   : > { %v7961_v10 = vcombine.high %v1226_v2, %v1250_v3  ;;  %v7963_v11 = vcombine.high %v1227_v5, %v1251_v6  ;;  %v1274_v12 = vld [vmem:[%s9328_s27 + $0xc00] sm:$0xff]  ;;  %v1275_v14 = vld [vmem:[%s9328_s27 + $0xc08] sm:$0xff]  ;;  %v7960_v16 = vcombine.low %v1226_v2, %v1250_v3  ;;  %v7962_v17 = vcombine.low %v1227_v5, %v1251_v6 }
 0x2b9   : > { %5782 = vmatpush1.bf16.msra.mxu0 %v7768_v39  ;;  %5823 = vmatpush1.bf16.msra.mxu1 %v7770_v43  ;;  %v1298_v13 = vld [vmem:[%s9328_s27 + $0xcc0] sm:$0xff]  ;;  %v1299_v15 = vld [vmem:[%s9328_s27 + $0xcc8] sm:$0xff] }
 0x2ba   : > { %5783 = vmatprep.subr.bf16.mxu0 %v7817_v44  ;;  %5824 = vmatprep.subr.bf16.mxu1 %v7819_v45  ;;  %v8009_v18 = vcombine.high %v1274_v12, %v1298_v13  ;;  %v8011_v19 = vcombine.high %v1275_v14, %v1299_v15  ;;  %v1322_v20 = vld [vmem:[%s9328_s27 + $0xd80] sm:$0xff]  ;;  %v1323_v22 = vld [vmem:[%s9328_s27 + $0xd88] sm:$0xff]  ;;  %v8008_v24 = vcombine.low %v1274_v12, %v1298_v13 }
 0x2bb   : > { %v1346_v21 = vld [vmem:[%s9328_s27 + $0xe40] sm:$0xff]  ;;  %v1347_v23 = vld [vmem:[%s9328_s27 + $0xe48] sm:$0xff]  ;;  %v8010_v25 = vcombine.low %v1275_v14, %v1299_v15 }
 0x2bc   : > { %v8057_v26 = vcombine.high %v1322_v20, %v1346_v21  ;;  %v8059_v27 = vcombine.high %v1323_v22, %v1347_v23  ;;  %v1370_v28 = vld [vmem:[%s9328_s27 + $0xf00] sm:$0xff]  ;;  %v1371_v30 = vld [vmem:[%s9328_s27 + $0xf08] sm:$0xff]  ;;  %v8056_v32 = vcombine.low %v1322_v20, %v1346_v21  ;;  %v8058_v33 = vcombine.low %v1323_v22, %v1347_v23 }
 0x2bd   : > { %5784 = vmatpush1.bf16.msra.mxu0 %v7816_v50  ;;  %5825 = vmatpush1.bf16.msra.mxu1 %v7818_v53  ;;  %v1394_v29 = vld [vmem:[%s9328_s27 + $0xfc0] sm:$0xff]  ;;  %v1395_v31 = vld [vmem:[%s9328_s27 + $0xfc8] sm:$0xff] }
 0x2be   : > { %5785 = vmatprep.subr.bf16.mxu0 %v7865_v54  ;;  %5826 = vmatprep.subr.bf16.mxu1 %v7867_v55  ;;  %v8105_v34 = vcombine.high %v1370_v28, %v1394_v29  ;;  %v8107_v35 = vcombine.high %v1371_v30, %v1395_v31  ;;  %v1418_v36 = vld [vmem:[%s9328_s27 + $0x1080] sm:$0xff]  ;;  %v1419_v38 = vld [vmem:[%s9328_s27 + $0x1088] sm:$0xff]  ;;  %v8104_v40 = vcombine.low %v1370_v28, %v1394_v29  ;;  %v965_v28 = vld [vmem:[%s9328_s27 + $0x258] sm:$0xff] }
 0x2bf   : > { %v1442_v37 = vld [vmem:[%s9328_s27 + $0x1140] sm:$0xff]  ;;  %v1443_v39 = vld [vmem:[%s9328_s27 + $0x1148] sm:$0xff]  ;;  %v8106_v41 = vcombine.low %v1371_v30, %v1395_v31 }
 0x2c0   : > { %v8153_v42 = vcombine.high %v1418_v36, %v1442_v37  ;;  %v8155_v43 = vcombine.high %v1419_v38, %v1443_v39  ;;  %v1466_v44 = vld [vmem:[%s9328_s27 + $0x1200] sm:$0xff]  ;;  %v1467_v46 = vld [vmem:[%s9328_s27 + $0x1208] sm:$0xff]  ;;  %v8152_v48 = vcombine.low %v1418_v36, %v1442_v37  ;;  %v8154_v49 = vcombine.low %v1419_v38, %v1443_v39  ;;  %v1036_v39 = vld [vmem:[%s9328_s27 + $0x490] sm:$0xff] }
 0x2c1   : > { %5786 = vmatpush1.bf16.msra.mxu0 %v7864_v60  ;;  %5827 = vmatpush1.bf16.msra.mxu1 %v7866_v62  ;;  %v1490_v45 = vld [vmem:[%s9328_s27 + $0x12c0] sm:$0xff]  ;;  %v1491_v47 = vld [vmem:[%s9328_s27 + $0x12c8] sm:$0xff] }
 0x2c2   : > { %5787 = vmatprep.subr.bf16.mxu0 %v7913_v63  ;;  %5828 = vmatprep.subr.bf16.mxu1 %v7915_v1  ;;  %v8201_v50 = vcombine.high %v1466_v44, %v1490_v45  ;;  %v8203_v52 = vcombine.high %v1467_v46, %v1491_v47  ;;  %v1514_v53 = vld [vmem:[%s9328_s27 + $0x1380] sm:$0xff]  ;;  %v1515_v55 = vld [vmem:[%s9328_s27 + $0x1388] sm:$0xff]  ;;  %v8200_v57 = vcombine.low %v1466_v44, %v1490_v45 }
 0x2c3   : > { %v1538_v54 = vld [vmem:[%s9328_s27 + $0x1440] sm:$0xff]  ;;  %v1539_v56 = vld [vmem:[%s9328_s27 + $0x1448] sm:$0xff]  ;;  %v8202_v58 = vcombine.low %v1467_v46, %v1491_v47  ;;  %v1084_v47 = vld [vmem:[%s9328_s27 + $0x610] sm:$0xff] }
 0x2c4   : > { %v8249_v59 = vcombine.high %v1514_v53, %v1538_v54  ;;  %v8251_v60 = vcombine.high %v1515_v55, %v1539_v56  ;;  %v1562_v62 = vld [vmem:[%s9328_s27 + $0x1500] sm:$0xff]  ;;  %v1563_v1 = vld [vmem:[%s9328_s27 + $0x1508] sm:$0xff]  ;;  %v8248_v3 = vcombine.low %v1514_v53, %v1538_v54  ;;  %v8250_v4 = vcombine.low %v1515_v55, %v1539_v56  ;;  %v1132_v56 = vld [vmem:[%s9328_s27 + $0x790] sm:$0xff] }
 0x2c5   : > { %5788 = vmatpush1.bf16.msra.mxu0 %v7912_v7  ;;  %5829 = vmatpush1.bf16.msra.mxu1 %v7914_v9  ;;  %v1586_v63 = vld [vmem:[%s9328_s27 + $0x15c0] sm:$0xff]  ;;  %v1587_v2 = vld [vmem:[%s9328_s27 + $0x15c8] sm:$0xff] }
 0x2c6   : > { %5789 = vmatprep.subr.bf16.mxu0 %v7961_v10  ;;  %5830 = vmatprep.subr.bf16.mxu1 %v7963_v11  ;;  %v8297_v5 = vcombine.high %v1562_v62, %v1586_v63  ;;  %v8299_v6 = vcombine.high %v1563_v1, %v1587_v2  ;;  %v1610_v7 = vld [vmem:[%s9328_s27 + $0x1680] sm:$0xff]  ;;  %v1611_v10 = vld [vmem:[%s9328_s27 + $0x1688] sm:$0xff]  ;;  %v8296_v12 = vcombine.low %v1562_v62, %v1586_v63 }
 0x2c7   : > { %v1634_v9 = vld [vmem:[%s9328_s27 + $0x1740] sm:$0xff]  ;;  %v1635_v11 = vld [vmem:[%s9328_s27 + $0x1748] sm:$0xff]  ;;  %v8298_v13 = vcombine.low %v1563_v1, %v1587_v2  ;;  %v1180_v2 = vld [vmem:[%s9328_s27 + $0x910] sm:$0xff] }
 0x2c8   : > { %v8345_v14 = vcombine.high %v1610_v7, %v1634_v9  ;;  %v8347_v15 = vcombine.high %v1611_v10, %v1635_v11  ;;  %v8344_v20 = vcombine.low %v1610_v7, %v1634_v9  ;;  %v8346_v21 = vcombine.low %v1611_v10, %v1635_v11  ;;  %v1228_v11 = vld [vmem:[%s9328_s27 + $0xa90] sm:$0xff] }
 0x2c9   : > { %5790 = vmatpush1.bf16.msra.mxu0 %v7960_v16  ;;  %5831 = vmatpush1.bf16.msra.mxu1 %v7962_v17  ;;  %v892_v16 = vld [vmem:[%s9328_s27 + $0x10] sm:$0xff] }
 0x2ca   : > { %5791 = vmatprep.subr.bf16.mxu0 %v8009_v18  ;;  %5832 = vmatprep.subr.bf16.mxu1 %v8011_v19  ;;  %v916_v17 = vld [vmem:[%s9328_s27 + $0xd0] sm:$0xff]  ;;  %v893_v18 = vld [vmem:[%s9328_s27 + $0x18] sm:$0xff] }
 0x2cb   : > { %v917_v19 = vld [vmem:[%s9328_s27 + $0xd8] sm:$0xff]  ;;  %v7629_v22 = vcombine.high %v892_v16, %v916_v17  ;;  %v7628_v29 = vcombine.low %v892_v16, %v916_v17 }
 0x2cc   : > { %v7631_v23 = vcombine.high %v893_v18, %v917_v19  ;;  %v7630_v30 = vcombine.low %v893_v18, %v917_v19  ;;  %v1276_v19 = vld [vmem:[%s9328_s27 + $0xc10] sm:$0xff] }
 0x2cd   : > { %5792 = vmatpush1.bf16.msra.mxu0 %v8008_v24  ;;  %5833 = vmatpush1.bf16.msra.mxu1 %v8010_v25  ;;  %v940_v24 = vld [vmem:[%s9328_s27 + $0x190] sm:$0xff] }
 0x2ce   : > { %5793 = vmatprep.subr.bf16.mxu0 %v8057_v26  ;;  %5834 = vmatprep.subr.bf16.mxu1 %v8059_v27  ;;  %v964_v25 = vld [vmem:[%s9328_s27 + $0x250] sm:$0xff]  ;;  %v9426_v26 = vrot.slane %v9373_v0, %v9371_v61  ;;  %v941_v27 = vld [vmem:[%s9328_s27 + $0x198] sm:$0xff] }
 0x2cf   : > { %v7677_v31 = vcombine.high %v940_v24, %v964_v25  ;;  %v989_v61 = vld [vmem:[%s9328_s27 + $0x318] sm:$0xff]  ;;  %v7678_v36 = vcombine.low %v941_v27, %v965_v28 }
 0x2d0   : > { %v1013_v0 = vld [vmem:[%s9328_s27 + $0x3d8] sm:$0xff] }
 0x2d1   : > { %5794 = vmatpush1.bf16.msra.mxu0 %v8056_v32  ;;  %5835 = vmatpush1.bf16.msra.mxu1 %v8058_v33  ;;  %v7679_v32 = vcombine.high %v941_v27, %v965_v28  ;;  %v988_v33 = vld [vmem:[%s9328_s27 + $0x310] sm:$0xff]  ;;  %v7727_v38 = vcombine.high %v989_v61, %v1013_v0  ;;  %v7726_v44 = vcombine.low %v989_v61, %v1013_v0 }
 0x2d2   : > { %5795 = vmatprep.subr.bf16.mxu0 %v8105_v34  ;;  %5836 = vmatprep.subr.bf16.mxu1 %v8107_v35  ;;  %v1012_v34 = vld [vmem:[%s9328_s27 + $0x3d0] sm:$0xff]  ;;  %v7676_v35 = vcombine.low %v940_v24, %v964_v25 }
 0x2d3   : > { %v7725_v37 = vcombine.high %v988_v33, %v1012_v34  ;;  %v1324_v28 = vld [vmem:[%s9328_s27 + $0xd90] sm:$0xff] }
 0x2d4   : > { %v1372_v0 = vld [vmem:[%s9328_s27 + $0xf10] sm:$0xff] }
 0x2d5   : > { %5796 = vmatpush1.bf16.msra.mxu0 %v8104_v40  ;;  %5837 = vmatpush1.bf16.msra.mxu1 %v8106_v41  ;;  %v1060_v40 = vld [vmem:[%s9328_s27 + $0x550] sm:$0xff]  ;;  %v1037_v41 = vld [vmem:[%s9328_s27 + $0x498] sm:$0xff] }
 0x2d6   : > { %5797 = vmatprep.subr.bf16.mxu0 %v8153_v42  ;;  %5838 = vmatprep.subr.bf16.mxu1 %v8155_v43  ;;  %v1061_v42 = vld [vmem:[%s9328_s27 + $0x558] sm:$0xff]  ;;  %v7724_v43 = vcombine.low %v988_v33, %v1012_v34  ;;  %v7773_v45 = vcombine.high %v1036_v39, %v1060_v40 }
 0x2d7   : > { %v7775_v46 = vcombine.high %v1037_v41, %v1061_v42  ;;  %v7774_v53 = vcombine.low %v1037_v41, %v1061_v42  ;;  %v1420_v42 = vld [vmem:[%s9328_s27 + $0x1090] sm:$0xff] }
 0x2d9   : > { %5798 = vmatpush1.bf16.msra.mxu0 %v8152_v48  ;;  %5839 = vmatpush1.bf16.msra.mxu1 %v8154_v49  ;;  %v1108_v48 = vld [vmem:[%s9328_s27 + $0x6d0] sm:$0xff]  ;;  %v1085_v49 = vld [vmem:[%s9328_s27 + $0x618] sm:$0xff] }
 0x2da   : > { %5799 = vmatprep.subr.bf16.mxu0 %v8201_v50  ;;  %5840 = vmatprep.subr.bf16.mxu1 %v8203_v52  ;;  %v1109_v50 = vld [vmem:[%s9328_s27 + $0x6d8] sm:$0xff]  ;;  %v7772_v52 = vcombine.low %v1036_v39, %v1060_v40  ;;  %v7821_v54 = vcombine.high %v1084_v47, %v1108_v48 }
 0x2db   : > { %v7823_v55 = vcombine.high %v1085_v49, %v1109_v50  ;;  %v7822_v62 = vcombine.low %v1085_v49, %v1109_v50  ;;  %v1468_v50 = vld [vmem:[%s9328_s27 + $0x1210] sm:$0xff] }
 0x2dd   : > { %5800 = vmatpush1.bf16.msra.mxu0 %v8200_v57  ;;  %5841 = vmatpush1.bf16.msra.mxu1 %v8202_v58  ;;  %v1156_v57 = vld [vmem:[%s9328_s27 + $0x850] sm:$0xff]  ;;  %v1133_v58 = vld [vmem:[%s9328_s27 + $0x798] sm:$0xff] }
 0x2de   : > { %5801 = vmatprep.subr.bf16.mxu0 %v8249_v59  ;;  %5842 = vmatprep.subr.bf16.mxu1 %v8251_v60  ;;  %v1157_v59 = vld [vmem:[%s9328_s27 + $0x858] sm:$0xff]  ;;  %v7820_v60 = vcombine.low %v1084_v47, %v1108_v48  ;;  %v7869_v63 = vcombine.high %v1132_v56, %v1156_v57 }
 0x2df   : > { %v7871_v1 = vcombine.high %v1133_v58, %v1157_v59  ;;  %v7870_v7 = vcombine.low %v1133_v58, %v1157_v59  ;;  %v1516_v59 = vld [vmem:[%s9328_s27 + $0x1390] sm:$0xff] }
 0x2e1   : > { %5802 = vmatpush1.bf16.msra.mxu0 %v8248_v3  ;;  %5843 = vmatpush1.bf16.msra.mxu1 %v8250_v4  ;;  %v1204_v3 = vld [vmem:[%s9328_s27 + $0x9d0] sm:$0xff]  ;;  %v1181_v4 = vld [vmem:[%s9328_s27 + $0x918] sm:$0xff] }
 0x2e2   : > { %5803 = vmatprep.subr.bf16.mxu0 %v8297_v5  ;;  %5844 = vmatprep.subr.bf16.mxu1 %v8299_v6  ;;  %v1205_v5 = vld [vmem:[%s9328_s27 + $0x9d8] sm:$0xff]  ;;  %v7868_v6 = vcombine.low %v1132_v56, %v1156_v57  ;;  %v7917_v9 = vcombine.high %v1180_v2, %v1204_v3 }
 0x2e3   : > { %v7919_v10 = vcombine.high %v1181_v4, %v1205_v5  ;;  %v7918_v16 = vcombine.low %v1181_v4, %v1205_v5  ;;  %v1564_v5 = vld [vmem:[%s9328_s27 + $0x1510] sm:$0xff] }
 0x2e5   : > { %5804 = vmatpush1.bf16.msra.mxu0 %v8296_v12  ;;  %5845 = vmatpush1.bf16.msra.mxu1 %v8298_v13  ;;  %v1252_v12 = vld [vmem:[%s9328_s27 + $0xb50] sm:$0xff]  ;;  %v1229_v13 = vld [vmem:[%s9328_s27 + $0xa98] sm:$0xff] }
 0x2e6   : > { %5805 = vmatprep.subr.bf16.mxu0 %v8345_v14  ;;  %5846 = vmatprep.subr.bf16.mxu1 %v8347_v15  ;;  %v1253_v14 = vld [vmem:[%s9328_s27 + $0xb58] sm:$0xff]  ;;  %v7916_v15 = vcombine.low %v1180_v2, %v1204_v3  ;;  %v7965_v17 = vcombine.high %v1228_v11, %v1252_v12 }
 0x2e7   : > { %v7967_v18 = vcombine.high %v1229_v13, %v1253_v14  ;;  %v7966_v24 = vcombine.low %v1229_v13, %v1253_v14  ;;  %v1612_v14 = vld [vmem:[%s9328_s27 + $0x1690] sm:$0xff] }
 0x2e9   : > { %5806 = vmatpush1.bf16.msra.mxu0 %v8344_v20  ;;  %5847 = vmatpush1.bf16.msra.mxu1 %v8346_v21  ;;  %v1300_v20 = vld [vmem:[%s9328_s27 + $0xcd0] sm:$0xff]  ;;  %v1277_v21 = vld [vmem:[%s9328_s27 + $0xc18] sm:$0xff] }
 0x2ea   : > { %5857 = vmatprep.subr.bf16.mxu0 %v7629_v22  ;;  %5898 = vmatprep.subr.bf16.mxu1 %v7631_v23  ;;  %v1301_v22 = vld [vmem:[%s9328_s27 + $0xcd8] sm:$0xff]  ;;  %v7964_v23 = vcombine.low %v1228_v11, %v1252_v12  ;;  %v8013_v25 = vcombine.high %v1276_v19, %v1300_v20 }
 0x2eb   : > { %v8015_v27 = vcombine.high %v1277_v21, %v1301_v22  ;;  %v8014_v33 = vcombine.low %v1277_v21, %v1301_v22  ;;  %v894_v22 = vld [vmem:[%s9328_s27 + $0x20] sm:$0xff] }
 0x2ec   : > { %5808 = vmatmul.mubr.bf16.vlgmr.msra.gmra.mrb[0].mxu0 %v9426_v26  ;;  %5849 = vmatmul.mubr.bf16.vlgmr.msra.gmra.mrb[0].mxu1 %v9426_v26 }
 0x2ed   : > { %5858 = vmatpush1.bf16.msra.mxu0 %v7628_v29  ;;  %5899 = vmatpush1.bf16.msra.mxu1 %v7630_v30  ;;  %v1348_v29 = vld [vmem:[%s9328_s27 + $0xe50] sm:$0xff]  ;;  %v1325_v30 = vld [vmem:[%s9328_s27 + $0xd98] sm:$0xff] }
 0x2ee   : > { %5859 = vmatprep.subr.bf16.mxu0 %v7677_v31  ;;  %5900 = vmatprep.subr.bf16.mxu1 %v7679_v32  ;;  %v1349_v31 = vld [vmem:[%s9328_s27 + $0xe58] sm:$0xff]  ;;  %v8012_v32 = vcombine.low %v1276_v19, %v1300_v20  ;;  %v8061_v34 = vcombine.high %v1324_v28, %v1348_v29 }
 0x2ef   : > { %5889 = vmatprep.mubr.bf16.mxu0 %v9382_v8  ;;  %5930 = vmatprep.mubr.bf16.mxu1 %v9382_v8  ;;  %v8063_v61 = vcombine.high %v1325_v30, %v1349_v31  ;;  %v8062_v39 = vcombine.low %v1325_v30, %v1349_v31  ;;  %v942_v31 = vld [vmem:[%s9328_s27 + $0x1a0] sm:$0xff] }
 0x2f1   : > { %5860 = vmatpush1.bf16.msra.mxu0 %v7676_v35  ;;  %5901 = vmatpush1.bf16.msra.mxu1 %v7678_v36  ;;  %v1396_v35 = vld [vmem:[%s9328_s27 + $0xfd0] sm:$0xff]  ;;  %v1373_v36 = vld [vmem:[%s9328_s27 + $0xf18] sm:$0xff] }
 0x2f2   : > { %5861 = vmatprep.subr.bf16.mxu0 %v7725_v37  ;;  %5902 = vmatprep.subr.bf16.mxu1 %v7727_v38  ;;  %v1397_v37 = vld [vmem:[%s9328_s27 + $0xfd8] sm:$0xff]  ;;  %v8060_v38 = vcombine.low %v1324_v28, %v1348_v29  ;;  %v8109_v40 = vcombine.high %v1372_v0, %v1396_v35 }
 0x2f3   : > { %v8111_v41 = vcombine.high %v1373_v36, %v1397_v37  ;;  %v8110_v47 = vcombine.low %v1373_v36, %v1397_v37  ;;  %v990_v37 = vld [vmem:[%s9328_s27 + $0x320] sm:$0xff] }
 0x2f5   : > { %5862 = vmatpush1.bf16.msra.mxu0 %v7724_v43  ;;  %5903 = vmatpush1.bf16.msra.mxu1 %v7726_v44  ;;  %v1444_v43 = vld [vmem:[%s9328_s27 + $0x1150] sm:$0xff]  ;;  %v1421_v44 = vld [vmem:[%s9328_s27 + $0x1098] sm:$0xff] }
 0x2f6   : > { %5863 = vmatprep.subr.bf16.mxu0 %v7773_v45  ;;  %5904 = vmatprep.subr.bf16.mxu1 %v7775_v46  ;;  %v1445_v45 = vld [vmem:[%s9328_s27 + $0x1158] sm:$0xff]  ;;  %v8108_v46 = vcombine.low %v1372_v0, %v1396_v35  ;;  %v8157_v48 = vcombine.high %v1420_v42, %v1444_v43 }
 0x2f7   : > { %v8159_v49 = vcombine.high %v1421_v44, %v1445_v45  ;;  %v8158_v56 = vcombine.low %v1421_v44, %v1445_v45  ;;  %v1038_v45 = vld [vmem:[%s9328_s27 + $0x4a0] sm:$0xff] }
 0x2f9   : > { %5864 = vmatpush1.bf16.msra.mxu0 %v7772_v52  ;;  %5905 = vmatpush1.bf16.msra.mxu1 %v7774_v53  ;;  %v1492_v52 = vld [vmem:[%s9328_s27 + $0x12d0] sm:$0xff]  ;;  %v1469_v53 = vld [vmem:[%s9328_s27 + $0x1218] sm:$0xff] }
 0x2fa   : > { %5865 = vmatprep.subr.bf16.mxu0 %v7821_v54  ;;  %5906 = vmatprep.subr.bf16.mxu1 %v7823_v55  ;;  %v1493_v54 = vld [vmem:[%s9328_s27 + $0x12d8] sm:$0xff]  ;;  %v8156_v55 = vcombine.low %v1420_v42, %v1444_v43  ;;  %v8205_v57 = vcombine.high %v1468_v50, %v1492_v52 }
 0x2fb   : > { %v8207_v58 = vcombine.high %v1469_v53, %v1493_v54  ;;  %v8206_v2 = vcombine.low %v1469_v53, %v1493_v54  ;;  %v1086_v54 = vld [vmem:[%s9328_s27 + $0x620] sm:$0xff] }
 0x2fd   : > { %5866 = vmatpush1.bf16.msra.mxu0 %v7820_v60  ;;  %5907 = vmatpush1.bf16.msra.mxu1 %v7822_v62  ;;  %v1540_v60 = vld [vmem:[%s9328_s27 + $0x1450] sm:$0xff]  ;;  %v1517_v62 = vld [vmem:[%s9328_s27 + $0x1398] sm:$0xff] }
 0x2fe   : > { %5867 = vmatprep.subr.bf16.mxu0 %v7869_v63  ;;  %5908 = vmatprep.subr.bf16.mxu1 %v7871_v1  ;;  %v1541_v63 = vld [vmem:[%s9328_s27 + $0x1458] sm:$0xff]  ;;  %v8204_v1 = vcombine.low %v1468_v50, %v1492_v52  ;;  %v8253_v3 = vcombine.high %v1516_v59, %v1540_v60 }
 0x2ff   : > { %v8255_v4 = vcombine.high %v1517_v62, %v1541_v63  ;;  %v8254_v11 = vcombine.low %v1517_v62, %v1541_v63  ;;  %v1134_v63 = vld [vmem:[%s9328_s27 + $0x7a0] sm:$0xff] }
 0x301   : > { %5868 = vmatpush1.bf16.msra.mxu0 %v7868_v6  ;;  %5909 = vmatpush1.bf16.msra.mxu1 %v7870_v7  ;;  %v1588_v6 = vld [vmem:[%s9328_s27 + $0x15d0] sm:$0xff]  ;;  %v1565_v7 = vld [vmem:[%s9328_s27 + $0x1518] sm:$0xff] }
 0x302   : > { %5869 = vmatprep.subr.bf16.mxu0 %v7917_v9  ;;  %5910 = vmatprep.subr.bf16.mxu1 %v7919_v10  ;;  %v1589_v9 = vld [vmem:[%s9328_s27 + $0x15d8] sm:$0xff]  ;;  %v8252_v10 = vcombine.low %v1516_v59, %v1540_v60  ;;  %v8301_v12 = vcombine.high %v1564_v5, %v1588_v6 }
 0x303   : > { %v8303_v13 = vcombine.high %v1565_v7, %v1589_v9  ;;  %v8302_v19 = vcombine.low %v1565_v7, %v1589_v9  ;;  %v1182_v9 = vld [vmem:[%s9328_s27 + $0x920] sm:$0xff] }
 0x305   : > { %5870 = vmatpush1.bf16.msra.mxu0 %v7916_v15  ;;  %5911 = vmatpush1.bf16.msra.mxu1 %v7918_v16  ;;  %v1636_v15 = vld [vmem:[%s9328_s27 + $0x1750] sm:$0xff]  ;;  %v1613_v16 = vld [vmem:[%s9328_s27 + $0x1698] sm:$0xff] }
 0x306   : > { %5871 = vmatprep.subr.bf16.mxu0 %v7965_v17  ;;  %5912 = vmatprep.subr.bf16.mxu1 %v7967_v18  ;;  %v1637_v17 = vld [vmem:[%s9328_s27 + $0x1758] sm:$0xff]  ;;  %v8300_v18 = vcombine.low %v1564_v5, %v1588_v6  ;;  %v8349_v20 = vcombine.high %v1612_v14, %v1636_v15 }
 0x307   : > { %v8351_v21 = vcombine.high %v1613_v16, %v1637_v17  ;;  %v8350_v28 = vcombine.low %v1613_v16, %v1637_v17  ;;  %v1230_v17 = vld [vmem:[%s9328_s27 + $0xaa0] sm:$0xff] }
 0x309   : > { %5872 = vmatpush1.bf16.msra.mxu0 %v7964_v23  ;;  %5913 = vmatpush1.bf16.msra.mxu1 %v7966_v24  ;;  %v918_v23 = vld [vmem:[%s9328_s27 + $0xe0] sm:$0xff]  ;;  %v895_v24 = vld [vmem:[%s9328_s27 + $0x28] sm:$0xff] }
 0x30a   : > { %5873 = vmatprep.subr.bf16.mxu0 %v8013_v25  ;;  %5914 = vmatprep.subr.bf16.mxu1 %v8015_v27  ;;  %v919_v25 = vld [vmem:[%s9328_s27 + $0xe8] sm:$0xff]  ;;  %v8348_v27 = vcombine.low %v1612_v14, %v1636_v15  ;;  %v7633_v29 = vcombine.high %v894_v22, %v918_v23 }
 0x30b   : > { %v7635_v30 = vcombine.high %v895_v24, %v919_v25  ;;  %v7634_v0 = vcombine.low %v895_v24, %v919_v25  ;;  %v1278_v25 = vld [vmem:[%s9328_s27 + $0xc20] sm:$0xff] }
 0x30d   : > { %5874 = vmatpush1.bf16.msra.mxu0 %v8012_v32  ;;  %5915 = vmatpush1.bf16.msra.mxu1 %v8014_v33  ;;  %v966_v32 = vld [vmem:[%s9328_s27 + $0x260] sm:$0xff]  ;;  %v943_v33 = vld [vmem:[%s9328_s27 + $0x1a8] sm:$0xff] }
 0x30e   : > { %5875 = vmatprep.subr.bf16.mxu0 %v8061_v34  ;;  %5916 = vmatprep.subr.bf16.mxu1 %v8063_v61  ;;  %v967_v34 = vld [vmem:[%s9328_s27 + $0x268] sm:$0xff]  ;;  %v7632_v61 = vcombine.low %v894_v22, %v918_v23  ;;  %v7681_v35 = vcombine.high %v942_v31, %v966_v32 }
 0x30f   : > { %v7683_v36 = vcombine.high %v943_v33, %v967_v34  ;;  %v7682_v42 = vcombine.low %v943_v33, %v967_v34  ;;  %v1326_v34 = vld [vmem:[%s9328_s27 + $0xda0] sm:$0xff] }
 0x311   : > { %5876 = vmatpush1.bf16.msra.mxu0 %v8060_v38  ;;  %5917 = vmatpush1.bf16.msra.mxu1 %v8062_v39  ;;  %v1014_v38 = vld [vmem:[%s9328_s27 + $0x3e0] sm:$0xff]  ;;  %v991_v39 = vld [vmem:[%s9328_s27 + $0x328] sm:$0xff] }
 0x312   : > { %5877 = vmatprep.subr.bf16.mxu0 %v8109_v40  ;;  %5918 = vmatprep.subr.bf16.mxu1 %v8111_v41  ;;  %v1015_v40 = vld [vmem:[%s9328_s27 + $0x3e8] sm:$0xff]  ;;  %v7680_v41 = vcombine.low %v942_v31, %v966_v32  ;;  %v7729_v43 = vcombine.high %v990_v37, %v1014_v38 }
 0x313   : > { %v7731_v44 = vcombine.high %v991_v39, %v1015_v40  ;;  %v7730_v50 = vcombine.low %v991_v39, %v1015_v40  ;;  %v1374_v40 = vld [vmem:[%s9328_s27 + $0xf20] sm:$0xff] }
 0x315   : > { %5878 = vmatpush1.bf16.msra.mxu0 %v8108_v46  ;;  %5919 = vmatpush1.bf16.msra.mxu1 %v8110_v47  ;;  %v1062_v46 = vld [vmem:[%s9328_s27 + $0x560] sm:$0xff]  ;;  %v1039_v47 = vld [vmem:[%s9328_s27 + $0x4a8] sm:$0xff] }
 0x316   : > { %5879 = vmatprep.subr.bf16.mxu0 %v8157_v48  ;;  %5920 = vmatprep.subr.bf16.mxu1 %v8159_v49  ;;  %v1063_v48 = vld [vmem:[%s9328_s27 + $0x568] sm:$0xff]  ;;  %v7728_v49 = vcombine.low %v990_v37, %v1014_v38  ;;  %v7777_v52 = vcombine.high %v1038_v45, %v1062_v46 }
 0x317   : > { %v7779_v53 = vcombine.high %v1039_v47, %v1063_v48  ;;  %v7778_v59 = vcombine.low %v1039_v47, %v1063_v48  ;;  %v1422_v48 = vld [vmem:[%s9328_s27 + $0x10a0] sm:$0xff] }
 0x319   : > { %5880 = vmatpush1.bf16.msra.mxu0 %v8156_v55  ;;  %5921 = vmatpush1.bf16.msra.mxu1 %v8158_v56  ;;  %v1110_v55 = vld [vmem:[%s9328_s27 + $0x6e0] sm:$0xff]  ;;  %v1087_v56 = vld [vmem:[%s9328_s27 + $0x628] sm:$0xff] }
 0x31a   : > { %5881 = vmatprep.subr.bf16.mxu0 %v8205_v57  ;;  %5922 = vmatprep.subr.bf16.mxu1 %v8207_v58  ;;  %v1111_v57 = vld [vmem:[%s9328_s27 + $0x6e8] sm:$0xff]  ;;  %v7776_v58 = vcombine.low %v1038_v45, %v1062_v46  ;;  %v7825_v60 = vcombine.high %v1086_v54, %v1110_v55 }
 0x31b   : > { %v7827_v62 = vcombine.high %v1087_v56, %v1111_v57  ;;  %v7826_v5 = vcombine.low %v1087_v56, %v1111_v57  ;;  %v1470_v57 = vld [vmem:[%s9328_s27 + $0x1220] sm:$0xff] }
 0x31d   : > { %5882 = vmatpush1.bf16.msra.mxu0 %v8204_v1  ;;  %5923 = vmatpush1.bf16.msra.mxu1 %v8206_v2  ;;  %v1158_v1 = vld [vmem:[%s9328_s27 + $0x860] sm:$0xff]  ;;  %v1135_v2 = vld [vmem:[%s9328_s27 + $0x7a8] sm:$0xff] }
 0x31e   : > { %5883 = vmatprep.subr.bf16.mxu0 %v8253_v3  ;;  %5924 = vmatprep.subr.bf16.mxu1 %v8255_v4  ;;  %v1159_v3 = vld [vmem:[%s9328_s27 + $0x868] sm:$0xff]  ;;  %v7824_v4 = vcombine.low %v1086_v54, %v1110_v55  ;;  %v7873_v6 = vcombine.high %v1134_v63, %v1158_v1 }
 0x31f   : > { %v7875_v7 = vcombine.high %v1135_v2, %v1159_v3  ;;  %v7874_v14 = vcombine.low %v1135_v2, %v1159_v3  ;;  %v1518_v3 = vld [vmem:[%s9328_s27 + $0x13a0] sm:$0xff] }
 0x321   : > { %5884 = vmatpush1.bf16.msra.mxu0 %v8252_v10  ;;  %5925 = vmatpush1.bf16.msra.mxu1 %v8254_v11  ;;  %v1206_v10 = vld [vmem:[%s9328_s27 + $0x9e0] sm:$0xff]  ;;  %v1183_v11 = vld [vmem:[%s9328_s27 + $0x928] sm:$0xff] }
 0x322   : > { %5885 = vmatprep.subr.bf16.mxu0 %v8301_v12  ;;  %5926 = vmatprep.subr.bf16.mxu1 %v8303_v13  ;;  %v1207_v12 = vld [vmem:[%s9328_s27 + $0x9e8] sm:$0xff]  ;;  %v7872_v13 = vcombine.low %v1134_v63, %v1158_v1  ;;  %v7921_v15 = vcombine.high %v1182_v9, %v1206_v10 }
 0x323   : > { %v7923_v16 = vcombine.high %v1183_v11, %v1207_v12  ;;  %v7922_v22 = vcombine.low %v1183_v11, %v1207_v12  ;;  %v1566_v12 = vld [vmem:[%s9328_s27 + $0x1520] sm:$0xff] }
 0x325   : > { %5886 = vmatpush1.bf16.msra.mxu0 %v8300_v18  ;;  %5927 = vmatpush1.bf16.msra.mxu1 %v8302_v19  ;;  %v1254_v18 = vld [vmem:[%s9328_s27 + $0xb60] sm:$0xff]  ;;  %v1231_v19 = vld [vmem:[%s9328_s27 + $0xaa8] sm:$0xff] }
 0x326   : > { %5887 = vmatprep.subr.bf16.mxu0 %v8349_v20  ;;  %5928 = vmatprep.subr.bf16.mxu1 %v8351_v21  ;;  %v1255_v20 = vld [vmem:[%s9328_s27 + $0xb68] sm:$0xff]  ;;  %v7920_v21 = vcombine.low %v1182_v9, %v1206_v10  ;;  %v7969_v23 = vcombine.high %v1230_v17, %v1254_v18 }
 0x327   : > { %v7971_v24 = vcombine.high %v1231_v19, %v1255_v20  ;;  %v7970_v31 = vcombine.low %v1231_v19, %v1255_v20  ;;  %v1614_v20 = vld [vmem:[%s9328_s27 + $0x16a0] sm:$0xff] }
 0x329   : > { %5888 = vmatpush1.bf16.msra.mxu0 %v8348_v27  ;;  %5929 = vmatpush1.bf16.msra.mxu1 %v8350_v28  ;;  %v1302_v27 = vld [vmem:[%s9328_s27 + $0xce0] sm:$0xff]  ;;  %v1279_v28 = vld [vmem:[%s9328_s27 + $0xc28] sm:$0xff] }
 0x32a   : > { %5939 = vmatprep.subr.bf16.mxu0 %v7633_v29  ;;  %5980 = vmatprep.subr.bf16.mxu1 %v7635_v30  ;;  %v1303_v29 = vld [vmem:[%s9328_s27 + $0xce8] sm:$0xff]  ;;  %v7968_v30 = vcombine.low %v1230_v17, %v1254_v18  ;;  %v8017_v32 = vcombine.high %v1278_v25, %v1302_v27 }
 0x32b   : > { %v8019_v33 = vcombine.high %v1279_v28, %v1303_v29  ;;  %v8018_v37 = vcombine.low %v1279_v28, %v1303_v29  ;;  %v896_v29 = vld [vmem:[%s9328_s27 + $0x30] sm:$0xff] }
 0x32c   : > { %5890 = vmatmul.mubr.bf16.vlgmr.msra.gmra.mrb[4].mxu0 %v9426_v26  ;;  %5931 = vmatmul.mubr.bf16.vlgmr.msra.gmra.mrb[4].mxu1 %v9426_v26 }
 0x32d   : > { %5940 = vmatpush1.bf16.msra.mxu0 %v7632_v61  ;;  %5981 = vmatpush1.bf16.msra.mxu1 %v7634_v0  ;;  %v1350_v61 = vld [vmem:[%s9328_s27 + $0xe60] sm:$0xff]  ;;  %v1327_v0 = vld [vmem:[%s9328_s27 + $0xda8] sm:$0xff] }
 0x32e   : > { %5941 = vmatprep.subr.bf16.mxu0 %v7681_v35  ;;  %5982 = vmatprep.subr.bf16.mxu1 %v7683_v36  ;;  %v1351_v35 = vld [vmem:[%s9328_s27 + $0xe68] sm:$0xff]  ;;  %v8016_v36 = vcombine.low %v1278_v25, %v1302_v27  ;;  %v8065_v38 = vcombine.high %v1326_v34, %v1350_v61 }
 0x32f   : > { %5971 = vmatprep.mubr.bf16.mxu0 %v9382_v8  ;;  %6012 = vmatprep.mubr.bf16.mxu1 %v9382_v8  ;;  %v8067_v39 = vcombine.high %v1327_v0, %v1351_v35  ;;  %v8066_v45 = vcombine.low %v1327_v0, %v1351_v35  ;;  %v944_v35 = vld [vmem:[%s9328_s27 + $0x1b0] sm:$0xff] }
 0x331   : > { %5942 = vmatpush1.bf16.msra.mxu0 %v7680_v41  ;;  %5983 = vmatpush1.bf16.msra.mxu1 %v7682_v42  ;;  %v1398_v41 = vld [vmem:[%s9328_s27 + $0xfe0] sm:$0xff]  ;;  %v1375_v42 = vld [vmem:[%s9328_s27 + $0xf28] sm:$0xff] }
 0x332   : > { %5943 = vmatprep.subr.bf16.mxu0 %v7729_v43  ;;  %5984 = vmatprep.subr.bf16.mxu1 %v7731_v44  ;;  %v1399_v43 = vld [vmem:[%s9328_s27 + $0xfe8] sm:$0xff]  ;;  %v8064_v44 = vcombine.low %v1326_v34, %v1350_v61  ;;  %v8113_v46 = vcombine.high %v1374_v40, %v1398_v41 }
 0x333   : > { %v8115_v47 = vcombine.high %v1375_v42, %v1399_v43  ;;  %v8114_v54 = vcombine.low %v1375_v42, %v1399_v43  ;;  %v992_v43 = vld [vmem:[%s9328_s27 + $0x330] sm:$0xff] }
 0x335   : > { %5944 = vmatpush1.bf16.msra.mxu0 %v7728_v49  ;;  %5985 = vmatpush1.bf16.msra.mxu1 %v7730_v50  ;;  %v1446_v49 = vld [vmem:[%s9328_s27 + $0x1160] sm:$0xff]  ;;  %v1423_v50 = vld [vmem:[%s9328_s27 + $0x10a8] sm:$0xff] }
 0x336   : > { %5945 = vmatprep.subr.bf16.mxu0 %v7777_v52  ;;  %5986 = vmatprep.subr.bf16.mxu1 %v7779_v53  ;;  %v1447_v52 = vld [vmem:[%s9328_s27 + $0x1168] sm:$0xff]  ;;  %v8112_v53 = vcombine.low %v1374_v40, %v1398_v41  ;;  %v8161_v55 = vcombine.high %v1422_v48, %v1446_v49 }
 0x337   : > { %v8163_v56 = vcombine.high %v1423_v50, %v1447_v52  ;;  %v8162_v63 = vcombine.low %v1423_v50, %v1447_v52  ;;  %v1040_v52 = vld [vmem:[%s9328_s27 + $0x4b0] sm:$0xff] }
 0x339   : > { %5946 = vmatpush1.bf16.msra.mxu0 %v7776_v58  ;;  %5987 = vmatpush1.bf16.msra.mxu1 %v7778_v59  ;;  %v1494_v58 = vld [vmem:[%s9328_s27 + $0x12e0] sm:$0xff]  ;;  %v1471_v59 = vld [vmem:[%s9328_s27 + $0x1228] sm:$0xff] }
 0x33a   : > { %5947 = vmatprep.subr.bf16.mxu0 %v7825_v60  ;;  %5988 = vmatprep.subr.bf16.mxu1 %v7827_v62  ;;  %v1495_v60 = vld [vmem:[%s9328_s27 + $0x12e8] sm:$0xff]  ;;  %v8160_v62 = vcombine.low %v1422_v48, %v1446_v49  ;;  %v8209_v1 = vcombine.high %v1470_v57, %v1494_v58 }
 0x33b   : > { %v8211_v2 = vcombine.high %v1471_v59, %v1495_v60  ;;  %v8210_v9 = vcombine.low %v1471_v59, %v1495_v60  ;;  %v1088_v60 = vld [vmem:[%s9328_s27 + $0x630] sm:$0xff] }
 0x33d   : > { %5948 = vmatpush1.bf16.msra.mxu0 %v7824_v4  ;;  %5989 = vmatpush1.bf16.msra.mxu1 %v7826_v5  ;;  %v1542_v4 = vld [vmem:[%s9328_s27 + $0x1460] sm:$0xff]  ;;  %v1519_v5 = vld [vmem:[%s9328_s27 + $0x13a8] sm:$0xff] }
 0x33e   : > { %5949 = vmatprep.subr.bf16.mxu0 %v7873_v6  ;;  %5990 = vmatprep.subr.bf16.mxu1 %v7875_v7  ;;  %v1543_v6 = vld [vmem:[%s9328_s27 + $0x1468] sm:$0xff]  ;;  %v8208_v7 = vcombine.low %v1470_v57, %v1494_v58  ;;  %v8257_v10 = vcombine.high %v1518_v3, %v1542_v4 }
 0x33f   : > { %v8259_v11 = vcombine.high %v1519_v5, %v1543_v6  ;;  %v8258_v17 = vcombine.low %v1519_v5, %v1543_v6  ;;  %v1136_v6 = vld [vmem:[%s9328_s27 + $0x7b0] sm:$0xff] }
 0x341   : > { %5950 = vmatpush1.bf16.msra.mxu0 %v7872_v13  ;;  %5991 = vmatpush1.bf16.msra.mxu1 %v7874_v14  ;;  %v1590_v13 = vld [vmem:[%s9328_s27 + $0x15e0] sm:$0xff]  ;;  %v1567_v14 = vld [vmem:[%s9328_s27 + $0x1528] sm:$0xff] }
 0x342   : > { %5951 = vmatprep.subr.bf16.mxu0 %v7921_v15  ;;  %5992 = vmatprep.subr.bf16.mxu1 %v7923_v16  ;;  %v1591_v15 = vld [vmem:[%s9328_s27 + $0x15e8] sm:$0xff]  ;;  %v8256_v16 = vcombine.low %v1518_v3, %v1542_v4  ;;  %v8305_v18 = vcombine.high %v1566_v12, %v1590_v13 }
 0x343   : > { %v8307_v19 = vcombine.high %v1567_v14, %v1591_v15  ;;  %v8306_v25 = vcombine.low %v1567_v14, %v1591_v15  ;;  %v1184_v15 = vld [vmem:[%s9328_s27 + $0x930] sm:$0xff] }
 0x345   : > { %5952 = vmatpush1.bf16.msra.mxu0 %v7920_v21  ;;  %5993 = vmatpush1.bf16.msra.mxu1 %v7922_v22  ;;  %v1638_v21 = vld [vmem:[%s9328_s27 + $0x1760] sm:$0xff]  ;;  %v1615_v22 = vld [vmem:[%s9328_s27 + $0x16a8] sm:$0xff] }
 0x346   : > { %5953 = vmatprep.subr.bf16.mxu0 %v7969_v23  ;;  %5994 = vmatprep.subr.bf16.mxu1 %v7971_v24  ;;  %v1639_v23 = vld [vmem:[%s9328_s27 + $0x1768] sm:$0xff]  ;;  %v8304_v24 = vcombine.low %v1566_v12, %v1590_v13  ;;  %v8353_v27 = vcombine.high %v1614_v20, %v1638_v21 }
 0x347   : > { %v8355_v28 = vcombine.high %v1615_v22, %v1639_v23  ;;  %v8354_v34 = vcombine.low %v1615_v22, %v1639_v23  ;;  %v1232_v23 = vld [vmem:[%s9328_s27 + $0xab0] sm:$0xff] }
 0x349   : > { %5954 = vmatpush1.bf16.msra.mxu0 %v7968_v30  ;;  %5995 = vmatpush1.bf16.msra.mxu1 %v7970_v31  ;;  %v920_v30 = vld [vmem:[%s9328_s27 + $0xf0] sm:$0xff]  ;;  %v897_v31 = vld [vmem:[%s9328_s27 + $0x38] sm:$0xff] }
 0x34a   : > { %5955 = vmatprep.subr.bf16.mxu0 %v8017_v32  ;;  %5996 = vmatprep.subr.bf16.mxu1 %v8019_v33  ;;  %v921_v32 = vld [vmem:[%s9328_s27 + $0xf8] sm:$0xff]  ;;  %v8352_v33 = vcombine.low %v1614_v20, %v1638_v21  ;;  %v7637_v61 = vcombine.high %v896_v29, %v920_v30 }
 0x34b   : > { %v7639_v0 = vcombine.high %v897_v31, %v921_v32  ;;  %v7638_v40 = vcombine.low %v897_v31, %v921_v32  ;;  %v1280_v32 = vld [vmem:[%s9328_s27 + $0xc30] sm:$0xff] }
 0x34d   : > { %5956 = vmatpush1.bf16.msra.mxu0 %v8016_v36  ;;  %5997 = vmatpush1.bf16.msra.mxu1 %v8018_v37  ;;  %v968_v36 = vld [vmem:[%s9328_s27 + $0x270] sm:$0xff]  ;;  %v945_v37 = vld [vmem:[%s9328_s27 + $0x1b8] sm:$0xff] }
 0x34e   : > { %5957 = vmatprep.subr.bf16.mxu0 %v8065_v38  ;;  %5998 = vmatprep.subr.bf16.mxu1 %v8067_v39  ;;  %v969_v38 = vld [vmem:[%s9328_s27 + $0x278] sm:$0xff]  ;;  %v7636_v39 = vcombine.low %v896_v29, %v920_v30  ;;  %v7685_v41 = vcombine.high %v944_v35, %v968_v36 }
 0x34f   : > { %v7687_v42 = vcombine.high %v945_v37, %v969_v38  ;;  %v7686_v48 = vcombine.low %v945_v37, %v969_v38  ;;  %v1328_v38 = vld [vmem:[%s9328_s27 + $0xdb0] sm:$0xff] }
 0x351   : > { %5958 = vmatpush1.bf16.msra.mxu0 %v8064_v44  ;;  %5999 = vmatpush1.bf16.msra.mxu1 %v8066_v45  ;;  %v1016_v44 = vld [vmem:[%s9328_s27 + $0x3f0] sm:$0xff]  ;;  %v993_v45 = vld [vmem:[%s9328_s27 + $0x338] sm:$0xff] }
 0x352   : > { %5959 = vmatprep.subr.bf16.mxu0 %v8113_v46  ;;  %6000 = vmatprep.subr.bf16.mxu1 %v8115_v47  ;;  %v1017_v46 = vld [vmem:[%s9328_s27 + $0x3f8] sm:$0xff]  ;;  %v7684_v47 = vcombine.low %v944_v35, %v968_v36  ;;  %v7733_v49 = vcombine.high %v992_v43, %v1016_v44 }
 0x353   : > { %v7735_v50 = vcombine.high %v993_v45, %v1017_v46  ;;  %v7734_v57 = vcombine.low %v993_v45, %v1017_v46  ;;  %v1376_v46 = vld [vmem:[%s9328_s27 + $0xf30] sm:$0xff] }
 0x355   : > { %5960 = vmatpush1.bf16.msra.mxu0 %v8112_v53  ;;  %6001 = vmatpush1.bf16.msra.mxu1 %v8114_v54  ;;  %v1064_v53 = vld [vmem:[%s9328_s27 + $0x570] sm:$0xff]  ;;  %v1041_v54 = vld [vmem:[%s9328_s27 + $0x4b8] sm:$0xff] }
 0x356   : > { %5961 = vmatprep.subr.bf16.mxu0 %v8161_v55  ;;  %6002 = vmatprep.subr.bf16.mxu1 %v8163_v56  ;;  %v1065_v55 = vld [vmem:[%s9328_s27 + $0x578] sm:$0xff]  ;;  %v7732_v56 = vcombine.low %v992_v43, %v1016_v44  ;;  %v7781_v58 = vcombine.high %v1040_v52, %v1064_v53 }
 0x357   : > { %v7783_v59 = vcombine.high %v1041_v54, %v1065_v55  ;;  %v7782_v3 = vcombine.low %v1041_v54, %v1065_v55  ;;  %v1424_v55 = vld [vmem:[%s9328_s27 + $0x10b0] sm:$0xff] }
 0x359   : > { %5962 = vmatpush1.bf16.msra.mxu0 %v8160_v62  ;;  %6003 = vmatpush1.bf16.msra.mxu1 %v8162_v63  ;;  %v1112_v62 = vld [vmem:[%s9328_s27 + $0x6f0] sm:$0xff]  ;;  %v1089_v63 = vld [vmem:[%s9328_s27 + $0x638] sm:$0xff] }
 0x35a   : > { %5963 = vmatprep.subr.bf16.mxu0 %v8209_v1  ;;  %6004 = vmatprep.subr.bf16.mxu1 %v8211_v2  ;;  %v1113_v1 = vld [vmem:[%s9328_s27 + $0x6f8] sm:$0xff]  ;;  %v7780_v2 = vcombine.low %v1040_v52, %v1064_v53  ;;  %v7829_v4 = vcombine.high %v1088_v60, %v1112_v62 }
 0x35b   : > { %v7831_v5 = vcombine.high %v1089_v63, %v1113_v1  ;;  %v7830_v12 = vcombine.low %v1089_v63, %v1113_v1  ;;  %v1472_v1 = vld [vmem:[%s9328_s27 + $0x1230] sm:$0xff] }
 0x35d   : > { %5964 = vmatpush1.bf16.msra.mxu0 %v8208_v7  ;;  %6005 = vmatpush1.bf16.msra.mxu1 %v8210_v9  ;;  %v1160_v7 = vld [vmem:[%s9328_s27 + $0x870] sm:$0xff]  ;;  %v1137_v9 = vld [vmem:[%s9328_s27 + $0x7b8] sm:$0xff] }
 0x35e   : > { %5965 = vmatprep.subr.bf16.mxu0 %v8257_v10  ;;  %6006 = vmatprep.subr.bf16.mxu1 %v8259_v11  ;;  %v1161_v10 = vld [vmem:[%s9328_s27 + $0x878] sm:$0xff]  ;;  %v7828_v11 = vcombine.low %v1088_v60, %v1112_v62  ;;  %v7877_v13 = vcombine.high %v1136_v6, %v1160_v7 }
 0x35f   : > { %v7879_v14 = vcombine.high %v1137_v9, %v1161_v10  ;;  %v7878_v20 = vcombine.low %v1137_v9, %v1161_v10  ;;  %v1520_v10 = vld [vmem:[%s9328_s27 + $0x13b0] sm:$0xff] }
 0x361   : > { %5966 = vmatpush1.bf16.msra.mxu0 %v8256_v16  ;;  %6007 = vmatpush1.bf16.msra.mxu1 %v8258_v17  ;;  %v1208_v16 = vld [vmem:[%s9328_s27 + $0x9f0] sm:$0xff]  ;;  %v1185_v17 = vld [vmem:[%s9328_s27 + $0x938] sm:$0xff] }
 0x362   : > { %5967 = vmatprep.subr.bf16.mxu0 %v8305_v18  ;;  %6008 = vmatprep.subr.bf16.mxu1 %v8307_v19  ;;  %v1209_v18 = vld [vmem:[%s9328_s27 + $0x9f8] sm:$0xff]  ;;  %v7876_v19 = vcombine.low %v1136_v6, %v1160_v7  ;;  %v7925_v21 = vcombine.high %v1184_v15, %v1208_v16 }
 0x363   : > { %v7927_v22 = vcombine.high %v1185_v17, %v1209_v18  ;;  %v7926_v29 = vcombine.low %v1185_v17, %v1209_v18  ;;  %v1568_v18 = vld [vmem:[%s9328_s27 + $0x1530] sm:$0xff] }
 0x365   : > { %5968 = vmatpush1.bf16.msra.mxu0 %v8304_v24  ;;  %6009 = vmatpush1.bf16.msra.mxu1 %v8306_v25  ;;  %v1256_v24 = vld [vmem:[%s9328_s27 + $0xb70] sm:$0xff]  ;;  %v1233_v25 = vld [vmem:[%s9328_s27 + $0xab8] sm:$0xff] }
 0x366   : > { %5969 = vmatprep.subr.bf16.mxu0 %v8353_v27  ;;  %6010 = vmatprep.subr.bf16.mxu1 %v8355_v28  ;;  %v1257_v27 = vld [vmem:[%s9328_s27 + $0xb78] sm:$0xff]  ;;  %v7924_v28 = vcombine.low %v1184_v15, %v1208_v16  ;;  %v7973_v30 = vcombine.high %v1232_v23, %v1256_v24 }
 0x367   : > { %v7975_v31 = vcombine.high %v1233_v25, %v1257_v27  ;;  %v7974_v35 = vcombine.low %v1233_v25, %v1257_v27  ;;  %v1616_v27 = vld [vmem:[%s9328_s27 + $0x16b0] sm:$0xff] }
 0x369   : > { %5970 = vmatpush1.bf16.msra.mxu0 %v8352_v33  ;;  %6011 = vmatpush1.bf16.msra.mxu1 %v8354_v34  ;;  %v1304_v33 = vld [vmem:[%s9328_s27 + $0xcf0] sm:$0xff]  ;;  %v1281_v34 = vld [vmem:[%s9328_s27 + $0xc38] sm:$0xff] }
 0x36a   : > { %6021 = vmatprep.subr.bf16.mxu0 %v7637_v61  ;;  %6062 = vmatprep.subr.bf16.mxu1 %v7639_v0  ;;  %v1305_v61 = vld [vmem:[%s9328_s27 + $0xcf8] sm:$0xff]  ;;  %v7972_v0 = vcombine.low %v1232_v23, %v1256_v24  ;;  %v8021_v36 = vcombine.high %v1280_v32, %v1304_v33 }
 0x36b   : > { %v8023_v37 = vcombine.high %v1281_v34, %v1305_v61  ;;  %v8022_v43 = vcombine.low %v1281_v34, %v1305_v61  ;;  %v898_v61 = vld [vmem:[%s9328_s27 + $0x40] sm:$0xff] }
 0x36c   : > { %5972 = vmatmul.mubr.bf16.vlgmr.msra.gmra.mrb[8].mxu0 %v9426_v26  ;;  %6013 = vmatmul.mubr.bf16.vlgmr.msra.gmra.mrb[8].mxu1 %v9426_v26 }
 0x36d   : > { %6022 = vmatpush1.bf16.msra.mxu0 %v7636_v39  ;;  %6063 = vmatpush1.bf16.msra.mxu1 %v7638_v40  ;;  %v1352_v39 = vld [vmem:[%s9328_s27 + $0xe70] sm:$0xff]  ;;  %v1329_v40 = vld [vmem:[%s9328_s27 + $0xdb8] sm:$0xff] }
 0x36e   : > { %6023 = vmatprep.subr.bf16.mxu0 %v7685_v41  ;;  %6064 = vmatprep.subr.bf16.mxu1 %v7687_v42  ;;  %v1353_v41 = vld [vmem:[%s9328_s27 + $0xe78] sm:$0xff]  ;;  %v8020_v42 = vcombine.low %v1280_v32, %v1304_v33  ;;  %v8069_v44 = vcombine.high %v1328_v38, %v1352_v39 }
 0x36f   : > { %6053 = vmatprep.mubr.bf16.mxu0 %v9382_v8  ;;  %6094 = vmatprep.mubr.bf16.mxu1 %v9382_v8  ;;  %v8071_v45 = vcombine.high %v1329_v40, %v1353_v41  ;;  %v8070_v52 = vcombine.low %v1329_v40, %v1353_v41  ;;  %v946_v41 = vld [vmem:[%s9328_s27 + $0x1c0] sm:$0xff] }
 0x371   : > { %6024 = vmatpush1.bf16.msra.mxu0 %v7684_v47  ;;  %6065 = vmatpush1.bf16.msra.mxu1 %v7686_v48  ;;  %v1400_v47 = vld [vmem:[%s9328_s27 + $0xff0] sm:$0xff]  ;;  %v1377_v48 = vld [vmem:[%s9328_s27 + $0xf38] sm:$0xff] }
 0x372   : > { %6025 = vmatprep.subr.bf16.mxu0 %v7733_v49  ;;  %6066 = vmatprep.subr.bf16.mxu1 %v7735_v50  ;;  %v1401_v49 = vld [vmem:[%s9328_s27 + $0xff8] sm:$0xff]  ;;  %v8068_v50 = vcombine.low %v1328_v38, %v1352_v39  ;;  %v8117_v53 = vcombine.high %v1376_v46, %v1400_v47 }
 0x373   : > { %v8119_v54 = vcombine.high %v1377_v48, %v1401_v49  ;;  %v8118_v60 = vcombine.low %v1377_v48, %v1401_v49  ;;  %v994_v49 = vld [vmem:[%s9328_s27 + $0x340] sm:$0xff] }
 0x375   : > { %6026 = vmatpush1.bf16.msra.mxu0 %v7732_v56  ;;  %6067 = vmatpush1.bf16.msra.mxu1 %v7734_v57  ;;  %v1448_v56 = vld [vmem:[%s9328_s27 + $0x1170] sm:$0xff]  ;;  %v1425_v57 = vld [vmem:[%s9328_s27 + $0x10b8] sm:$0xff] }
 0x376   : > { %6027 = vmatprep.subr.bf16.mxu0 %v7781_v58  ;;  %6068 = vmatprep.subr.bf16.mxu1 %v7783_v59  ;;  %v1449_v58 = vld [vmem:[%s9328_s27 + $0x1178] sm:$0xff]  ;;  %v8116_v59 = vcombine.low %v1376_v46, %v1400_v47  ;;  %v8165_v62 = vcombine.high %v1424_v55, %v1448_v56 }
 0x377   : > { %v8167_v63 = vcombine.high %v1425_v57, %v1449_v58  ;;  %v8166_v6 = vcombine.low %v1425_v57, %v1449_v58  ;;  %v1042_v58 = vld [vmem:[%s9328_s27 + $0x4c0] sm:$0xff] }
 0x379   : > { %6028 = vmatpush1.bf16.msra.mxu0 %v7780_v2  ;;  %6069 = vmatpush1.bf16.msra.mxu1 %v7782_v3  ;;  %v1496_v2 = vld [vmem:[%s9328_s27 + $0x12f0] sm:$0xff]  ;;  %v1473_v3 = vld [vmem:[%s9328_s27 + $0x1238] sm:$0xff] }
 0x37a   : > { %6029 = vmatprep.subr.bf16.mxu0 %v7829_v4  ;;  %6070 = vmatprep.subr.bf16.mxu1 %v7831_v5  ;;  %v1497_v4 = vld [vmem:[%s9328_s27 + $0x12f8] sm:$0xff]  ;;  %v8164_v5 = vcombine.low %v1424_v55, %v1448_v56  ;;  %v8213_v7 = vcombine.high %v1472_v1, %v1496_v2 }
 0x37b   : > { %v8215_v9 = vcombine.high %v1473_v3, %v1497_v4  ;;  %v8214_v15 = vcombine.low %v1473_v3, %v1497_v4  ;;  %v1090_v4 = vld [vmem:[%s9328_s27 + $0x640] sm:$0xff] }
 0x37d   : > { %6030 = vmatpush1.bf16.msra.mxu0 %v7828_v11  ;;  %6071 = vmatpush1.bf16.msra.mxu1 %v7830_v12  ;;  %v1544_v11 = vld [vmem:[%s9328_s27 + $0x1470] sm:$0xff]  ;;  %v1521_v12 = vld [vmem:[%s9328_s27 + $0x13b8] sm:$0xff] }
 0x37e   : > { %6031 = vmatprep.subr.bf16.mxu0 %v7877_v13  ;;  %6072 = vmatprep.subr.bf16.mxu1 %v7879_v14  ;;  %v1545_v13 = vld [vmem:[%s9328_s27 + $0x1478] sm:$0xff]  ;;  %v8212_v14 = vcombine.low %v1472_v1, %v1496_v2  ;;  %v8261_v16 = vcombine.high %v1520_v10, %v1544_v11 }
 0x37f   : > { %v8263_v17 = vcombine.high %v1521_v12, %v1545_v13  ;;  %v8262_v23 = vcombine.low %v1521_v12, %v1545_v13  ;;  %v1138_v13 = vld [vmem:[%s9328_s27 + $0x7c0] sm:$0xff] }
 0x381   : > { %6032 = vmatpush1.bf16.msra.mxu0 %v7876_v19  ;;  %6073 = vmatpush1.bf16.msra.mxu1 %v7878_v20  ;;  %v1592_v19 = vld [vmem:[%s9328_s27 + $0x15f0] sm:$0xff]  ;;  %v1569_v20 = vld [vmem:[%s9328_s27 + $0x1538] sm:$0xff] }
 0x382   : > { %6033 = vmatprep.subr.bf16.mxu0 %v7925_v21  ;;  %6074 = vmatprep.subr.bf16.mxu1 %v7927_v22  ;;  %v1593_v21 = vld [vmem:[%s9328_s27 + $0x15f8] sm:$0xff]  ;;  %v8260_v22 = vcombine.low %v1520_v10, %v1544_v11  ;;  %v8309_v24 = vcombine.high %v1568_v18, %v1592_v19 }
 0x383   : > { %v8311_v25 = vcombine.high %v1569_v20, %v1593_v21  ;;  %v8310_v32 = vcombine.low %v1569_v20, %v1593_v21  ;;  %v9661_v20 = vsub.s32 2, %v9364_v51  ;;  %v9664_v21 = vsub.s32 1, %v9364_v51 }
 0x385   : > { %6034 = vmatpush1.bf16.msra.mxu0 %v7924_v28  ;;  %6075 = vmatpush1.bf16.msra.mxu1 %v7926_v29  ;;  %v1640_v28 = vld [vmem:[%s9328_s27 + $0x1770] sm:$0xff]  ;;  %v1617_v29 = vld [vmem:[%s9328_s27 + $0x16b8] sm:$0xff] }
 0x386   : > { %6035 = vmatprep.subr.bf16.mxu0 %v7973_v30  ;;  %6076 = vmatprep.subr.bf16.mxu1 %v7975_v31  ;;  %v1641_v30 = vld [vmem:[%s9328_s27 + $0x1778] sm:$0xff]  ;;  %v8308_v31 = vcombine.low %v1568_v18, %v1592_v19  ;;  %v8357_v33 = vcombine.high %v1616_v27, %v1640_v28  ;;  %v9658_v19 = vld [vmem:[%s9334_s15] sm:$0xff] }
 0x387   : > { %v8359_v34 = vcombine.high %v1617_v29, %v1641_v30  ;;  %v8358_v38 = vcombine.low %v1617_v29, %v1641_v30  ;;  %v1186_v29 = vld [vmem:[%s9328_s27 + $0x940] sm:$0xff] }
 0x388   : > { %v1210_v30 = vld [vmem:[%s9328_s27 + $0xa00] sm:$0xff] }
 0x389   : > { %6036 = vmatpush1.bf16.msra.mxu0 %v7972_v0  ;;  %6077 = vmatpush1.bf16.msra.mxu1 %v7974_v35  ;;  %v922_v0 = vld [vmem:[%s9328_s27 + $0x100] sm:$0xff]  ;;  %v899_v35 = vld [vmem:[%s9328_s27 + $0x48] sm:$0xff] }
 0x38a   : > { %6037 = vmatprep.subr.bf16.mxu0 %v8021_v36  ;;  %6078 = vmatprep.subr.bf16.mxu1 %v8023_v37  ;;  %v923_v36 = vld [vmem:[%s9328_s27 + $0x108] sm:$0xff]  ;;  %v8356_v37 = vcombine.low %v1616_v27, %v1640_v28  ;;  %v7641_v39 = vcombine.high %v898_v61, %v922_v0 }
 0x38b   : > { %v7643_v40 = vcombine.high %v899_v35, %v923_v36  ;;  %v7642_v46 = vcombine.low %v899_v35, %v923_v36 }
 0x38d   : > { %6038 = vmatpush1.bf16.msra.mxu0 %v8020_v42  ;;  %6079 = vmatpush1.bf16.msra.mxu1 %v8022_v43  ;;  %v970_v42 = vld [vmem:[%s9328_s27 + $0x280] sm:$0xff]  ;;  %v947_v43 = vld [vmem:[%s9328_s27 + $0x1c8] sm:$0xff] }
 0x38e   : > { %6039 = vmatprep.subr.bf16.mxu0 %v8069_v44  ;;  %6080 = vmatprep.subr.bf16.mxu1 %v8071_v45  ;;  %v971_v44 = vld [vmem:[%s9328_s27 + $0x288] sm:$0xff]  ;;  %v7640_v45 = vcombine.low %v898_v61, %v922_v0  ;;  %v7689_v47 = vcombine.high %v946_v41, %v970_v42  ;;  %v1677_v61 = vrot.slane %v9658_v19, %v9664_v21 }
 0x38f   : > { %v7691_v48 = vcombine.high %v947_v43, %v971_v44  ;;  %v7690_v55 = vcombine.low %v947_v43, %v971_v44 }
 0x391   : > { %6040 = vmatpush1.bf16.msra.mxu0 %v8068_v50  ;;  %6081 = vmatpush1.bf16.msra.mxu1 %v8070_v52  ;;  %v1018_v50 = vld [vmem:[%s9328_s27 + $0x400] sm:$0xff]  ;;  %v995_v52 = vld [vmem:[%s9328_s27 + $0x348] sm:$0xff] }
 0x392   : > { %6041 = vmatprep.subr.bf16.mxu0 %v8117_v53  ;;  %6082 = vmatprep.subr.bf16.mxu1 %v8119_v54  ;;  %v1019_v53 = vld [vmem:[%s9328_s27 + $0x408] sm:$0xff]  ;;  %v7688_v54 = vcombine.low %v946_v41, %v970_v42  ;;  %v7737_v56 = vcombine.high %v994_v49, %v1018_v50  ;;  %v1234_v41 = vld [vmem:[%s9328_s27 + $0xac0] sm:$0xff] }
 0x393   : > { %v7739_v57 = vcombine.high %v995_v52, %v1019_v53  ;;  %v7738_v1 = vcombine.low %v995_v52, %v1019_v53  ;;  %v1258_v42 = vld [vmem:[%s9328_s27 + $0xb80] sm:$0xff] }
 0x395   : > { %6042 = vmatpush1.bf16.msra.mxu0 %v8116_v59  ;;  %6083 = vmatpush1.bf16.msra.mxu1 %v8118_v60  ;;  %v1066_v59 = vld [vmem:[%s9328_s27 + $0x580] sm:$0xff]  ;;  %v1043_v60 = vld [vmem:[%s9328_s27 + $0x4c8] sm:$0xff] }
 0x396   : > { %6043 = vmatprep.subr.bf16.mxu0 %v8165_v62  ;;  %6084 = vmatprep.subr.bf16.mxu1 %v8167_v63  ;;  %v1067_v62 = vld [vmem:[%s9328_s27 + $0x588] sm:$0xff]  ;;  %v7736_v63 = vcombine.low %v994_v49, %v1018_v50  ;;  %v7785_v2 = vcombine.high %v1042_v58, %v1066_v59 }
 0x397   : > { %v7787_v3 = vcombine.high %v1043_v60, %v1067_v62  ;;  %v7786_v10 = vcombine.low %v1043_v60, %v1067_v62 }
 0x399   : > { %6044 = vmatpush1.bf16.msra.mxu0 %v8164_v5  ;;  %6085 = vmatpush1.bf16.msra.mxu1 %v8166_v6  ;;  %v1114_v5 = vld [vmem:[%s9328_s27 + $0x700] sm:$0xff]  ;;  %v1091_v6 = vld [vmem:[%s9328_s27 + $0x648] sm:$0xff] }
 0x39a   : > { %6045 = vmatprep.subr.bf16.mxu0 %v8213_v7  ;;  %6086 = vmatprep.subr.bf16.mxu1 %v8215_v9  ;;  %v1115_v7 = vld [vmem:[%s9328_s27 + $0x708] sm:$0xff]  ;;  %v7784_v9 = vcombine.low %v1042_v58, %v1066_v59  ;;  %v7833_v11 = vcombine.high %v1090_v4, %v1114_v5  ;;  %v7832_v18 = vcombine.low %v1090_v4, %v1114_v5 }
 0x39b   : > { %v7835_v12 = vcombine.high %v1091_v6, %v1115_v7  ;;  %v7977_v59 = vcombine.high %v1234_v41, %v1258_v42  ;;  %v1283_v4 = vld [vmem:[%s9328_s27 + $0xc48] sm:$0xff] }
 0x39c   : > { %v1307_v5 = vld [vmem:[%s9328_s27 + $0xd08] sm:$0xff] }
 0x39d   : > { %6046 = vmatpush1.bf16.msra.mxu0 %v8212_v14  ;;  %6087 = vmatpush1.bf16.msra.mxu1 %v8214_v15  ;;  %v1162_v14 = vld [vmem:[%s9328_s27 + $0x880] sm:$0xff]  ;;  %v9653_v15 = vsub.s32 0, %v9364_v51 }
 0x39e   : > { %6047 = vmatprep.subr.bf16.mxu0 %v8261_v16  ;;  %6088 = vmatprep.subr.bf16.mxu1 %v8263_v17  ;;  %v1139_v16 = vld [vmem:[%s9328_s27 + $0x7c8] sm:$0xff]  ;;  %v7881_v27 = vcombine.high %v1138_v13, %v1162_v14  ;;  %v7880_v35 = vcombine.low %v1138_v13, %v1162_v14  ;;  %v1330_v13 = vld [vmem:[%s9328_s27 + $0xdc0] sm:$0xff] }
 0x39f   : > { %v1163_v17 = vld [vmem:[%s9328_s27 + $0x888] sm:$0xff]  ;;  %v1354_v14 = vld [vmem:[%s9328_s27 + $0xe80] sm:$0xff] }
 0x3a0   : > { %v7883_v28 = vcombine.high %v1139_v16, %v1163_v17 }
 0x3a1   : > { %6048 = vmatpush1.bf16.msra.mxu0 %v8260_v22  ;;  %6089 = vmatpush1.bf16.msra.mxu1 %v8262_v23  ;;  %v9029_v22 = vmov 1983009808  }
 0x3a2   : > { %6049 = vmatprep.subr.bf16.mxu0 %v8309_v24  ;;  %6090 = vmatprep.subr.bf16.mxu1 %v8311_v25  ;;  %v6810_v23 = vunpack.c.l.s4 %v9029_v22  ;;  %v7834_v24 = vcombine.low %v1091_v6, %v1115_v7  ;;  %v9667_v25 = vsub.s32 3, %v9364_v51  ;;  %v7976_v7 = vcombine.low %v1234_v41, %v1258_v42  ;;  %v1474_v42 = vld [vmem:[%s9328_s27 + $0x1240] sm:$0xff] }
 0x3a4   : > { %v6811_v0 = vunpack.c.0.s8 %v6810_v23  ;;  %v1685_v36 = vrot.slane %v9658_v19, %v9667_v25  ;;  %v8026_v23 = vcombine.low %v1283_v4, %v1307_v5 }
 0x3a5   : > { %6050 = vmatpush1.bf16.msra.mxu0 %v8308_v31  ;;  %6091 = vmatpush1.bf16.msra.mxu1 %v8310_v32  ;;  %v1673_v31 = vrot.slane %v9658_v19, %v9653_v15  ;;  %v1187_v32 = vld [vmem:[%s9328_s27 + $0x948] sm:$0xff] }
 0x3a6   : > { %6051 = vmatprep.subr.bf16.mxu0 %v8357_v33  ;;  %6092 = vmatprep.subr.bf16.mxu1 %v8359_v34  ;;  %v1211_v33 = vld [vmem:[%s9328_s27 + $0xa08] sm:$0xff]  ;;  %v1681_v34 = vrot.slane %v9658_v19, %v9661_v20  ;;  %v9692_v50 = vsub.s32 %v6811_v0, %v9364_v51  ;;  %v1426_v0 = vld [vmem:[%s9328_s27 + $0x10c0] sm:$0xff] }
 0x3a7   : > { %v7930_v58 = vcombine.low %v1187_v32, %v1211_v33 }
 0x3a9   : > { %6052 = vmatpush1.bf16.msra.mxu0 %v8356_v37  ;;  %6093 = vmatpush1.bf16.msra.mxu1 %v8358_v38  ;;  %v7882_v37 = vcombine.low %v1139_v16, %v1163_v17  ;;  %v7929_v38 = vcombine.high %v1186_v29, %v1210_v30  ;;  %v1331_v17 = vld [vmem:[%s9328_s27 + $0xdc8] sm:$0xff] }
 0x3aa   : > { %6103 = vmatprep.subr.bf16.mxu0 %v7641_v39  ;;  %6144 = vmatprep.subr.bf16.mxu1 %v7643_v40  ;;  %v7931_v40 = vcombine.high %v1187_v32, %v1211_v33  ;;  %v8072_v32 = vcombine.low %v1330_v13, %v1354_v14 }
 0x3ac   : > { %6054 = vmatmul.mubr.bf16.vlgmr.msra.gmra.mrb[12].mxu0 %v9426_v26  ;;  %6095 = vmatmul.mubr.bf16.vlgmr.msra.gmra.mrb[12].mxu1 %v9426_v26 }
 0x3ad   : > { %6104 = vmatpush1.bf16.msra.mxu0 %v7640_v45  ;;  %6145 = vmatpush1.bf16.msra.mxu1 %v7642_v46  ;;  %v1235_v46 = vld [vmem:[%s9328_s27 + $0xac8] sm:$0xff] }
 0x3ae   : > { %6105 = vmatprep.subr.bf16.mxu0 %v7689_v47  ;;  %6146 = vmatprep.subr.bf16.mxu1 %v7691_v48  ;;  %v1259_v47 = vld [vmem:[%s9328_s27 + $0xb88] sm:$0xff] }
 0x3af   : > { %6135 = vmatprep.mubr.bf16.mxu0 %v9382_v8  ;;  %6176 = vmatprep.mubr.bf16.mxu1 %v9382_v8 }
 0x3b1   : > { %6106 = vmatpush1.bf16.msra.mxu0 %v7688_v54  ;;  %6147 = vmatpush1.bf16.msra.mxu1 %v7690_v55  ;;  %v7928_v54 = vcombine.low %v1186_v29, %v1210_v30  ;;  %v1402_v29 = vld [vmem:[%s9328_s27 + $0x1000] sm:$0xff]  ;;  %v1379_v30 = vld [vmem:[%s9328_s27 + $0xf48] sm:$0xff] }
 0x3b2   : > { %6107 = vmatprep.subr.bf16.mxu0 %v7737_v56  ;;  %6148 = vmatprep.subr.bf16.mxu1 %v7739_v57 }
 0x3b5   : > { %6108 = vmatpush1.bf16.msra.mxu0 %v7736_v63  ;;  %6149 = vmatpush1.bf16.msra.mxu1 %v7738_v1  ;;  %v7979_v63 = vcombine.high %v1235_v46, %v1259_v47  ;;  %v1282_v1 = vld [vmem:[%s9328_s27 + $0xc40] sm:$0xff] }
 0x3b6   : > { %6109 = vmatprep.subr.bf16.mxu0 %v7785_v2  ;;  %6150 = vmatprep.subr.bf16.mxu1 %v7787_v3  ;;  %v1306_v2 = vld [vmem:[%s9328_s27 + $0xd00] sm:$0xff] }
 0x3b7   : > { %v8024_v22 = vcombine.low %v1282_v1, %v1306_v2 }
 0x3b9   : > { %6110 = vmatpush1.bf16.msra.mxu0 %v7784_v9  ;;  %6151 = vmatpush1.bf16.msra.mxu1 %v7786_v10  ;;  %v7978_v10 = vcombine.low %v1235_v46, %v1259_v47  ;;  %v1499_v46 = vld [vmem:[%s9328_s27 + $0x1308] sm:$0xff] }
 0x3ba   : > { %6111 = vmatprep.subr.bf16.mxu0 %v7833_v11  ;;  %6152 = vmatprep.subr.bf16.mxu1 %v7835_v12  ;;  %v8025_v11 = vcombine.high %v1282_v1, %v1306_v2  ;;  %v8027_v12 = vcombine.high %v1283_v4, %v1307_v5  ;;  %v1570_v2 = vld [vmem:[%s9328_s27 + $0x1540] sm:$0xff]  ;;  %v1571_v4 = vld [vmem:[%s9328_s27 + $0x1548] sm:$0xff] }
 0x3bb   : > { %v1595_v5 = vld [vmem:[%s9328_s27 + $0x1608] sm:$0xff] }
 0x3bd   : > { %6112 = vmatpush1.bf16.msra.mxu0 %v7832_v18  ;;  %6153 = vmatpush1.bf16.msra.mxu1 %v7834_v24  ;;  %v1355_v18 = vld [vmem:[%s9328_s27 + $0xe88] sm:$0xff]  ;;  %v8073_v24 = vcombine.high %v1330_v13, %v1354_v14 }
 0x3be   : > { %6113 = vmatprep.subr.bf16.mxu0 %v7881_v27  ;;  %6154 = vmatprep.subr.bf16.mxu1 %v7883_v28  ;;  %v8075_v27 = vcombine.high %v1331_v17, %v1355_v18  ;;  %v1378_v28 = vld [vmem:[%s9328_s27 + $0xf40] sm:$0xff]  ;;  %v8074_v33 = vcombine.low %v1331_v17, %v1355_v18  ;;  %v1619_v13 = vld [vmem:[%s9328_s27 + $0x16c8] sm:$0xff]  ;;  %v8314_v17 = vcombine.low %v1571_v4, %v1595_v5 }
 0x3bf   : > { %v5809_v39 = vpop.f32.mrb[0].mxu0  ;;  %v5850_v44 = vpop.f32.mrb[0].mxu1  ;;  %v1643_v14 = vld [vmem:[%s9328_s27 + $0x1788] sm:$0xff] }
 0x3c0   : > { %v9683_v43 = vadd.f32 %v5809_v39, %v1673_v31  ;;  %v5811_v45 = vpop.f32.mrb[1].mxu0  ;;  %v9687_v48 = vadd.f32 %v5850_v44, %v1681_v34  ;;  %v5852_v52 = vpop.f32.mrb[1].mxu1  ;;  %v1403_v31 = vld [vmem:[%s9328_s27 + $0x1008] sm:$0xff]  ;;  %v8121_v34 = vcombine.high %v1378_v28, %v1402_v29  ;;  %v1498_v44 = vld [vmem:[%s9328_s27 + $0x1300] sm:$0xff] }
 0x3c1   : > { %v9689_v49 = vadd.f32 %v5811_v45, %v1677_v61  ;;  %v5813_v53 = vpop.f32.mrb[2].mxu0  ;;  %6114 = vmatpush1.bf16.msra.mxu0 %v7880_v35  ;;  %v9694_v55 = vadd.f32 %v5852_v52, %v1685_v36  ;;  %v5854_v56 = vpop.f32.mrb[2].mxu1  ;;  %6155 = vmatpush1.bf16.msra.mxu1 %v7882_v37  ;;  %v8123_v61 = vcombine.high %v1379_v30, %v1403_v31  ;;  %v1450_v35 = vld [vmem:[%s9328_s27 + $0x1180] sm:$0xff]  ;;  %v1427_v36 = vld [vmem:[%s9328_s27 + $0x10c8] sm:$0xff] }
 0x3c2   : > { %v5814_v57 = vpop.f32.mrb[3].mxu0  ;;  %6115 = vmatprep.subr.bf16.mxu0 %v7929_v38  ;;  %v5855_v62 = vpop.f32.mrb[3].mxu1  ;;  %6156 = vmatprep.subr.bf16.mxu1 %v7931_v40  ;;  %v1451_v37 = vld [vmem:[%s9328_s27 + $0x1188] sm:$0xff]  ;;  %v8120_v38 = vcombine.low %v1378_v28, %v1402_v29  ;;  %v8122_v39 = vcombine.low %v1379_v30, %v1403_v31  ;;  %v8169_v40 = vcombine.high %v1426_v0, %v1450_v35  ;;  %v1522_v56 = vld [vmem:[%s9328_s27 + $0x13c0] sm:$0xff]  ;;  %v925_v28 = vld [vmem:[%s9328_s27 + $0x118] sm:$0xff] }
 0x3c3   : > { %v6807_v60 = vcombine.low %v9683_v43, %v9689_v49  ;;  %v6808_v3 = vcombine.low %v9687_v48, %v9694_v55  ;;  %v8171_v41 = vcombine.high %v1427_v36, %v1451_v37  ;;  %v1475_v45 = vld [vmem:[%s9328_s27 + $0x1248] sm:$0xff]  ;;  %v8168_v47 = vcombine.low %v1426_v0, %v1450_v35  ;;  %v1546_v57 = vld [vmem:[%s9328_s27 + $0x1480] sm:$0xff]  ;;  %v973_v0 = vld [vmem:[%s9328_s27 + $0x298] sm:$0xff] }
 0x3c4   : > { %v8170_v52 = vcombine.low %v1427_v36, %v1451_v37  ;;  %v8217_v53 = vcombine.high %v1474_v42, %v1498_v44  ;;  %v8218_v62 = vcombine.low %v1475_v45, %v1499_v46  ;;  %v8362_v30 = vcombine.low %v1619_v13, %v1643_v14 }
 0x3c5   : > { %v6815_v6 = vrot.slane %v6807_v60, %v9692_v50  ;;  %6116 = vmatpush1.bf16.msra.mxu0 %v7928_v54  ;;  %v6822_v9 = vrot.slane %v6808_v3, %v9692_v50  ;;  %6157 = vmatpush1.bf16.msra.mxu1 %v7930_v58  ;;  %v8219_v54 = vcombine.high %v1475_v45, %v1499_v46  ;;  %v1523_v58 = vld [vmem:[%s9328_s27 + $0x13c8] sm:$0xff]  ;;  %v1594_v3 = vld [vmem:[%s9328_s27 + $0x1600] sm:$0xff] }
 0x3c6   : > { %6117 = vmatprep.subr.bf16.mxu0 %v7977_v59  ;;  %6158 = vmatprep.subr.bf16.mxu1 %v7979_v63  ;;  %v1547_v59 = vld [vmem:[%s9328_s27 + $0x1488] sm:$0xff]  ;;  %v8216_v60 = vcombine.low %v1474_v42, %v1498_v44  ;;  %v8265_v63 = vcombine.high %v1522_v56, %v1546_v57  ;;  %v1021_v42 = vld [vmem:[%s9328_s27 + $0x418] sm:$0xff] }
 0x3c7   : > { %v6823_v16 = vcombine.low %v6815_v6, %v6822_v9  ;;  %v8267_v1 = vcombine.high %v1523_v58, %v1547_v59  ;;  %v8264_v6 = vcombine.low %v1522_v56, %v1546_v57  ;;  %v8313_v9 = vcombine.high %v1570_v2, %v1594_v3  ;;  %v1069_v56 = vld [vmem:[%s9328_s27 + $0x598] sm:$0xff] }
 0x3c9   : > { %6118 = vmatpush1.bf16.msra.mxu0 %v7976_v7  ;;  %7026 = vst [vmem:[%s9711_s20] sm:$0xff] %v6823_v16  ;;  %6159 = vmatpush1.bf16.msra.mxu1 %v7978_v10  ;;  %v8266_v7 = vcombine.low %v1523_v58, %v1547_v59  ;;  %v8315_v10 = vcombine.high %v1571_v4, %v1595_v5 }
 0x3ca   : > { %6119 = vmatprep.subr.bf16.mxu0 %v8025_v11  ;;  %6160 = vmatprep.subr.bf16.mxu1 %v8027_v12  ;;  %v1618_v11 = vld [vmem:[%s9328_s27 + $0x16c0] sm:$0xff]  ;;  %v8312_v16 = vcombine.low %v1570_v2, %v1594_v3  ;;  %v1117_v2 = vld [vmem:[%s9328_s27 + $0x718] sm:$0xff] }
 0x3cb   : > { %v1642_v12 = vld [vmem:[%s9328_s27 + $0x1780] sm:$0xff] }
 0x3cc   : > { %v8361_v18 = vcombine.high %v1618_v11, %v1642_v12  ;;  %v8360_v29 = vcombine.low %v1618_v11, %v1642_v12  ;;  %v1141_v11 = vld [vmem:[%s9328_s27 + $0x7d8] sm:$0xff] }
 0x3cd   : > { %6120 = vmatpush1.bf16.msra.mxu0 %v8024_v22  ;;  %6161 = vmatpush1.bf16.msra.mxu1 %v8026_v23  ;;  %v8363_v22 = vcombine.high %v1619_v13, %v1643_v14  ;;  %v900_v23 = vld [vmem:[%s9328_s27 + $0x50] sm:$0xff]  ;;  %v1165_v12 = vld [vmem:[%s9328_s27 + $0x898] sm:$0xff]  ;;  %v9770_v14 = vsub.s32 6, %v9364_v51 }
 0x3ce   : > { %6121 = vmatprep.subr.bf16.mxu0 %v8073_v24  ;;  %6162 = vmatprep.subr.bf16.mxu1 %v8075_v27  ;;  %v924_v24 = vld [vmem:[%s9328_s27 + $0x110] sm:$0xff]  ;;  %v901_v27 = vld [vmem:[%s9328_s27 + $0x58] sm:$0xff] }
 0x3cf   : > { %v7645_v31 = vcombine.high %v900_v23, %v924_v24  ;;  %v7644_v35 = vcombine.low %v900_v23, %v924_v24  ;;  %v7646_v36 = vcombine.low %v901_v27, %v925_v28  ;;  %v7887_v23 = vcombine.high %v1141_v11, %v1165_v12  ;;  %v1188_v24 = vld [vmem:[%s9328_s27 + $0x950] sm:$0xff] }
 0x3d1   : > { %6122 = vmatpush1.bf16.msra.mxu0 %v8072_v32  ;;  %6163 = vmatpush1.bf16.msra.mxu1 %v8074_v33  ;;  %v7647_v32 = vcombine.high %v901_v27, %v925_v28  ;;  %v948_v33 = vld [vmem:[%s9328_s27 + $0x1d0] sm:$0xff] }
 0x3d2   : > { %6123 = vmatprep.subr.bf16.mxu0 %v8121_v34  ;;  %6164 = vmatprep.subr.bf16.mxu1 %v8123_v61  ;;  %v972_v34 = vld [vmem:[%s9328_s27 + $0x290] sm:$0xff]  ;;  %v949_v61 = vld [vmem:[%s9328_s27 + $0x1d8] sm:$0xff] }
 0x3d3   : > { %v7693_v37 = vcombine.high %v948_v33, %v972_v34  ;;  %v7692_v44 = vcombine.low %v948_v33, %v972_v34  ;;  %v7694_v45 = vcombine.low %v949_v61, %v973_v0  ;;  %v1212_v27 = vld [vmem:[%s9328_s27 + $0xa10] sm:$0xff] }
 0x3d5   : > { %6124 = vmatpush1.bf16.msra.mxu0 %v8120_v38  ;;  %6165 = vmatpush1.bf16.msra.mxu1 %v8122_v39  ;;  %v7695_v38 = vcombine.high %v949_v61, %v973_v0  ;;  %v996_v39 = vld [vmem:[%s9328_s27 + $0x350] sm:$0xff]  ;;  %v7886_v61 = vcombine.low %v1141_v11, %v1165_v12  ;;  %v7933_v0 = vcombine.high %v1188_v24, %v1212_v27 }
 0x3d6   : > { %6125 = vmatprep.subr.bf16.mxu0 %v8169_v40  ;;  %6166 = vmatprep.subr.bf16.mxu1 %v8171_v41  ;;  %v1020_v40 = vld [vmem:[%s9328_s27 + $0x410] sm:$0xff]  ;;  %v997_v41 = vld [vmem:[%s9328_s27 + $0x358] sm:$0xff] }
 0x3d7   : > { %v7741_v46 = vcombine.high %v996_v39, %v1020_v40  ;;  %v7740_v57 = vcombine.low %v996_v39, %v1020_v40  ;;  %v7742_v58 = vcombine.low %v997_v41, %v1021_v42 }
 0x3d9   : > { %6126 = vmatpush1.bf16.msra.mxu0 %v8168_v47  ;;  %6167 = vmatpush1.bf16.msra.mxu1 %v8170_v52  ;;  %v7743_v47 = vcombine.high %v997_v41, %v1021_v42  ;;  %v1044_v52 = vld [vmem:[%s9328_s27 + $0x4d0] sm:$0xff]  ;;  %v1237_v42 = vld [vmem:[%s9328_s27 + $0xad8] sm:$0xff] }
 0x3da   : > { %6127 = vmatprep.subr.bf16.mxu0 %v8217_v53  ;;  %6168 = vmatprep.subr.bf16.mxu1 %v8219_v54  ;;  %v1068_v53 = vld [vmem:[%s9328_s27 + $0x590] sm:$0xff]  ;;  %v1045_v54 = vld [vmem:[%s9328_s27 + $0x4d8] sm:$0xff] }
 0x3db   : > { %v7789_v59 = vcombine.high %v1044_v52, %v1068_v53  ;;  %v7788_v3 = vcombine.low %v1044_v52, %v1068_v53  ;;  %v7790_v4 = vcombine.low %v1045_v54, %v1069_v56  ;;  %v7932_v52 = vcombine.low %v1188_v24, %v1212_v27  ;;  %v1357_v24 = vld [vmem:[%s9328_s27 + $0xe98] sm:$0xff] }
 0x3dd   : > { %6128 = vmatpush1.bf16.msra.mxu0 %v8216_v60  ;;  %6169 = vmatpush1.bf16.msra.mxu1 %v8218_v62  ;;  %v7791_v60 = vcombine.high %v1045_v54, %v1069_v56  ;;  %v1092_v62 = vld [vmem:[%s9328_s27 + $0x650] sm:$0xff] }
 0x3de   : > { %6129 = vmatprep.subr.bf16.mxu0 %v8265_v63  ;;  %6170 = vmatprep.subr.bf16.mxu1 %v8267_v1  ;;  %v1116_v63 = vld [vmem:[%s9328_s27 + $0x710] sm:$0xff]  ;;  %v1093_v1 = vld [vmem:[%s9328_s27 + $0x658] sm:$0xff] }
 0x3df   : > { %v7837_v5 = vcombine.high %v1092_v62, %v1116_v63  ;;  %v7836_v13 = vcombine.low %v1092_v62, %v1116_v63  ;;  %v1284_v63 = vld [vmem:[%s9328_s27 + $0xc50] sm:$0xff] }
 0x3e1   : > { %6130 = vmatpush1.bf16.msra.mxu0 %v8264_v6  ;;  %6171 = vmatpush1.bf16.msra.mxu1 %v8266_v7  ;;  %v7839_v6 = vcombine.high %v1093_v1, %v1117_v2  ;;  %v1140_v7 = vld [vmem:[%s9328_s27 + $0x7d0] sm:$0xff] }
 0x3e2   : > { %6131 = vmatprep.subr.bf16.mxu0 %v8313_v9  ;;  %6172 = vmatprep.subr.bf16.mxu1 %v8315_v10  ;;  %v1164_v9 = vld [vmem:[%s9328_s27 + $0x890] sm:$0xff]  ;;  %v9765_v10 = vsub.s32 4, %v9364_v51 }
 0x3e3   : > { %v7884_v33 = vcombine.low %v1140_v7, %v1164_v9 }
 0x3e4   : > { %v1689_v28 = vrot.slane %v9658_v19, %v9765_v10 }
 0x3e5   : > { %6132 = vmatpush1.bf16.msra.mxu0 %v8312_v16  ;;  %6173 = vmatpush1.bf16.msra.mxu1 %v8314_v17  ;;  %v9773_v16 = vsub.s32 5, %v9364_v51  ;;  %v7838_v17 = vcombine.low %v1093_v1, %v1117_v2  ;;  %v1308_v1 = vld [vmem:[%s9328_s27 + $0xd10] sm:$0xff] }
 0x3e6   : > { %6133 = vmatprep.subr.bf16.mxu0 %v8361_v18  ;;  %6174 = vmatprep.subr.bf16.mxu1 %v8363_v22  ;;  %v9776_v18 = vsub.s32 7, %v9364_v51  ;;  %v7885_v22 = vcombine.high %v1140_v7, %v1164_v9  ;;  %v8029_v11 = vcombine.high %v1284_v63, %v1308_v1  ;;  %v8028_v27 = vcombine.low %v1284_v63, %v1308_v1  ;;  %v1524_v63 = vld [vmem:[%s9328_s27 + $0x13d0] sm:$0xff] }
 0x3e7   : > { %v1548_v1 = vld [vmem:[%s9328_s27 + $0x1490] sm:$0xff] }
 0x3e8   : > { %v1701_v34 = vrot.slane %v9658_v19, %v9776_v18 }
 0x3e9   : > { %6134 = vmatpush1.bf16.msra.mxu0 %v8360_v29  ;;  %6175 = vmatpush1.bf16.msra.mxu1 %v8362_v30  ;;  %v1189_v29 = vld [vmem:[%s9328_s27 + $0x958] sm:$0xff] }
 0x3ea   : > { %6185 = vmatprep.subr.bf16.mxu0 %v7645_v31  ;;  %6226 = vmatprep.subr.bf16.mxu1 %v7647_v32  ;;  %v1213_v30 = vld [vmem:[%s9328_s27 + $0xa18] sm:$0xff]  ;;  %v1697_v31 = vrot.slane %v9658_v19, %v9770_v14  ;;  %v1693_v32 = vrot.slane %v9658_v19, %v9773_v16 }
 0x3ec   : > { %6136 = vmatmul.mubr.bf16.vlgmr.msra.gmra.mrb[16].mxu0 %v9426_v26  ;;  %6177 = vmatmul.mubr.bf16.vlgmr.msra.gmra.mrb[16].mxu1 %v9426_v26 }
 0x3ed   : > { %6186 = vmatpush1.bf16.msra.mxu0 %v7644_v35  ;;  %6227 = vmatpush1.bf16.msra.mxu1 %v7646_v36  ;;  %v7935_v36 = vcombine.high %v1189_v29, %v1213_v30 }
 0x3ee   : > { %6187 = vmatprep.subr.bf16.mxu0 %v7693_v37  ;;  %6228 = vmatprep.subr.bf16.mxu1 %v7695_v38  ;;  %v1236_v37 = vld [vmem:[%s9328_s27 + $0xad0] sm:$0xff] }
 0x3ef   : > { %6217 = vmatprep.mubr.bf16.mxu0 %v9382_v8  ;;  %6258 = vmatprep.mubr.bf16.mxu1 %v9382_v8  ;;  %v1260_v38 = vld [vmem:[%s9328_s27 + $0xb90] sm:$0xff] }
 0x3f1   : > { %6188 = vmatpush1.bf16.msra.mxu0 %v7692_v44  ;;  %6229 = vmatpush1.bf16.msra.mxu1 %v7694_v45  ;;  %v1261_v44 = vld [vmem:[%s9328_s27 + $0xb98] sm:$0xff] }
 0x3f2   : > { %6189 = vmatprep.subr.bf16.mxu0 %v7741_v46  ;;  %6230 = vmatprep.subr.bf16.mxu1 %v7743_v47  ;;  %v7983_v62 = vcombine.high %v1237_v42, %v1261_v44  ;;  %v7982_v9 = vcombine.low %v1237_v42, %v1261_v44 }
 0x3f5   : > { %6190 = vmatpush1.bf16.msra.mxu0 %v7740_v57  ;;  %6231 = vmatpush1.bf16.msra.mxu1 %v7742_v58  ;;  %v7934_v57 = vcombine.low %v1189_v29, %v1213_v30  ;;  %v7981_v58 = vcombine.high %v1236_v37, %v1260_v38 }
 0x3f6   : > { %6191 = vmatprep.subr.bf16.mxu0 %v7789_v59  ;;  %6232 = vmatprep.subr.bf16.mxu1 %v7791_v60 }
 0x3f9   : > { %6192 = vmatpush1.bf16.msra.mxu0 %v7788_v3  ;;  %6233 = vmatpush1.bf16.msra.mxu1 %v7790_v4  ;;  %v1285_v3 = vld [vmem:[%s9328_s27 + $0xc58] sm:$0xff] }
 0x3fa   : > { %6193 = vmatprep.subr.bf16.mxu0 %v7837_v5  ;;  %6234 = vmatprep.subr.bf16.mxu1 %v7839_v6  ;;  %v1309_v4 = vld [vmem:[%s9328_s27 + $0xd18] sm:$0xff]  ;;  %v7980_v6 = vcombine.low %v1236_v37, %v1260_v38  ;;  %v1428_v37 = vld [vmem:[%s9328_s27 + $0x10d0] sm:$0xff] }
 0x3fb   : > { %v8031_v12 = vcombine.high %v1285_v3, %v1309_v4  ;;  %v1452_v38 = vld [vmem:[%s9328_s27 + $0x1190] sm:$0xff] }
 0x3fd   : > { %6194 = vmatpush1.bf16.msra.mxu0 %v7836_v13  ;;  %6235 = vmatpush1.bf16.msra.mxu1 %v7838_v17  ;;  %v1332_v13 = vld [vmem:[%s9328_s27 + $0xdd0] sm:$0xff] }
 0x3fe   : > { %6195 = vmatprep.subr.bf16.mxu0 %v7885_v22  ;;  %6236 = vmatprep.subr.bf16.mxu1 %v7887_v23  ;;  %v1356_v17 = vld [vmem:[%s9328_s27 + $0xe90] sm:$0xff]  ;;  %v1333_v23 = vld [vmem:[%s9328_s27 + $0xdd8] sm:$0xff] }
 0x3ff   : > { %v5891_v35 = vpop.f32.mrb[4].mxu0  ;;  %v5932_v40 = vpop.f32.mrb[4].mxu1  ;;  %v8077_v29 = vcombine.high %v1332_v13, %v1356_v17  ;;  %v8079_v30 = vcombine.high %v1333_v23, %v1357_v24 }
 0x400   : > { %v9792_v39 = vadd.f32 %v5891_v35, %v1689_v28  ;;  %v5893_v41 = vpop.f32.mrb[5].mxu0  ;;  %v9796_v45 = vadd.f32 %v5932_v40, %v1697_v31  ;;  %v5934_v19 = vpop.f32.mrb[5].mxu1  ;;  %v8030_v28 = vcombine.low %v1285_v3, %v1309_v4  ;;  %v1380_v31 = vld [vmem:[%s9328_s27 + $0xf50] sm:$0xff]  ;;  %v1429_v40 = vld [vmem:[%s9328_s27 + $0x10d8] sm:$0xff] }
 0x401   : > { %v9798_v46 = vadd.f32 %v5893_v41, %v1693_v32  ;;  %v5895_v47 = vpop.f32.mrb[6].mxu0  ;;  %6196 = vmatpush1.bf16.msra.mxu0 %v7884_v33  ;;  %v9800_v53 = vadd.f32 %v5934_v19, %v1701_v34  ;;  %v5936_v54 = vpop.f32.mrb[6].mxu1  ;;  %6237 = vmatpush1.bf16.msra.mxu1 %v7886_v61  ;;  %v1404_v32 = vld [vmem:[%s9328_s27 + $0x1010] sm:$0xff]  ;;  %v1381_v33 = vld [vmem:[%s9328_s27 + $0xf58] sm:$0xff]  ;;  %v8076_v61 = vcombine.low %v1332_v13, %v1356_v17 }
 0x402   : > { %v5896_v56 = vpop.f32.mrb[7].mxu0  ;;  %6197 = vmatprep.subr.bf16.mxu0 %v7933_v0  ;;  %v5937_v60 = vpop.f32.mrb[7].mxu1  ;;  %6238 = vmatprep.subr.bf16.mxu1 %v7935_v36  ;;  %v1405_v34 = vld [vmem:[%s9328_s27 + $0x1018] sm:$0xff]  ;;  %v8078_v0 = vcombine.low %v1333_v23, %v1357_v24  ;;  %v8125_v35 = vcombine.high %v1380_v31, %v1404_v32  ;;  %v8124_v42 = vcombine.low %v1380_v31, %v1404_v32  ;;  %v1500_v54 = vld [vmem:[%s9328_s27 + $0x1310] sm:$0xff] }
 0x403   : > { %v6824_v59 = vcombine.low %v9792_v39, %v9798_v46  ;;  %v6825_v2 = vcombine.low %v9796_v45, %v9800_v53  ;;  %v8127_v36 = vcombine.high %v1381_v33, %v1405_v34  ;;  %v1453_v41 = vld [vmem:[%s9328_s27 + $0x1198] sm:$0xff]  ;;  %v8126_v44 = vcombine.low %v1381_v33, %v1405_v34 }
 0x404   : > { %v8173_v19 = vcombine.high %v1428_v37, %v1452_v38  ;;  %v8175_v47 = vcombine.high %v1429_v40, %v1453_v41  ;;  %v1477_v56 = vld [vmem:[%s9328_s27 + $0x1258] sm:$0xff]  ;;  %v8268_v17 = vcombine.low %v1524_v63, %v1548_v1 }
 0x405   : > { %v6832_v5 = vrot.slane %v6824_v59, %v9692_v50  ;;  %6198 = vmatpush1.bf16.msra.mxu0 %v7932_v52  ;;  %v6839_v7 = vrot.slane %v6825_v2, %v9692_v50  ;;  %6239 = vmatpush1.bf16.msra.mxu1 %v7934_v57  ;;  %v1476_v52 = vld [vmem:[%s9328_s27 + $0x1250] sm:$0xff]  ;;  %v1501_v57 = vld [vmem:[%s9328_s27 + $0x1318] sm:$0xff]  ;;  %v8174_v59 = vcombine.low %v1429_v40, %v1453_v41 }
 0x406   : > { %6199 = vmatprep.subr.bf16.mxu0 %v7981_v58  ;;  %6240 = vmatprep.subr.bf16.mxu1 %v7983_v62  ;;  %v8172_v58 = vcombine.low %v1428_v37, %v1452_v38  ;;  %v8221_v60 = vcombine.high %v1476_v52, %v1500_v54  ;;  %v8223_v62 = vcombine.high %v1477_v56, %v1501_v57  ;;  %v1525_v2 = vld [vmem:[%s9328_s27 + $0x13d8] sm:$0xff] }
 0x407   : > { %v6840_v22 = vcombine.low %v6832_v5, %v6839_v7  ;;  %v1549_v3 = vld [vmem:[%s9328_s27 + $0x1498] sm:$0xff]  ;;  %v8220_v4 = vcombine.low %v1476_v52, %v1500_v54  ;;  %v8222_v5 = vcombine.low %v1477_v56, %v1501_v57 }
 0x408   : > { %v8271_v7 = vcombine.high %v1525_v2, %v1549_v3  ;;  %v1597_v13 = vld [vmem:[%s9328_s27 + $0x1618] sm:$0xff] }
 0x409   : > { %6200 = vmatpush1.bf16.msra.mxu0 %v7980_v6  ;;  %7027 = vst [vmem:[%s9711_s20 + $0x8] sm:$0xff] %v6840_v22  ;;  %6241 = vmatpush1.bf16.msra.mxu1 %v7982_v9  ;;  %v8269_v6 = vcombine.high %v1524_v63, %v1548_v1  ;;  %v1572_v9 = vld [vmem:[%s9328_s27 + $0x1550] sm:$0xff]  ;;  %v8270_v22 = vcombine.low %v1525_v2, %v1549_v3 }
 0x40a   : > { %6201 = vmatprep.subr.bf16.mxu0 %v8029_v11  ;;  %6242 = vmatprep.subr.bf16.mxu1 %v8031_v12  ;;  %v1596_v11 = vld [vmem:[%s9328_s27 + $0x1610] sm:$0xff]  ;;  %v1573_v12 = vld [vmem:[%s9328_s27 + $0x1558] sm:$0xff] }
 0x40b   : > { %v8317_v23 = vcombine.high %v1572_v9, %v1596_v11  ;;  %v8319_v24 = vcombine.high %v1573_v12, %v1597_v13  ;;  %v8316_v31 = vcombine.low %v1572_v9, %v1596_v11  ;;  %v8318_v32 = vcombine.low %v1573_v12, %v1597_v13 }
 0x40d   : > { %6202 = vmatpush1.bf16.msra.mxu0 %v8028_v27  ;;  %6243 = vmatpush1.bf16.msra.mxu1 %v8030_v28  ;;  %v1620_v27 = vld [vmem:[%s9328_s27 + $0x16d0] sm:$0xff] }
 0x40e   : > { %6203 = vmatprep.subr.bf16.mxu0 %v8077_v29  ;;  %6244 = vmatprep.subr.bf16.mxu1 %v8079_v30  ;;  %v1644_v28 = vld [vmem:[%s9328_s27 + $0x1790] sm:$0xff]  ;;  %v1621_v29 = vld [vmem:[%s9328_s27 + $0x16d8] sm:$0xff] }
 0x40f   : > { %v1645_v30 = vld [vmem:[%s9328_s27 + $0x1798] sm:$0xff]  ;;  %v8365_v33 = vcombine.high %v1620_v27, %v1644_v28  ;;  %v8364_v37 = vcombine.low %v1620_v27, %v1644_v28 }
 0x410   : > { %v8367_v34 = vcombine.high %v1621_v29, %v1645_v30  ;;  %v8366_v38 = vcombine.low %v1621_v29, %v1645_v30 }
 0x411   : > { %6204 = vmatpush1.bf16.msra.mxu0 %v8076_v61  ;;  %6245 = vmatpush1.bf16.msra.mxu1 %v8078_v0  ;;  %v902_v61 = vld [vmem:[%s9328_s27 + $0x60] sm:$0xff] }
 0x412   : > { %6205 = vmatprep.subr.bf16.mxu0 %v8125_v35  ;;  %6246 = vmatprep.subr.bf16.mxu1 %v8127_v36  ;;  %v926_v0 = vld [vmem:[%s9328_s27 + $0x120] sm:$0xff]  ;;  %v903_v35 = vld [vmem:[%s9328_s27 + $0x68] sm:$0xff] }
 0x413   : > { %v927_v36 = vld [vmem:[%s9328_s27 + $0x128] sm:$0xff]  ;;  %v7649_v40 = vcombine.high %v902_v61, %v926_v0  ;;  %v7648_v52 = vcombine.low %v902_v61, %v926_v0 }
 0x414   : > { %v7651_v41 = vcombine.high %v903_v35, %v927_v36  ;;  %v7650_v54 = vcombine.low %v903_v35, %v927_v36  ;;  %v9870_v0 = vld [vmem:[%s9334_s15 + $0x8] sm:$0xff] }
 0x415   : > { %6206 = vmatpush1.bf16.msra.mxu0 %v8124_v42  ;;  %6247 = vmatpush1.bf16.msra.mxu1 %v8126_v44  ;;  %v950_v42 = vld [vmem:[%s9328_s27 + $0x1e0] sm:$0xff] }
 0x416   : > { %6207 = vmatprep.subr.bf16.mxu0 %v8173_v19  ;;  %6248 = vmatprep.subr.bf16.mxu1 %v8175_v47  ;;  %v974_v44 = vld [vmem:[%s9328_s27 + $0x2a0] sm:$0xff]  ;;  %v951_v19 = vld [vmem:[%s9328_s27 + $0x1e8] sm:$0xff] }
 0x417   : > { %v975_v47 = vld [vmem:[%s9328_s27 + $0x2a8] sm:$0xff]  ;;  %v7697_v56 = vcombine.high %v950_v42, %v974_v44  ;;  %v7696_v63 = vcombine.low %v950_v42, %v974_v44 }
 0x418   : > { %v7699_v57 = vcombine.high %v951_v19, %v975_v47  ;;  %v7698_v1 = vcombine.low %v951_v19, %v975_v47  ;;  %v1191_v42 = vld [vmem:[%s9328_s27 + $0x968] sm:$0xff]  ;;  %v1713_v19 = vrot.slane %v9870_v0, %v9661_v20  ;;  %v1709_v47 = vrot.slane %v9870_v0, %v9664_v21 }
 0x419   : > { %6208 = vmatpush1.bf16.msra.mxu0 %v8172_v58  ;;  %6249 = vmatpush1.bf16.msra.mxu1 %v8174_v59  ;;  %v998_v58 = vld [vmem:[%s9328_s27 + $0x360] sm:$0xff]  ;;  %v1215_v44 = vld [vmem:[%s9328_s27 + $0xa28] sm:$0xff] }
 0x41a   : > { %6209 = vmatprep.subr.bf16.mxu0 %v8221_v60  ;;  %6250 = vmatprep.subr.bf16.mxu1 %v8223_v62  ;;  %v1022_v59 = vld [vmem:[%s9328_s27 + $0x420] sm:$0xff]  ;;  %v999_v60 = vld [vmem:[%s9328_s27 + $0x368] sm:$0xff] }
 0x41b   : > { %v1023_v62 = vld [vmem:[%s9328_s27 + $0x428] sm:$0xff]  ;;  %v7745_v2 = vcombine.high %v998_v58, %v1022_v59  ;;  %v7744_v9 = vcombine.low %v998_v58, %v1022_v59  ;;  %v7939_v59 = vcombine.high %v1191_v42, %v1215_v44 }
 0x41c   : > { %v7747_v3 = vcombine.high %v999_v60, %v1023_v62  ;;  %v7746_v11 = vcombine.low %v999_v60, %v1023_v62  ;;  %v1238_v60 = vld [vmem:[%s9328_s27 + $0xae0] sm:$0xff] }
 0x41d   : > { %6210 = vmatpush1.bf16.msra.mxu0 %v8220_v4  ;;  %6251 = vmatpush1.bf16.msra.mxu1 %v8222_v5  ;;  %v1046_v4 = vld [vmem:[%s9328_s27 + $0x4e0] sm:$0xff] }
 0x41e   : > { %6211 = vmatprep.subr.bf16.mxu0 %v8269_v6  ;;  %6252 = vmatprep.subr.bf16.mxu1 %v8271_v7  ;;  %v1070_v5 = vld [vmem:[%s9328_s27 + $0x5a0] sm:$0xff]  ;;  %v1047_v6 = vld [vmem:[%s9328_s27 + $0x4e8] sm:$0xff] }
 0x41f   : > { %v1071_v7 = vld [vmem:[%s9328_s27 + $0x5a8] sm:$0xff]  ;;  %v7793_v12 = vcombine.high %v1046_v4, %v1070_v5  ;;  %v7792_v27 = vcombine.low %v1046_v4, %v1070_v5  ;;  %v1262_v62 = vld [vmem:[%s9328_s27 + $0xba0] sm:$0xff] }
 0x420   : > { %v7795_v13 = vcombine.high %v1047_v6, %v1071_v7  ;;  %v7794_v28 = vcombine.low %v1047_v6, %v1071_v7  ;;  %v1263_v4 = vld [vmem:[%s9328_s27 + $0xba8] sm:$0xff] }
 0x421   : > { %6212 = vmatpush1.bf16.msra.mxu0 %v8268_v17  ;;  %6253 = vmatpush1.bf16.msra.mxu1 %v8270_v22  ;;  %v1094_v17 = vld [vmem:[%s9328_s27 + $0x660] sm:$0xff] }
 0x422   : > { %6213 = vmatprep.subr.bf16.mxu0 %v8317_v23  ;;  %6254 = vmatprep.subr.bf16.mxu1 %v8319_v24  ;;  %v1118_v22 = vld [vmem:[%s9328_s27 + $0x720] sm:$0xff]  ;;  %v1095_v23 = vld [vmem:[%s9328_s27 + $0x668] sm:$0xff] }
 0x423   : > { %v1119_v24 = vld [vmem:[%s9328_s27 + $0x728] sm:$0xff]  ;;  %v7841_v29 = vcombine.high %v1094_v17, %v1118_v22  ;;  %v7840_v61 = vcombine.low %v1094_v17, %v1118_v22  ;;  %v7938_v22 = vcombine.low %v1191_v42, %v1215_v44 }
 0x424   : > { %v7843_v30 = vcombine.high %v1095_v23, %v1119_v24  ;;  %v7842_v35 = vcombine.low %v1095_v23, %v1119_v24  ;;  %v7985_v23 = vcombine.high %v1238_v60, %v1262_v62  ;;  %v1335_v44 = vld [vmem:[%s9328_s27 + $0xde8] sm:$0xff] }
 0x425   : > { %6214 = vmatpush1.bf16.msra.mxu0 %v8316_v31  ;;  %6255 = vmatpush1.bf16.msra.mxu1 %v8318_v32  ;;  %v1142_v31 = vld [vmem:[%s9328_s27 + $0x7e0] sm:$0xff] }
 0x426   : > { %6215 = vmatprep.subr.bf16.mxu0 %v8365_v33  ;;  %6256 = vmatprep.subr.bf16.mxu1 %v8367_v34  ;;  %v1166_v32 = vld [vmem:[%s9328_s27 + $0x8a0] sm:$0xff]  ;;  %v1143_v33 = vld [vmem:[%s9328_s27 + $0x7e8] sm:$0xff] }
 0x427   : > { %v1167_v34 = vld [vmem:[%s9328_s27 + $0x8a8] sm:$0xff]  ;;  %v7889_v36 = vcombine.high %v1142_v31, %v1166_v32 }
 0x429   : > { %6216 = vmatpush1.bf16.msra.mxu0 %v8364_v37  ;;  %6257 = vmatpush1.bf16.msra.mxu1 %v8366_v38  ;;  %v7891_v37 = vcombine.high %v1143_v33, %v1167_v34  ;;  %v1190_v38 = vld [vmem:[%s9328_s27 + $0x960] sm:$0xff] }
 0x42a   : > { %6267 = vmatprep.subr.bf16.mxu0 %v7649_v40  ;;  %6308 = vmatprep.subr.bf16.mxu1 %v7651_v41  ;;  %v1214_v40 = vld [vmem:[%s9328_s27 + $0xa20] sm:$0xff]  ;;  %v1705_v41 = vrot.slane %v9870_v0, %v9653_v15 }
 0x42c   : > { %6218 = vmatmul.mubr.bf16.vlgmr.msra.gmra.mrb[20].mxu0 %v9426_v26  ;;  %6259 = vmatmul.mubr.bf16.vlgmr.msra.gmra.mrb[20].mxu1 %v9426_v26 }
 0x42d   : > { %6268 = vmatpush1.bf16.msra.mxu0 %v7648_v52  ;;  %6309 = vmatpush1.bf16.msra.mxu1 %v7650_v54  ;;  %v7888_v52 = vcombine.low %v1142_v31, %v1166_v32  ;;  %v1717_v54 = vrot.slane %v9870_v0, %v9667_v25  ;;  %v1287_v32 = vld [vmem:[%s9328_s27 + $0xc68] sm:$0xff] }
 0x42e   : > { %6269 = vmatprep.subr.bf16.mxu0 %v7697_v56  ;;  %6310 = vmatprep.subr.bf16.mxu1 %v7699_v57  ;;  %v7890_v56 = vcombine.low %v1143_v33, %v1167_v34  ;;  %v7937_v57 = vcombine.high %v1190_v38, %v1214_v40  ;;  %v1311_v33 = vld [vmem:[%s9328_s27 + $0xd28] sm:$0xff] }
 0x42f   : > { %6299 = vmatprep.mubr.bf16.mxu0 %v9382_v8  ;;  %6340 = vmatprep.mubr.bf16.mxu1 %v9382_v8 }
 0x431   : > { %6270 = vmatpush1.bf16.msra.mxu0 %v7696_v63  ;;  %6311 = vmatpush1.bf16.msra.mxu1 %v7698_v1 }
 0x432   : > { %6271 = vmatprep.subr.bf16.mxu0 %v7745_v2  ;;  %6312 = vmatprep.subr.bf16.mxu1 %v7747_v3  ;;  %v1239_v3 = vld [vmem:[%s9328_s27 + $0xae8] sm:$0xff] }
 0x435   : > { %6272 = vmatpush1.bf16.msra.mxu0 %v7744_v9  ;;  %6313 = vmatpush1.bf16.msra.mxu1 %v7746_v11  ;;  %v7936_v11 = vcombine.low %v1190_v38, %v1214_v40  ;;  %v8035_v38 = vcombine.high %v1287_v32, %v1311_v33  ;;  %v1334_v40 = vld [vmem:[%s9328_s27 + $0xde0] sm:$0xff] }
 0x436   : > { %6273 = vmatprep.subr.bf16.mxu0 %v7793_v12  ;;  %6314 = vmatprep.subr.bf16.mxu1 %v7795_v13 }
 0x439   : > { %6274 = vmatpush1.bf16.msra.mxu0 %v7792_v27  ;;  %6315 = vmatpush1.bf16.msra.mxu1 %v7794_v28  ;;  %v7987_v28 = vcombine.high %v1239_v3, %v1263_v4 }
 0x43a   : > { %6275 = vmatprep.subr.bf16.mxu0 %v7841_v29  ;;  %6316 = vmatprep.subr.bf16.mxu1 %v7843_v30  ;;  %v1286_v29 = vld [vmem:[%s9328_s27 + $0xc60] sm:$0xff] }
 0x43b   : > { %v1310_v30 = vld [vmem:[%s9328_s27 + $0xd20] sm:$0xff] }
 0x43d   : > { %6276 = vmatpush1.bf16.msra.mxu0 %v7840_v61  ;;  %6317 = vmatpush1.bf16.msra.mxu1 %v7842_v35  ;;  %v7984_v61 = vcombine.low %v1238_v60, %v1262_v62  ;;  %v1407_v60 = vld [vmem:[%s9328_s27 + $0x1028] sm:$0xff] }
 0x43e   : > { %6277 = vmatprep.subr.bf16.mxu0 %v7889_v36  ;;  %6318 = vmatprep.subr.bf16.mxu1 %v7891_v37  ;;  %v7986_v36 = vcombine.low %v1239_v3, %v1263_v4  ;;  %v8033_v37 = vcombine.high %v1286_v29, %v1310_v30  ;;  %v1430_v4 = vld [vmem:[%s9328_s27 + $0x10e0] sm:$0xff] }
 0x43f   : > { %v5973_v58 = vpop.f32.mrb[8].mxu0  ;;  %v6014_v1 = vpop.f32.mrb[8].mxu1 }
 0x440   : > { %v9886_v63 = vadd.f32 %v5973_v58, %v1705_v41  ;;  %v5975_v2 = vpop.f32.mrb[9].mxu0  ;;  %v9890_v5 = vadd.f32 %v6014_v1, %v1713_v19  ;;  %v6016_v7 = vpop.f32.mrb[9].mxu1  ;;  %v1358_v41 = vld [vmem:[%s9328_s27 + $0xea0] sm:$0xff]  ;;  %v1359_v19 = vld [vmem:[%s9328_s27 + $0xea8] sm:$0xff] }
 0x441   : > { %v9892_v6 = vadd.f32 %v5975_v2, %v1709_v47  ;;  %v5977_v9 = vpop.f32.mrb[10].mxu0  ;;  %6278 = vmatpush1.bf16.msra.mxu0 %v7888_v52  ;;  %v9894_v12 = vadd.f32 %v6016_v7, %v1717_v54  ;;  %v6018_v13 = vpop.f32.mrb[10].mxu1  ;;  %6319 = vmatpush1.bf16.msra.mxu1 %v7890_v56  ;;  %v8032_v47 = vcombine.low %v1286_v29, %v1310_v30  ;;  %v1406_v58 = vld [vmem:[%s9328_s27 + $0x1020] sm:$0xff]  ;;  %v1503_v29 = vld [vmem:[%s9328_s27 + $0x1328] sm:$0xff] }
 0x442   : > { %v5978_v17 = vpop.f32.mrb[11].mxu0  ;;  %6279 = vmatprep.subr.bf16.mxu0 %v7937_v57  ;;  %v6019_v27 = vpop.f32.mrb[11].mxu1  ;;  %6320 = vmatprep.subr.bf16.mxu1 %v7939_v59  ;;  %v8034_v52 = vcombine.low %v1287_v32, %v1311_v33  ;;  %v8081_v54 = vcombine.high %v1334_v40, %v1358_v41  ;;  %v8083_v56 = vcombine.high %v1335_v44, %v1359_v19  ;;  %v1382_v57 = vld [vmem:[%s9328_s27 + $0xf60] sm:$0xff]  ;;  %v1383_v59 = vld [vmem:[%s9328_s27 + $0xf68] sm:$0xff] }
 0x443   : > { %v6841_v24 = vcombine.low %v9886_v63, %v9892_v6  ;;  %v6842_v31 = vcombine.low %v9890_v5, %v9894_v12  ;;  %v8080_v62 = vcombine.low %v1334_v40, %v1358_v41  ;;  %v8082_v1 = vcombine.low %v1335_v44, %v1359_v19  ;;  %v1454_v7 = vld [vmem:[%s9328_s27 + $0x11a0] sm:$0xff]  ;;  %v1431_v9 = vld [vmem:[%s9328_s27 + $0x10e8] sm:$0xff] }
 0x444   : > { %v8129_v2 = vcombine.high %v1382_v57, %v1406_v58  ;;  %v8131_v3 = vcombine.high %v1383_v59, %v1407_v60  ;;  %v8128_v13 = vcombine.low %v1382_v57, %v1406_v58  ;;  %v8130_v17 = vcombine.low %v1383_v59, %v1407_v60  ;;  %v1502_v27 = vld [vmem:[%s9328_s27 + $0x1320] sm:$0xff]  ;;  %v1575_v19 = vld [vmem:[%s9328_s27 + $0x1568] sm:$0xff] }
 0x445   : > { %v6849_v34 = vrot.slane %v6841_v24, %v9692_v50  ;;  %6280 = vmatpush1.bf16.msra.mxu0 %v7936_v11  ;;  %v6856_v35 = vrot.slane %v6842_v31, %v9692_v50  ;;  %6321 = vmatpush1.bf16.msra.mxu1 %v7938_v22  ;;  %v1455_v11 = vld [vmem:[%s9328_s27 + $0x11a8] sm:$0xff]  ;;  %v8177_v22 = vcombine.high %v1430_v4, %v1454_v7  ;;  %v1478_v24 = vld [vmem:[%s9328_s27 + $0x1260] sm:$0xff] }
 0x446   : > { %6281 = vmatprep.subr.bf16.mxu0 %v7985_v23  ;;  %6322 = vmatprep.subr.bf16.mxu1 %v7987_v28  ;;  %v8179_v23 = vcombine.high %v1431_v9, %v1455_v11  ;;  %v1479_v28 = vld [vmem:[%s9328_s27 + $0x1268] sm:$0xff]  ;;  %v8176_v30 = vcombine.low %v1430_v4, %v1454_v7  ;;  %v8178_v31 = vcombine.low %v1431_v9, %v1455_v11  ;;  %v1598_v44 = vld [vmem:[%s9328_s27 + $0x1620] sm:$0xff]  ;;  %v904_v7 = vld [vmem:[%s9328_s27 + $0x70] sm:$0xff] }
 0x447   : > { %v6857_v42 = vcombine.low %v6849_v34, %v6856_v35  ;;  %v8225_v32 = vcombine.high %v1478_v24, %v1502_v27  ;;  %v8227_v33 = vcombine.high %v1479_v28, %v1503_v29  ;;  %v1526_v34 = vld [vmem:[%s9328_s27 + $0x13e0] sm:$0xff]  ;;  %v1527_v35 = vld [vmem:[%s9328_s27 + $0x13e8] sm:$0xff]  ;;  %v928_v9 = vld [vmem:[%s9328_s27 + $0x130] sm:$0xff] }
 0x448   : > { %v1622_v58 = vld [vmem:[%s9328_s27 + $0x16e0] sm:$0xff]  ;;  %v1623_v60 = vld [vmem:[%s9328_s27 + $0x16e8] sm:$0xff]  ;;  %v905_v11 = vld [vmem:[%s9328_s27 + $0x78] sm:$0xff] }
 0x449   : > { %6282 = vmatpush1.bf16.msra.mxu0 %v7984_v61  ;;  %7028 = vst [vmem:[%s9711_s20 + $0x10] sm:$0xff] %v6857_v42  ;;  %6323 = vmatpush1.bf16.msra.mxu1 %v7986_v36  ;;  %v1550_v61 = vld [vmem:[%s9328_s27 + $0x14a0] sm:$0xff]  ;;  %v1551_v36 = vld [vmem:[%s9328_s27 + $0x14a8] sm:$0xff] }
 0x44a   : > { %6283 = vmatprep.subr.bf16.mxu0 %v8033_v37  ;;  %6324 = vmatprep.subr.bf16.mxu1 %v8035_v38  ;;  %v8224_v37 = vcombine.low %v1478_v24, %v1502_v27  ;;  %v8226_v38 = vcombine.low %v1479_v28, %v1503_v29  ;;  %v8273_v40 = vcombine.high %v1526_v34, %v1550_v61  ;;  %v1574_v42 = vld [vmem:[%s9328_s27 + $0x1560] sm:$0xff]  ;;  %v952_v27 = vld [vmem:[%s9328_s27 + $0x1f0] sm:$0xff]  ;;  %v953_v29 = vld [vmem:[%s9328_s27 + $0x1f8] sm:$0xff] }
 0x44b   : > { %v8275_v41 = vcombine.high %v1527_v35, %v1551_v36  ;;  %v1646_v59 = vld [vmem:[%s9328_s27 + $0x17a0] sm:$0xff]  ;;  %v976_v28 = vld [vmem:[%s9328_s27 + $0x2b0] sm:$0xff] }
 0x44d   : > { %6284 = vmatpush1.bf16.msra.mxu0 %v8032_v47  ;;  %6325 = vmatpush1.bf16.msra.mxu1 %v8034_v52  ;;  %v1599_v47 = vld [vmem:[%s9328_s27 + $0x1628] sm:$0xff]  ;;  %v8272_v52 = vcombine.low %v1526_v34, %v1550_v61  ;;  %v1000_v61 = vld [vmem:[%s9328_s27 + $0x370] sm:$0xff] }
 0x44e   : > { %6285 = vmatprep.subr.bf16.mxu0 %v8081_v54  ;;  %6326 = vmatprep.subr.bf16.mxu1 %v8083_v56  ;;  %v8274_v54 = vcombine.low %v1527_v35, %v1551_v36  ;;  %v8321_v56 = vcombine.high %v1574_v42, %v1598_v44  ;;  %v8323_v57 = vcombine.high %v1575_v19, %v1599_v47  ;;  %v1024_v35 = vld [vmem:[%s9328_s27 + $0x430] sm:$0xff]  ;;  %v1001_v36 = vld [vmem:[%s9328_s27 + $0x378] sm:$0xff] }
 0x451   : > { %6286 = vmatpush1.bf16.msra.mxu0 %v8080_v62  ;;  %6327 = vmatpush1.bf16.msra.mxu1 %v8082_v1  ;;  %v1647_v62 = vld [vmem:[%s9328_s27 + $0x17a8] sm:$0xff]  ;;  %v8320_v1 = vcombine.low %v1574_v42, %v1598_v44  ;;  %v1048_v44 = vld [vmem:[%s9328_s27 + $0x4f0] sm:$0xff] }
 0x452   : > { %6287 = vmatprep.subr.bf16.mxu0 %v8129_v2  ;;  %6328 = vmatprep.subr.bf16.mxu1 %v8131_v3  ;;  %v8322_v2 = vcombine.low %v1575_v19, %v1599_v47  ;;  %v8369_v3 = vcombine.high %v1622_v58, %v1646_v59  ;;  %v8371_v4 = vcombine.high %v1623_v60, %v1647_v62  ;;  %v1072_v19 = vld [vmem:[%s9328_s27 + $0x5b0] sm:$0xff]  ;;  %v1049_v47 = vld [vmem:[%s9328_s27 + $0x4f8] sm:$0xff] }
 0x455   : > { %6288 = vmatpush1.bf16.msra.mxu0 %v8128_v13  ;;  %6329 = vmatpush1.bf16.msra.mxu1 %v8130_v17  ;;  %v929_v13 = vld [vmem:[%s9328_s27 + $0x138] sm:$0xff]  ;;  %v8368_v17 = vcombine.low %v1622_v58, %v1646_v59  ;;  %v1096_v59 = vld [vmem:[%s9328_s27 + $0x670] sm:$0xff] }
 0x456   : > { %6289 = vmatprep.subr.bf16.mxu0 %v8177_v22  ;;  %6330 = vmatprep.subr.bf16.mxu1 %v8179_v23  ;;  %v8370_v22 = vcombine.low %v1623_v60, %v1647_v62  ;;  %v7653_v23 = vcombine.high %v904_v7, %v928_v9  ;;  %v7655_v24 = vcombine.high %v905_v11, %v929_v13  ;;  %v1120_v60 = vld [vmem:[%s9328_s27 + $0x730] sm:$0xff]  ;;  %v1097_v62 = vld [vmem:[%s9328_s27 + $0x678] sm:$0xff] }
 0x459   : > { %6290 = vmatpush1.bf16.msra.mxu0 %v8176_v30  ;;  %6331 = vmatpush1.bf16.msra.mxu1 %v8178_v31  ;;  %v977_v30 = vld [vmem:[%s9328_s27 + $0x2b8] sm:$0xff]  ;;  %v7652_v31 = vcombine.low %v904_v7, %v928_v9  ;;  %v1144_v9 = vld [vmem:[%s9328_s27 + $0x7f0] sm:$0xff] }
 0x45a   : > { %6291 = vmatprep.subr.bf16.mxu0 %v8225_v32  ;;  %6332 = vmatprep.subr.bf16.mxu1 %v8227_v33  ;;  %v7654_v32 = vcombine.low %v905_v11, %v929_v13  ;;  %v7701_v33 = vcombine.high %v952_v27, %v976_v28  ;;  %v7703_v34 = vcombine.high %v953_v29, %v977_v30  ;;  %v1168_v11 = vld [vmem:[%s9328_s27 + $0x8b0] sm:$0xff]  ;;  %v1145_v13 = vld [vmem:[%s9328_s27 + $0x7f8] sm:$0xff] }
 0x45d   : > { %6292 = vmatpush1.bf16.msra.mxu0 %v8224_v37  ;;  %6333 = vmatpush1.bf16.msra.mxu1 %v8226_v38  ;;  %v1025_v37 = vld [vmem:[%s9328_s27 + $0x438] sm:$0xff]  ;;  %v7700_v38 = vcombine.low %v952_v27, %v976_v28  ;;  %v1192_v28 = vld [vmem:[%s9328_s27 + $0x970] sm:$0xff] }
 0x45e   : > { %6293 = vmatprep.subr.bf16.mxu0 %v8273_v40  ;;  %6334 = vmatprep.subr.bf16.mxu1 %v8275_v41  ;;  %v7702_v40 = vcombine.low %v953_v29, %v977_v30  ;;  %v7749_v41 = vcombine.high %v1000_v61, %v1024_v35  ;;  %v7751_v42 = vcombine.high %v1001_v36, %v1025_v37  ;;  %v1216_v29 = vld [vmem:[%s9328_s27 + $0xa30] sm:$0xff] }
 0x45f   : > { %v1721_v30 = vrot.slane %v9870_v0, %v9765_v10 }
 0x461   : > { %6294 = vmatpush1.bf16.msra.mxu0 %v8272_v52  ;;  %6335 = vmatpush1.bf16.msra.mxu1 %v8274_v54  ;;  %v1073_v52 = vld [vmem:[%s9328_s27 + $0x5b8] sm:$0xff]  ;;  %v7748_v54 = vcombine.low %v1000_v61, %v1024_v35  ;;  %v7892_v61 = vcombine.low %v1144_v9, %v1168_v11  ;;  %v1733_v35 = vrot.slane %v9870_v0, %v9776_v18 }
 0x462   : > { %6295 = vmatprep.subr.bf16.mxu0 %v8321_v56  ;;  %6336 = vmatprep.subr.bf16.mxu1 %v8323_v57  ;;  %v7750_v56 = vcombine.low %v1001_v36, %v1025_v37  ;;  %v7797_v57 = vcombine.high %v1048_v44, %v1072_v19  ;;  %v7799_v58 = vcombine.high %v1049_v47, %v1073_v52 }
 0x463   : > { %v7941_v37 = vcombine.high %v1192_v28, %v1216_v29 }
 0x465   : > { %6296 = vmatpush1.bf16.msra.mxu0 %v8320_v1  ;;  %6337 = vmatpush1.bf16.msra.mxu1 %v8322_v2  ;;  %v1121_v1 = vld [vmem:[%s9328_s27 + $0x738] sm:$0xff]  ;;  %v7796_v2 = vcombine.low %v1048_v44, %v1072_v19 }
 0x466   : > { %6297 = vmatprep.subr.bf16.mxu0 %v8369_v3  ;;  %6338 = vmatprep.subr.bf16.mxu1 %v8371_v4  ;;  %v7798_v3 = vcombine.low %v1049_v47, %v1073_v52  ;;  %v7845_v4 = vcombine.high %v1096_v59, %v1120_v60  ;;  %v7847_v7 = vcombine.high %v1097_v62, %v1121_v1  ;;  %v1241_v52 = vld [vmem:[%s9328_s27 + $0xaf8] sm:$0xff] }
 0x469   : > { %6298 = vmatpush1.bf16.msra.mxu0 %v8368_v17  ;;  %6339 = vmatpush1.bf16.msra.mxu1 %v8370_v22  ;;  %v1169_v17 = vld [vmem:[%s9328_s27 + $0x8b8] sm:$0xff]  ;;  %v7844_v22 = vcombine.low %v1096_v59, %v1120_v60  ;;  %v7940_v59 = vcombine.low %v1192_v28, %v1216_v29 }
 0x46a   : > { %6349 = vmatprep.subr.bf16.mxu0 %v7653_v23  ;;  %6390 = vmatprep.subr.bf16.mxu1 %v7655_v24  ;;  %v7846_v23 = vcombine.low %v1097_v62, %v1121_v1  ;;  %v7893_v24 = vcombine.high %v1144_v9, %v1168_v11  ;;  %v7895_v27 = vcombine.high %v1145_v13, %v1169_v17  ;;  %v1288_v11 = vld [vmem:[%s9328_s27 + $0xc70] sm:$0xff] }
 0x46b   : > { %v7894_v36 = vcombine.low %v1145_v13, %v1169_v17  ;;  %v1312_v13 = vld [vmem:[%s9328_s27 + $0xd30] sm:$0xff] }
 0x46c   : > { %6300 = vmatmul.mubr.bf16.vlgmr.msra.gmra.mrb[24].mxu0 %v9426_v26  ;;  %6341 = vmatmul.mubr.bf16.vlgmr.msra.gmra.mrb[24].mxu1 %v9426_v26 }
 0x46d   : > { %6350 = vmatpush1.bf16.msra.mxu0 %v7652_v31  ;;  %6391 = vmatpush1.bf16.msra.mxu1 %v7654_v32  ;;  %v1193_v31 = vld [vmem:[%s9328_s27 + $0x978] sm:$0xff] }
 0x46e   : > { %6351 = vmatprep.subr.bf16.mxu0 %v7701_v33  ;;  %6392 = vmatprep.subr.bf16.mxu1 %v7703_v34  ;;  %v1217_v32 = vld [vmem:[%s9328_s27 + $0xa38] sm:$0xff]  ;;  %v1729_v33 = vrot.slane %v9870_v0, %v9770_v14  ;;  %v1725_v34 = vrot.slane %v9870_v0, %v9773_v16 }
 0x46f   : > { %6381 = vmatprep.mubr.bf16.mxu0 %v9382_v8  ;;  %6422 = vmatprep.mubr.bf16.mxu1 %v9382_v8 }
 0x471   : > { %6352 = vmatpush1.bf16.msra.mxu0 %v7700_v38  ;;  %6393 = vmatpush1.bf16.msra.mxu1 %v7702_v40  ;;  %v7943_v40 = vcombine.high %v1193_v31, %v1217_v32 }
 0x472   : > { %6353 = vmatprep.subr.bf16.mxu0 %v7749_v41  ;;  %6394 = vmatprep.subr.bf16.mxu1 %v7751_v42  ;;  %v1240_v41 = vld [vmem:[%s9328_s27 + $0xaf0] sm:$0xff] }
 0x473   : > { %v1264_v42 = vld [vmem:[%s9328_s27 + $0xbb0] sm:$0xff] }
 0x475   : > { %6354 = vmatpush1.bf16.msra.mxu0 %v7748_v54  ;;  %6395 = vmatpush1.bf16.msra.mxu1 %v7750_v56  ;;  %v1265_v54 = vld [vmem:[%s9328_s27 + $0xbb8] sm:$0xff] }
 0x476   : > { %6355 = vmatprep.subr.bf16.mxu0 %v7797_v57  ;;  %6396 = vmatprep.subr.bf16.mxu1 %v7799_v58  ;;  %v7991_v9 = vcombine.high %v1241_v52, %v1265_v54  ;;  %v7990_v29 = vcombine.low %v1241_v52, %v1265_v54 }
 0x479   : > { %6356 = vmatpush1.bf16.msra.mxu0 %v7796_v2  ;;  %6397 = vmatpush1.bf16.msra.mxu1 %v7798_v3  ;;  %v7942_v2 = vcombine.low %v1193_v31, %v1217_v32  ;;  %v7989_v3 = vcombine.high %v1240_v41, %v1264_v42  ;;  %v1336_v32 = vld [vmem:[%s9328_s27 + $0xdf0] sm:$0xff] }
 0x47a   : > { %6357 = vmatprep.subr.bf16.mxu0 %v7845_v4  ;;  %6398 = vmatprep.subr.bf16.mxu1 %v7847_v7 }
 0x47d   : > { %6358 = vmatpush1.bf16.msra.mxu0 %v7844_v22  ;;  %6399 = vmatpush1.bf16.msra.mxu1 %v7846_v23  ;;  %v1289_v22 = vld [vmem:[%s9328_s27 + $0xc78] sm:$0xff] }
 0x47e   : > { %6359 = vmatprep.subr.bf16.mxu0 %v7893_v24  ;;  %6400 = vmatprep.subr.bf16.mxu1 %v7895_v27  ;;  %v1313_v23 = vld [vmem:[%s9328_s27 + $0xd38] sm:$0xff]  ;;  %v7988_v27 = vcombine.low %v1240_v41, %v1264_v42  ;;  %v1384_v41 = vld [vmem:[%s9328_s27 + $0xf70] sm:$0xff] }
 0x47f   : > { %v6055_v38 = vpop.f32.mrb[12].mxu0  ;;  %v6096_v19 = vpop.f32.mrb[12].mxu1  ;;  %v8039_v31 = vcombine.high %v1289_v22, %v1313_v23  ;;  %v1408_v42 = vld [vmem:[%s9328_s27 + $0x1030] sm:$0xff] }
 0x480   : > { %v9977_v44 = vadd.f32 %v6055_v38, %v1721_v30  ;;  %v6057_v47 = vpop.f32.mrb[13].mxu0  ;;  %v9981_v56 = vadd.f32 %v6096_v19, %v1729_v33  ;;  %v6098_v0 = vpop.f32.mrb[13].mxu1  ;;  %v8037_v30 = vcombine.high %v1288_v11, %v1312_v13  ;;  %v1360_v33 = vld [vmem:[%s9328_s27 + $0xeb0] sm:$0xff]  ;;  %v1385_v19 = vld [vmem:[%s9328_s27 + $0xf78] sm:$0xff] }
 0x481   : > { %v9983_v57 = vadd.f32 %v6057_v47, %v1725_v34  ;;  %v6059_v58 = vpop.f32.mrb[14].mxu0  ;;  %6360 = vmatpush1.bf16.msra.mxu0 %v7892_v61  ;;  %v9985_v60 = vadd.f32 %v6098_v0, %v1733_v35  ;;  %v6100_v62 = vpop.f32.mrb[14].mxu1  ;;  %6401 = vmatpush1.bf16.msra.mxu1 %v7894_v36  ;;  %v1337_v61 = vld [vmem:[%s9328_s27 + $0xdf8] sm:$0xff]  ;;  %v8036_v36 = vcombine.low %v1288_v11, %v1312_v13  ;;  %v1480_v11 = vld [vmem:[%s9328_s27 + $0x1270] sm:$0xff] }
 0x482   : > { %v6060_v1 = vpop.f32.mrb[15].mxu0  ;;  %6361 = vmatprep.subr.bf16.mxu0 %v7941_v37  ;;  %v6101_v7 = vpop.f32.mrb[15].mxu1  ;;  %6402 = vmatprep.subr.bf16.mxu1 %v7943_v40  ;;  %v1361_v35 = vld [vmem:[%s9328_s27 + $0xeb8] sm:$0xff]  ;;  %v8038_v37 = vcombine.low %v1289_v22, %v1313_v23  ;;  %v8085_v38 = vcombine.high %v1336_v32, %v1360_v33  ;;  %v8084_v52 = vcombine.low %v1336_v32, %v1360_v33  ;;  %v1456_v62 = vld [vmem:[%s9328_s27 + $0x11b0] sm:$0xff] }
 0x483   : > { %v6858_v4 = vcombine.low %v9977_v44, %v9983_v57  ;;  %v6859_v17 = vcombine.low %v9981_v56, %v9985_v60  ;;  %v8087_v40 = vcombine.high %v1337_v61, %v1361_v35  ;;  %v1409_v47 = vld [vmem:[%s9328_s27 + $0x1038] sm:$0xff]  ;;  %v8086_v54 = vcombine.low %v1337_v61, %v1361_v35  ;;  %v1504_v13 = vld [vmem:[%s9328_s27 + $0x1330] sm:$0xff] }
 0x484   : > { %v8133_v0 = vcombine.high %v1384_v41, %v1408_v42  ;;  %v8135_v58 = vcombine.high %v1385_v19, %v1409_v47  ;;  %v1433_v1 = vld [vmem:[%s9328_s27 + $0x10f8] sm:$0xff]  ;;  %v8228_v33 = vcombine.low %v1480_v11, %v1504_v13 }
 0x485   : > { %v6866_v24 = vrot.slane %v6858_v4, %v9692_v50  ;;  %6362 = vmatpush1.bf16.msra.mxu0 %v7940_v59  ;;  %v6873_v28 = vrot.slane %v6859_v17, %v9692_v50  ;;  %6403 = vmatpush1.bf16.msra.mxu1 %v7942_v2  ;;  %v1432_v59 = vld [vmem:[%s9328_s27 + $0x10f0] sm:$0xff]  ;;  %v1457_v2 = vld [vmem:[%s9328_s27 + $0x11b8] sm:$0xff]  ;;  %v8134_v4 = vcombine.low %v1385_v19, %v1409_v47 }
 0x486   : > { %6363 = vmatprep.subr.bf16.mxu0 %v7989_v3  ;;  %6404 = vmatprep.subr.bf16.mxu1 %v7991_v9  ;;  %v8132_v3 = vcombine.low %v1384_v41, %v1408_v42  ;;  %v8181_v7 = vcombine.high %v1432_v59, %v1456_v62  ;;  %v8183_v9 = vcombine.high %v1433_v1, %v1457_v2  ;;  %v1481_v17 = vld [vmem:[%s9328_s27 + $0x1278] sm:$0xff] }
 0x487   : > { %v6874_v34 = vcombine.low %v6866_v24, %v6873_v28  ;;  %v1505_v22 = vld [vmem:[%s9328_s27 + $0x1338] sm:$0xff]  ;;  %v8180_v23 = vcombine.low %v1432_v59, %v1456_v62  ;;  %v8182_v24 = vcombine.low %v1433_v1, %v1457_v2 }
 0x488   : > { %v8231_v28 = vcombine.high %v1481_v17, %v1505_v22  ;;  %v1553_v32 = vld [vmem:[%s9328_s27 + $0x14b8] sm:$0xff] }
 0x489   : > { %6364 = vmatpush1.bf16.msra.mxu0 %v7988_v27  ;;  %7029 = vst [vmem:[%s9711_s20 + $0x18] sm:$0xff] %v6874_v34  ;;  %6405 = vmatpush1.bf16.msra.mxu1 %v7990_v29  ;;  %v8229_v27 = vcombine.high %v1480_v11, %v1504_v13  ;;  %v1528_v29 = vld [vmem:[%s9328_s27 + $0x13f0] sm:$0xff]  ;;  %v8230_v34 = vcombine.low %v1481_v17, %v1505_v22 }
 0x48a   : > { %6365 = vmatprep.subr.bf16.mxu0 %v8037_v30  ;;  %6406 = vmatprep.subr.bf16.mxu1 %v8039_v31  ;;  %v1552_v30 = vld [vmem:[%s9328_s27 + $0x14b0] sm:$0xff]  ;;  %v1529_v31 = vld [vmem:[%s9328_s27 + $0x13f8] sm:$0xff] }
 0x48b   : > { %v8277_v61 = vcombine.high %v1528_v29, %v1552_v30  ;;  %v8279_v35 = vcombine.high %v1529_v31, %v1553_v32  ;;  %v8276_v41 = vcombine.low %v1528_v29, %v1552_v30  ;;  %v8278_v42 = vcombine.low %v1529_v31, %v1553_v32 }
 0x48d   : > { %6366 = vmatpush1.bf16.msra.mxu0 %v8036_v36  ;;  %6407 = vmatpush1.bf16.msra.mxu1 %v8038_v37  ;;  %v1576_v36 = vld [vmem:[%s9328_s27 + $0x1570] sm:$0xff] }
 0x48e   : > { %6367 = vmatprep.subr.bf16.mxu0 %v8085_v38  ;;  %6408 = vmatprep.subr.bf16.mxu1 %v8087_v40  ;;  %v1600_v37 = vld [vmem:[%s9328_s27 + $0x1630] sm:$0xff]  ;;  %v1577_v38 = vld [vmem:[%s9328_s27 + $0x1578] sm:$0xff] }
 0x48f   : > { %v1601_v40 = vld [vmem:[%s9328_s27 + $0x1638] sm:$0xff]  ;;  %v8325_v19 = vcombine.high %v1576_v36, %v1600_v37  ;;  %v8324_v59 = vcombine.low %v1576_v36, %v1600_v37 }
 0x490   : > { %v8327_v47 = vcombine.high %v1577_v38, %v1601_v40  ;;  %v8326_v62 = vcombine.low %v1577_v38, %v1601_v40 }
 0x491   : > { %6368 = vmatpush1.bf16.msra.mxu0 %v8084_v52  ;;  %6409 = vmatpush1.bf16.msra.mxu1 %v8086_v54  ;;  %v1624_v52 = vld [vmem:[%s9328_s27 + $0x16f0] sm:$0xff] }
 0x492   : > { %6369 = vmatprep.subr.bf16.mxu0 %v8133_v0  ;;  %6410 = vmatprep.subr.bf16.mxu1 %v8135_v58  ;;  %v1648_v54 = vld [vmem:[%s9328_s27 + $0x17b0] sm:$0xff]  ;;  %v1625_v0 = vld [vmem:[%s9328_s27 + $0x16f8] sm:$0xff] }
 0x493   : > { %v1649_v58 = vld [vmem:[%s9328_s27 + $0x17b8] sm:$0xff]  ;;  %v8373_v1 = vcombine.high %v1624_v52, %v1648_v54  ;;  %v8372_v11 = vcombine.low %v1624_v52, %v1648_v54 }
 0x494   : > { %v8375_v2 = vcombine.high %v1625_v0, %v1649_v58  ;;  %v8374_v13 = vcombine.low %v1625_v0, %v1649_v58 }
 0x495   : > { %6370 = vmatpush1.bf16.msra.mxu0 %v8132_v3  ;;  %6411 = vmatpush1.bf16.msra.mxu1 %v8134_v4  ;;  %v906_v3 = vld [vmem:[%s9328_s27 + $0x80] sm:$0xff] }
 0x496   : > { %6371 = vmatprep.subr.bf16.mxu0 %v8181_v7  ;;  %6412 = vmatprep.subr.bf16.mxu1 %v8183_v9  ;;  %v930_v4 = vld [vmem:[%s9328_s27 + $0x140] sm:$0xff]  ;;  %v907_v7 = vld [vmem:[%s9328_s27 + $0x88] sm:$0xff] }
 0x497   : > { %v931_v9 = vld [vmem:[%s9328_s27 + $0x148] sm:$0xff]  ;;  %v7657_v17 = vcombine.high %v906_v3, %v930_v4  ;;  %v7656_v29 = vcombine.low %v906_v3, %v930_v4 }
 0x498   : > { %v7659_v22 = vcombine.high %v907_v7, %v931_v9  ;;  %v7658_v30 = vcombine.low %v907_v7, %v931_v9 }
 0x499   : > { %6372 = vmatpush1.bf16.msra.mxu0 %v8180_v23  ;;  %6413 = vmatpush1.bf16.msra.mxu1 %v8182_v24  ;;  %v954_v23 = vld [vmem:[%s9328_s27 + $0x200] sm:$0xff] }
 0x49a   : > { %6373 = vmatprep.subr.bf16.mxu0 %v8229_v27  ;;  %6414 = vmatprep.subr.bf16.mxu1 %v8231_v28  ;;  %v978_v24 = vld [vmem:[%s9328_s27 + $0x2c0] sm:$0xff]  ;;  %v955_v27 = vld [vmem:[%s9328_s27 + $0x208] sm:$0xff] }
 0x49b   : > { %v979_v28 = vld [vmem:[%s9328_s27 + $0x2c8] sm:$0xff]  ;;  %v7705_v31 = vcombine.high %v954_v23, %v978_v24  ;;  %v7704_v36 = vcombine.low %v954_v23, %v978_v24  ;;  %v10055_v24 = vld [vmem:[%s9334_s15 + $0x10] sm:$0xff] }
 0x49c   : > { %v7707_v32 = vcombine.high %v955_v27, %v979_v28  ;;  %v7706_v37 = vcombine.low %v955_v27, %v979_v28 }
 0x49d   : > { %6374 = vmatpush1.bf16.msra.mxu0 %v8228_v33  ;;  %6415 = vmatpush1.bf16.msra.mxu1 %v8230_v34  ;;  %v1002_v33 = vld [vmem:[%s9328_s27 + $0x380] sm:$0xff] }
 0x49e   : > { %6375 = vmatprep.subr.bf16.mxu0 %v8277_v61  ;;  %6416 = vmatprep.subr.bf16.mxu1 %v8279_v35  ;;  %v1026_v34 = vld [vmem:[%s9328_s27 + $0x440] sm:$0xff]  ;;  %v1003_v61 = vld [vmem:[%s9328_s27 + $0x388] sm:$0xff] }
 0x49f   : > { %v1027_v35 = vld [vmem:[%s9328_s27 + $0x448] sm:$0xff]  ;;  %v7753_v38 = vcombine.high %v1002_v33, %v1026_v34  ;;  %v7752_v52 = vcombine.low %v1002_v33, %v1026_v34 }
 0x4a0   : > { %v7755_v40 = vcombine.high %v1003_v61, %v1027_v35  ;;  %v7754_v54 = vcombine.low %v1003_v61, %v1027_v35  ;;  %v1195_v33 = vld [vmem:[%s9328_s27 + $0x988] sm:$0xff]  ;;  %v1745_v61 = vrot.slane %v10055_v24, %v9661_v20  ;;  %v1741_v35 = vrot.slane %v10055_v24, %v9664_v21 }
 0x4a1   : > { %6376 = vmatpush1.bf16.msra.mxu0 %v8276_v41  ;;  %6417 = vmatpush1.bf16.msra.mxu1 %v8278_v42  ;;  %v1050_v41 = vld [vmem:[%s9328_s27 + $0x500] sm:$0xff]  ;;  %v1219_v34 = vld [vmem:[%s9328_s27 + $0xa48] sm:$0xff] }
 0x4a2   : > { %6377 = vmatprep.subr.bf16.mxu0 %v8325_v19  ;;  %6418 = vmatprep.subr.bf16.mxu1 %v8327_v47  ;;  %v1074_v42 = vld [vmem:[%s9328_s27 + $0x5c0] sm:$0xff]  ;;  %v1051_v19 = vld [vmem:[%s9328_s27 + $0x508] sm:$0xff] }
 0x4a3   : > { %v1075_v47 = vld [vmem:[%s9328_s27 + $0x5c8] sm:$0xff]  ;;  %v7801_v0 = vcombine.high %v1050_v41, %v1074_v42  ;;  %v7800_v3 = vcombine.low %v1050_v41, %v1074_v42  ;;  %v7947_v42 = vcombine.high %v1195_v33, %v1219_v34 }
 0x4a4   : > { %v7803_v58 = vcombine.high %v1051_v19, %v1075_v47  ;;  %v7802_v4 = vcombine.low %v1051_v19, %v1075_v47  ;;  %v1242_v19 = vld [vmem:[%s9328_s27 + $0xb00] sm:$0xff] }
 0x4a5   : > { %6378 = vmatpush1.bf16.msra.mxu0 %v8324_v59  ;;  %6419 = vmatpush1.bf16.msra.mxu1 %v8326_v62  ;;  %v1098_v59 = vld [vmem:[%s9328_s27 + $0x680] sm:$0xff] }
 0x4a6   : > { %6379 = vmatprep.subr.bf16.mxu0 %v8373_v1  ;;  %6420 = vmatprep.subr.bf16.mxu1 %v8375_v2  ;;  %v1122_v62 = vld [vmem:[%s9328_s27 + $0x740] sm:$0xff]  ;;  %v1099_v1 = vld [vmem:[%s9328_s27 + $0x688] sm:$0xff] }
 0x4a7   : > { %v1123_v2 = vld [vmem:[%s9328_s27 + $0x748] sm:$0xff]  ;;  %v7849_v7 = vcombine.high %v1098_v59, %v1122_v62  ;;  %v7848_v23 = vcombine.low %v1098_v59, %v1122_v62  ;;  %v1266_v47 = vld [vmem:[%s9328_s27 + $0xbc0] sm:$0xff] }
 0x4a8   : > { %v7851_v9 = vcombine.high %v1099_v1, %v1123_v2  ;;  %v7850_v27 = vcombine.low %v1099_v1, %v1123_v2  ;;  %v1267_v59 = vld [vmem:[%s9328_s27 + $0xbc8] sm:$0xff] }
 0x4a9   : > { %6380 = vmatpush1.bf16.msra.mxu0 %v8372_v11  ;;  %6421 = vmatpush1.bf16.msra.mxu1 %v8374_v13  ;;  %v1146_v11 = vld [vmem:[%s9328_s27 + $0x800] sm:$0xff] }
 0x4aa   : > { %6431 = vmatprep.subr.bf16.mxu0 %v7657_v17  ;;  %6472 = vmatprep.subr.bf16.mxu1 %v7659_v22  ;;  %v1170_v13 = vld [vmem:[%s9328_s27 + $0x8c0] sm:$0xff]  ;;  %v1147_v17 = vld [vmem:[%s9328_s27 + $0x808] sm:$0xff] }
 0x4ab   : > { %v1171_v22 = vld [vmem:[%s9328_s27 + $0x8c8] sm:$0xff]  ;;  %v7897_v28 = vcombine.high %v1146_v11, %v1170_v13 }
 0x4ac   : > { %6382 = vmatmul.mubr.bf16.vlgmr.msra.gmra.mrb[28].mxu0 %v9426_v26  ;;  %6423 = vmatmul.mubr.bf16.vlgmr.msra.gmra.mrb[28].mxu1 %v9426_v26 }
 0x4ad   : > { %6432 = vmatpush1.bf16.msra.mxu0 %v7656_v29  ;;  %6473 = vmatpush1.bf16.msra.mxu1 %v7658_v30  ;;  %v7899_v29 = vcombine.high %v1147_v17, %v1171_v22  ;;  %v1194_v30 = vld [vmem:[%s9328_s27 + $0x980] sm:$0xff] }
 0x4ae   : > { %6433 = vmatprep.subr.bf16.mxu0 %v7705_v31  ;;  %6474 = vmatprep.subr.bf16.mxu1 %v7707_v32  ;;  %v1218_v31 = vld [vmem:[%s9328_s27 + $0xa40] sm:$0xff]  ;;  %v1737_v32 = vrot.slane %v10055_v24, %v9653_v15 }
 0x4af   : > { %6463 = vmatprep.mubr.bf16.mxu0 %v9382_v8  ;;  %6504 = vmatprep.mubr.bf16.mxu1 %v9382_v8 }
 0x4b1   : > { %6434 = vmatpush1.bf16.msra.mxu0 %v7704_v36  ;;  %6475 = vmatpush1.bf16.msra.mxu1 %v7706_v37  ;;  %v7896_v36 = vcombine.low %v1146_v11, %v1170_v13  ;;  %v1749_v37 = vrot.slane %v10055_v24, %v9667_v25  ;;  %v7946_v13 = vcombine.low %v1195_v33, %v1219_v34 }
 0x4b2   : > { %6435 = vmatprep.subr.bf16.mxu0 %v7753_v38  ;;  %6476 = vmatprep.subr.bf16.mxu1 %v7755_v40  ;;  %v7898_v38 = vcombine.low %v1147_v17, %v1171_v22  ;;  %v7945_v40 = vcombine.high %v1194_v30, %v1218_v31  ;;  %v7993_v17 = vcombine.high %v1242_v19, %v1266_v47 }
 0x4b3   : > { %v7992_v34 = vcombine.low %v1242_v19, %v1266_v47 }
 0x4b5   : > { %6436 = vmatpush1.bf16.msra.mxu0 %v7752_v52  ;;  %6477 = vmatpush1.bf16.msra.mxu1 %v7754_v54 }
 0x4b6   : > { %6437 = vmatprep.subr.bf16.mxu0 %v7801_v0  ;;  %6478 = vmatprep.subr.bf16.mxu1 %v7803_v58  ;;  %v1243_v58 = vld [vmem:[%s9328_s27 + $0xb08] sm:$0xff] }
 0x4b9   : > { %6438 = vmatpush1.bf16.msra.mxu0 %v7800_v3  ;;  %6479 = vmatpush1.bf16.msra.mxu1 %v7802_v4  ;;  %v7944_v4 = vcombine.low %v1194_v30, %v1218_v31  ;;  %v1291_v31 = vld [vmem:[%s9328_s27 + $0xc88] sm:$0xff] }
 0x4ba   : > { %6439 = vmatprep.subr.bf16.mxu0 %v7849_v7  ;;  %6480 = vmatprep.subr.bf16.mxu1 %v7851_v9 }
 0x4bd   : > { %6440 = vmatpush1.bf16.msra.mxu0 %v7848_v23  ;;  %6481 = vmatpush1.bf16.msra.mxu1 %v7850_v27  ;;  %v7995_v27 = vcombine.high %v1243_v58, %v1267_v59 }
 0x4be   : > { %6441 = vmatprep.subr.bf16.mxu0 %v7897_v28  ;;  %6482 = vmatprep.subr.bf16.mxu1 %v7899_v29  ;;  %v1290_v28 = vld [vmem:[%s9328_s27 + $0xc80] sm:$0xff] }
 0x4bf   : > { %v6137_v41 = vpop.f32.mrb[16].mxu0  ;;  %v6178_v54 = vpop.f32.mrb[16].mxu1  ;;  %v1314_v29 = vld [vmem:[%s9328_s27 + $0xd40] sm:$0xff] }
 0x4c0   : > { %v10071_v52 = vadd.f32 %v6137_v41, %v1737_v32  ;;  %v6139_v0 = vpop.f32.mrb[17].mxu0  ;;  %v10075_v62 = vadd.f32 %v6178_v54, %v1745_v61  ;;  %v6180_v2 = vpop.f32.mrb[17].mxu1  ;;  %v1315_v32 = vld [vmem:[%s9328_s27 + $0xd48] sm:$0xff] }
 0x4c1   : > { %v10077_v1 = vadd.f32 %v6139_v0, %v1741_v35  ;;  %v6141_v3 = vpop.f32.mrb[18].mxu0  ;;  %6442 = vmatpush1.bf16.msra.mxu0 %v7896_v36  ;;  %v10079_v7 = vadd.f32 %v6180_v2, %v1749_v37  ;;  %v6182_v9 = vpop.f32.mrb[18].mxu1  ;;  %6483 = vmatpush1.bf16.msra.mxu1 %v7898_v38  ;;  %v7994_v35 = vcombine.low %v1243_v58, %v1267_v59  ;;  %v1338_v38 = vld [vmem:[%s9328_s27 + $0xe00] sm:$0xff]  ;;  %v1363_v54 = vld [vmem:[%s9328_s27 + $0xec8] sm:$0xff] }
 0x4c2   : > { %v6142_v11 = vpop.f32.mrb[19].mxu0  ;;  %6443 = vmatprep.subr.bf16.mxu0 %v7945_v40  ;;  %v6183_v23 = vpop.f32.mrb[19].mxu1  ;;  %6484 = vmatprep.subr.bf16.mxu1 %v7947_v42  ;;  %v8041_v36 = vcombine.high %v1290_v28, %v1314_v29  ;;  %v8043_v37 = vcombine.high %v1291_v31, %v1315_v32  ;;  %v1362_v40 = vld [vmem:[%s9328_s27 + $0xec0] sm:$0xff]  ;;  %v1339_v42 = vld [vmem:[%s9328_s27 + $0xe08] sm:$0xff]  ;;  %v8040_v0 = vcombine.low %v1290_v28, %v1314_v29 }
 0x4c3   : > { %v6875_v22 = vcombine.low %v10071_v52, %v10077_v1  ;;  %v6876_v30 = vcombine.low %v10075_v62, %v10079_v7  ;;  %v8042_v19 = vcombine.low %v1291_v31, %v1315_v32  ;;  %v8089_v47 = vcombine.high %v1338_v38, %v1362_v40  ;;  %v1386_v59 = vld [vmem:[%s9328_s27 + $0xf80] sm:$0xff]  ;;  %v1387_v3 = vld [vmem:[%s9328_s27 + $0xf88] sm:$0xff] }
 0x4c4   : > { %v8091_v58 = vcombine.high %v1339_v42, %v1363_v54  ;;  %v1410_v2 = vld [vmem:[%s9328_s27 + $0x1040] sm:$0xff]  ;;  %v8088_v9 = vcombine.low %v1338_v38, %v1362_v40  ;;  %v8090_v11 = vcombine.low %v1339_v42, %v1363_v54  ;;  %v1459_v28 = vld [vmem:[%s9328_s27 + $0x11c8] sm:$0xff] }
 0x4c5   : > { %v6883_v33 = vrot.slane %v6875_v22, %v9692_v50  ;;  %6444 = vmatpush1.bf16.msra.mxu0 %v7944_v4  ;;  %v6890_v61 = vrot.slane %v6876_v30, %v9692_v50  ;;  %6485 = vmatpush1.bf16.msra.mxu1 %v7946_v13  ;;  %v1411_v4 = vld [vmem:[%s9328_s27 + $0x1048] sm:$0xff]  ;;  %v8137_v13 = vcombine.high %v1386_v59, %v1410_v2  ;;  %v1434_v22 = vld [vmem:[%s9328_s27 + $0x1100] sm:$0xff] }
 0x4c6   : > { %6445 = vmatprep.subr.bf16.mxu0 %v7993_v17  ;;  %6486 = vmatprep.subr.bf16.mxu1 %v7995_v27  ;;  %v8139_v17 = vcombine.high %v1387_v3, %v1411_v4  ;;  %v1458_v23 = vld [vmem:[%s9328_s27 + $0x11c0] sm:$0xff]  ;;  %v1435_v27 = vld [vmem:[%s9328_s27 + $0x1108] sm:$0xff]  ;;  %v8136_v29 = vcombine.low %v1386_v59, %v1410_v2  ;;  %v8138_v30 = vcombine.low %v1387_v3, %v1411_v4 }
 0x4c7   : > { %v6891_v41 = vcombine.low %v6883_v33, %v6890_v61  ;;  %v8185_v31 = vcombine.high %v1434_v22, %v1458_v23  ;;  %v8187_v32 = vcombine.high %v1435_v27, %v1459_v28  ;;  %v1482_v33 = vld [vmem:[%s9328_s27 + $0x1280] sm:$0xff]  ;;  %v1483_v61 = vld [vmem:[%s9328_s27 + $0x1288] sm:$0xff] }
 0x4c8   : > { %v1554_v42 = vld [vmem:[%s9328_s27 + $0x14c0] sm:$0xff]  ;;  %v1531_v54 = vld [vmem:[%s9328_s27 + $0x1408] sm:$0xff] }
 0x4c9   : > { %6446 = vmatpush1.bf16.msra.mxu0 %v7992_v34  ;;  %7030 = vst [vmem:[%s9711_s20 + $0x20] sm:$0xff] %v6891_v41  ;;  %6487 = vmatpush1.bf16.msra.mxu1 %v7994_v35  ;;  %v1506_v34 = vld [vmem:[%s9328_s27 + $0x1340] sm:$0xff]  ;;  %v1507_v35 = vld [vmem:[%s9328_s27 + $0x1348] sm:$0xff] }
 0x4ca   : > { %6447 = vmatprep.subr.bf16.mxu0 %v8041_v36  ;;  %6488 = vmatprep.subr.bf16.mxu1 %v8043_v37  ;;  %v8184_v36 = vcombine.low %v1434_v22, %v1458_v23  ;;  %v8186_v37 = vcombine.low %v1435_v27, %v1459_v28  ;;  %v8233_v38 = vcombine.high %v1482_v33, %v1506_v34  ;;  %v1530_v41 = vld [vmem:[%s9328_s27 + $0x1400] sm:$0xff]  ;;  %v1579_v4 = vld [vmem:[%s9328_s27 + $0x1588] sm:$0xff] }
 0x4cb   : > { %v8235_v40 = vcombine.high %v1483_v61, %v1507_v35  ;;  %v1578_v2 = vld [vmem:[%s9328_s27 + $0x1580] sm:$0xff]  ;;  %v1627_v28 = vld [vmem:[%s9328_s27 + $0x1708] sm:$0xff] }
 0x4cc   : > { %v1602_v3 = vld [vmem:[%s9328_s27 + $0x1640] sm:$0xff] }
 0x4cd   : > { %6448 = vmatpush1.bf16.msra.mxu0 %v8040_v0  ;;  %6489 = vmatpush1.bf16.msra.mxu1 %v8042_v19  ;;  %v1555_v0 = vld [vmem:[%s9328_s27 + $0x14c8] sm:$0xff]  ;;  %v8232_v19 = vcombine.low %v1482_v33, %v1506_v34  ;;  %v1626_v23 = vld [vmem:[%s9328_s27 + $0x1700] sm:$0xff]  ;;  %v908_v34 = vld [vmem:[%s9328_s27 + $0x90] sm:$0xff] }
 0x4ce   : > { %6449 = vmatprep.subr.bf16.mxu0 %v8089_v47  ;;  %6490 = vmatprep.subr.bf16.mxu1 %v8091_v58  ;;  %v8234_v47 = vcombine.low %v1483_v61, %v1507_v35  ;;  %v8281_v58 = vcombine.high %v1530_v41, %v1554_v42  ;;  %v8283_v59 = vcombine.high %v1531_v54, %v1555_v0  ;;  %v1650_v27 = vld [vmem:[%s9328_s27 + $0x17c0] sm:$0xff]  ;;  %v932_v61 = vld [vmem:[%s9328_s27 + $0x150] sm:$0xff]  ;;  %v909_v35 = vld [vmem:[%s9328_s27 + $0x98] sm:$0xff] }
 0x4d1   : > { %6450 = vmatpush1.bf16.msra.mxu0 %v8088_v9  ;;  %6491 = vmatpush1.bf16.msra.mxu1 %v8090_v11  ;;  %v1603_v9 = vld [vmem:[%s9328_s27 + $0x1648] sm:$0xff]  ;;  %v8280_v11 = vcombine.low %v1530_v41, %v1554_v42  ;;  %v956_v42 = vld [vmem:[%s9328_s27 + $0x210] sm:$0xff] }
 0x4d2   : > { %6451 = vmatprep.subr.bf16.mxu0 %v8137_v13  ;;  %6492 = vmatprep.subr.bf16.mxu1 %v8139_v17  ;;  %v8282_v13 = vcombine.low %v1531_v54, %v1555_v0  ;;  %v8329_v17 = vcombine.high %v1578_v2, %v1602_v3  ;;  %v8331_v22 = vcombine.high %v1579_v4, %v1603_v9  ;;  %v980_v54 = vld [vmem:[%s9328_s27 + $0x2d0] sm:$0xff]  ;;  %v957_v0 = vld [vmem:[%s9328_s27 + $0x218] sm:$0xff] }
 0x4d5   : > { %6452 = vmatpush1.bf16.msra.mxu0 %v8136_v29  ;;  %6493 = vmatpush1.bf16.msra.mxu1 %v8138_v30  ;;  %v1651_v29 = vld [vmem:[%s9328_s27 + $0x17c8] sm:$0xff]  ;;  %v8328_v30 = vcombine.low %v1578_v2, %v1602_v3  ;;  %v1004_v3 = vld [vmem:[%s9328_s27 + $0x390] sm:$0xff] }
 0x4d6   : > { %6453 = vmatprep.subr.bf16.mxu0 %v8185_v31  ;;  %6494 = vmatprep.subr.bf16.mxu1 %v8187_v32  ;;  %v8330_v31 = vcombine.low %v1579_v4, %v1603_v9  ;;  %v8377_v32 = vcombine.high %v1626_v23, %v1650_v27  ;;  %v8379_v33 = vcombine.high %v1627_v28, %v1651_v29  ;;  %v1028_v4 = vld [vmem:[%s9328_s27 + $0x450] sm:$0xff]  ;;  %v1005_v9 = vld [vmem:[%s9328_s27 + $0x398] sm:$0xff] }
 0x4d9   : > { %6454 = vmatpush1.bf16.msra.mxu0 %v8184_v36  ;;  %6495 = vmatpush1.bf16.msra.mxu1 %v8186_v37  ;;  %v933_v36 = vld [vmem:[%s9328_s27 + $0x158] sm:$0xff]  ;;  %v8376_v37 = vcombine.low %v1626_v23, %v1650_v27  ;;  %v1052_v27 = vld [vmem:[%s9328_s27 + $0x510] sm:$0xff] }
 0x4da   : > { %6455 = vmatprep.subr.bf16.mxu0 %v8233_v38  ;;  %6496 = vmatprep.subr.bf16.mxu1 %v8235_v40  ;;  %v8378_v38 = vcombine.low %v1627_v28, %v1651_v29  ;;  %v7661_v40 = vcombine.high %v908_v34, %v932_v61  ;;  %v7663_v41 = vcombine.high %v909_v35, %v933_v36  ;;  %v1076_v28 = vld [vmem:[%s9328_s27 + $0x5d0] sm:$0xff]  ;;  %v1053_v29 = vld [vmem:[%s9328_s27 + $0x518] sm:$0xff] }
 0x4dd   : > { %6456 = vmatpush1.bf16.msra.mxu0 %v8232_v19  ;;  %6497 = vmatpush1.bf16.msra.mxu1 %v8234_v47  ;;  %v981_v19 = vld [vmem:[%s9328_s27 + $0x2d8] sm:$0xff]  ;;  %v7660_v47 = vcombine.low %v908_v34, %v932_v61  ;;  %v1100_v61 = vld [vmem:[%s9328_s27 + $0x690] sm:$0xff] }
 0x4de   : > { %6457 = vmatprep.subr.bf16.mxu0 %v8281_v58  ;;  %6498 = vmatprep.subr.bf16.mxu1 %v8283_v59  ;;  %v7662_v58 = vcombine.low %v909_v35, %v933_v36  ;;  %v7709_v59 = vcombine.high %v956_v42, %v980_v54  ;;  %v7711_v2 = vcombine.high %v957_v0, %v981_v19  ;;  %v1124_v35 = vld [vmem:[%s9328_s27 + $0x750] sm:$0xff]  ;;  %v1101_v36 = vld [vmem:[%s9328_s27 + $0x698] sm:$0xff] }
 0x4e1   : > { %6458 = vmatpush1.bf16.msra.mxu0 %v8280_v11  ;;  %6499 = vmatpush1.bf16.msra.mxu1 %v8282_v13  ;;  %v1029_v11 = vld [vmem:[%s9328_s27 + $0x458] sm:$0xff]  ;;  %v7708_v13 = vcombine.low %v956_v42, %v980_v54  ;;  %v1148_v54 = vld [vmem:[%s9328_s27 + $0x810] sm:$0xff] }
 0x4e2   : > { %6459 = vmatprep.subr.bf16.mxu0 %v8329_v17  ;;  %6500 = vmatprep.subr.bf16.mxu1 %v8331_v22  ;;  %v7710_v17 = vcombine.low %v957_v0, %v981_v19  ;;  %v7757_v22 = vcombine.high %v1004_v3, %v1028_v4  ;;  %v7759_v23 = vcombine.high %v1005_v9, %v1029_v11  ;;  %v1172_v0 = vld [vmem:[%s9328_s27 + $0x8d0] sm:$0xff]  ;;  %v1149_v19 = vld [vmem:[%s9328_s27 + $0x818] sm:$0xff] }
 0x4e5   : > { %6460 = vmatpush1.bf16.msra.mxu0 %v8328_v30  ;;  %6501 = vmatpush1.bf16.msra.mxu1 %v8330_v31  ;;  %v1077_v30 = vld [vmem:[%s9328_s27 + $0x5d8] sm:$0xff]  ;;  %v7756_v31 = vcombine.low %v1004_v3, %v1028_v4  ;;  %v1196_v4 = vld [vmem:[%s9328_s27 + $0x990] sm:$0xff] }
 0x4e6   : > { %6461 = vmatprep.subr.bf16.mxu0 %v8377_v32  ;;  %6502 = vmatprep.subr.bf16.mxu1 %v8379_v33  ;;  %v7758_v32 = vcombine.low %v1005_v9, %v1029_v11  ;;  %v7805_v33 = vcombine.high %v1052_v27, %v1076_v28  ;;  %v7807_v34 = vcombine.high %v1053_v29, %v1077_v30  ;;  %v1220_v9 = vld [vmem:[%s9328_s27 + $0xa50] sm:$0xff] }
 0x4e7   : > { %v1753_v11 = vrot.slane %v10055_v24, %v9765_v10 }
 0x4e9   : > { %6462 = vmatpush1.bf16.msra.mxu0 %v8376_v37  ;;  %6503 = vmatpush1.bf16.msra.mxu1 %v8378_v38  ;;  %v1125_v37 = vld [vmem:[%s9328_s27 + $0x758] sm:$0xff]  ;;  %v7804_v38 = vcombine.low %v1052_v27, %v1076_v28  ;;  %v7900_v27 = vcombine.low %v1148_v54, %v1172_v0  ;;  %v1765_v28 = vrot.slane %v10055_v24, %v9776_v18 }
 0x4ea   : > { %6513 = vmatprep.subr.bf16.mxu0 %v7661_v40  ;;  %6554 = vmatprep.subr.bf16.mxu1 %v7663_v41  ;;  %v7806_v40 = vcombine.low %v1053_v29, %v1077_v30  ;;  %v7853_v41 = vcombine.high %v1100_v61, %v1124_v35  ;;  %v7855_v42 = vcombine.high %v1101_v36, %v1125_v37 }
 0x4eb   : > { %v7949_v30 = vcombine.high %v1196_v4, %v1220_v9 }
 0x4ec   : > { %6464 = vmatmul.mubr.bf16.vlgmr.msra.gmra.mrb[32].mxu0 %v9426_v26  ;;  %6505 = vmatmul.mubr.bf16.vlgmr.msra.gmra.mrb[32].mxu1 %v9426_v26 }
 0x4ed   : > { %6514 = vmatpush1.bf16.msra.mxu0 %v7660_v47  ;;  %6555 = vmatpush1.bf16.msra.mxu1 %v7662_v58  ;;  %v1173_v47 = vld [vmem:[%s9328_s27 + $0x8d8] sm:$0xff]  ;;  %v7852_v58 = vcombine.low %v1100_v61, %v1124_v35 }
 0x4ee   : > { %6515 = vmatprep.subr.bf16.mxu0 %v7709_v59  ;;  %6556 = vmatprep.subr.bf16.mxu1 %v7711_v2  ;;  %v7854_v59 = vcombine.low %v1101_v36, %v1125_v37  ;;  %v7901_v2 = vcombine.high %v1148_v54, %v1172_v0  ;;  %v7903_v3 = vcombine.high %v1149_v19, %v1173_v47  ;;  %v1245_v37 = vld [vmem:[%s9328_s27 + $0xb18] sm:$0xff] }
 0x4ef   : > { %6545 = vmatprep.mubr.bf16.mxu0 %v9382_v8  ;;  %6586 = vmatprep.mubr.bf16.mxu1 %v9382_v8  ;;  %v7902_v29 = vcombine.low %v1149_v19, %v1173_v47  ;;  %v7948_v54 = vcombine.low %v1196_v4, %v1220_v9  ;;  %v1293_v9 = vld [vmem:[%s9328_s27 + $0xc98] sm:$0xff] }
 0x4f1   : > { %6516 = vmatpush1.bf16.msra.mxu0 %v7708_v13  ;;  %6557 = vmatpush1.bf16.msra.mxu1 %v7710_v17  ;;  %v1197_v13 = vld [vmem:[%s9328_s27 + $0x998] sm:$0xff] }
 0x4f2   : > { %6517 = vmatprep.subr.bf16.mxu0 %v7757_v22  ;;  %6558 = vmatprep.subr.bf16.mxu1 %v7759_v23  ;;  %v1221_v17 = vld [vmem:[%s9328_s27 + $0xa58] sm:$0xff]  ;;  %v1761_v22 = vrot.slane %v10055_v24, %v9770_v14  ;;  %v1757_v23 = vrot.slane %v10055_v24, %v9773_v16 }
 0x4f5   : > { %6518 = vmatpush1.bf16.msra.mxu0 %v7756_v31  ;;  %6559 = vmatpush1.bf16.msra.mxu1 %v7758_v32  ;;  %v7951_v32 = vcombine.high %v1197_v13, %v1221_v17 }
 0x4f6   : > { %6519 = vmatprep.subr.bf16.mxu0 %v7805_v33  ;;  %6560 = vmatprep.subr.bf16.mxu1 %v7807_v34  ;;  %v1244_v33 = vld [vmem:[%s9328_s27 + $0xb10] sm:$0xff] }
 0x4f7   : > { %v1268_v34 = vld [vmem:[%s9328_s27 + $0xbd0] sm:$0xff] }
 0x4f9   : > { %6520 = vmatpush1.bf16.msra.mxu0 %v7804_v38  ;;  %6561 = vmatpush1.bf16.msra.mxu1 %v7806_v40  ;;  %v1269_v38 = vld [vmem:[%s9328_s27 + $0xbd8] sm:$0xff] }
 0x4fa   : > { %6521 = vmatprep.subr.bf16.mxu0 %v7853_v41  ;;  %6562 = vmatprep.subr.bf16.mxu1 %v7855_v42 }
 0x4fd   : > { %6522 = vmatpush1.bf16.msra.mxu0 %v7852_v58  ;;  %6563 = vmatpush1.bf16.msra.mxu1 %v7854_v59  ;;  %v7950_v58 = vcombine.low %v1197_v13, %v1221_v17  ;;  %v7997_v59 = vcombine.high %v1244_v33, %v1268_v34  ;;  %v7996_v17 = vcombine.low %v1244_v33, %v1268_v34 }
 0x4fe   : > { %6523 = vmatprep.subr.bf16.mxu0 %v7901_v2  ;;  %6564 = vmatprep.subr.bf16.mxu1 %v7903_v3 }
 0x4ff   : > { %v6219_v31 = vpop.f32.mrb[20].mxu0  ;;  %v6260_v35 = vpop.f32.mrb[20].mxu1 }
 0x500   : > { %v10162_v61 = vadd.f32 %v6219_v31, %v1753_v11  ;;  %v6221_v36 = vpop.f32.mrb[21].mxu0  ;;  %v10166_v40 = vadd.f32 %v6260_v35, %v1761_v22  ;;  %v6262_v24 = vpop.f32.mrb[21].mxu1  ;;  %v7999_v11 = vcombine.high %v1245_v37, %v1269_v38  ;;  %v1292_v22 = vld [vmem:[%s9328_s27 + $0xc90] sm:$0xff] }
 0x501   : > { %v10168_v41 = vadd.f32 %v6221_v36, %v1757_v23  ;;  %v6223_v42 = vpop.f32.mrb[22].mxu0  ;;  %6524 = vmatpush1.bf16.msra.mxu0 %v7900_v27  ;;  %v10170_v0 = vadd.f32 %v6262_v24, %v1765_v28  ;;  %v6264_v19 = vpop.f32.mrb[22].mxu1  ;;  %6565 = vmatpush1.bf16.msra.mxu1 %v7902_v29  ;;  %v1316_v23 = vld [vmem:[%s9328_s27 + $0xd50] sm:$0xff]  ;;  %v1317_v27 = vld [vmem:[%s9328_s27 + $0xd58] sm:$0xff]  ;;  %v7998_v29 = vcombine.low %v1245_v37, %v1269_v38 }
 0x502   : > { %v6224_v47 = vpop.f32.mrb[23].mxu0  ;;  %6525 = vmatprep.subr.bf16.mxu0 %v7949_v30  ;;  %v6265_v3 = vpop.f32.mrb[23].mxu1  ;;  %6566 = vmatprep.subr.bf16.mxu1 %v7951_v32  ;;  %v8045_v30 = vcombine.high %v1292_v22, %v1316_v23  ;;  %v8047_v31 = vcombine.high %v1293_v9, %v1317_v27  ;;  %v1340_v32 = vld [vmem:[%s9328_s27 + $0xe10] sm:$0xff]  ;;  %v1341_v24 = vld [vmem:[%s9328_s27 + $0xe18] sm:$0xff]  ;;  %v8046_v33 = vcombine.low %v1293_v9, %v1317_v27 }
 0x503   : > { %v6892_v2 = vcombine.low %v10162_v61, %v10168_v41  ;;  %v6893_v4 = vcombine.low %v10166_v40, %v10170_v0  ;;  %v1364_v35 = vld [vmem:[%s9328_s27 + $0xed0] sm:$0xff]  ;;  %v1365_v42 = vld [vmem:[%s9328_s27 + $0xed8] sm:$0xff] }
 0x504   : > { %v8093_v34 = vcombine.high %v1340_v32, %v1364_v35  ;;  %v8095_v37 = vcombine.high %v1341_v24, %v1365_v42  ;;  %v1388_v38 = vld [vmem:[%s9328_s27 + $0xf90] sm:$0xff]  ;;  %v1389_v47 = vld [vmem:[%s9328_s27 + $0xf98] sm:$0xff] }
 0x505   : > { %v6900_v13 = vrot.slane %v6892_v2, %v9692_v50  ;;  %6526 = vmatpush1.bf16.msra.mxu0 %v7948_v54  ;;  %v6907_v28 = vrot.slane %v6893_v4, %v9692_v50  ;;  %6567 = vmatpush1.bf16.msra.mxu1 %v7950_v58  ;;  %v8044_v54 = vcombine.low %v1292_v22, %v1316_v23  ;;  %v1412_v19 = vld [vmem:[%s9328_s27 + $0x1050] sm:$0xff]  ;;  %v1413_v58 = vld [vmem:[%s9328_s27 + $0x1058] sm:$0xff] }
 0x506   : > { %6527 = vmatprep.subr.bf16.mxu0 %v7997_v59  ;;  %6568 = vmatprep.subr.bf16.mxu1 %v7999_v11  ;;  %v8092_v59 = vcombine.low %v1340_v32, %v1364_v35  ;;  %v8094_v2 = vcombine.low %v1341_v24, %v1365_v42  ;;  %v8141_v3 = vcombine.high %v1388_v38, %v1412_v19  ;;  %v1436_v22 = vld [vmem:[%s9328_s27 + $0x1110] sm:$0xff]  ;;  %v1437_v4 = vld [vmem:[%s9328_s27 + $0x1118] sm:$0xff] }
 0x507   : > { %v6908_v36 = vcombine.low %v6900_v13, %v6907_v28  ;;  %v8143_v11 = vcombine.high %v1389_v47, %v1413_v58  ;;  %v1460_v23 = vld [vmem:[%s9328_s27 + $0x11d0] sm:$0xff]  ;;  %v1461_v9 = vld [vmem:[%s9328_s27 + $0x11d8] sm:$0xff]  ;;  %v8140_v27 = vcombine.low %v1388_v38, %v1412_v19  ;;  %v8142_v13 = vcombine.low %v1389_v47, %v1413_v58 }
 0x508   : > { %v8191_v28 = vcombine.high %v1437_v4, %v1461_v9  ;;  %v1509_v32 = vld [vmem:[%s9328_s27 + $0x1358] sm:$0xff]  ;;  %v8188_v35 = vcombine.low %v1436_v22, %v1460_v23 }
 0x509   : > { %6528 = vmatpush1.bf16.msra.mxu0 %v7996_v17  ;;  %7031 = vst [vmem:[%s9711_s20 + $0x28] sm:$0xff] %v6908_v36  ;;  %6569 = vmatpush1.bf16.msra.mxu1 %v7998_v29  ;;  %v8189_v17 = vcombine.high %v1436_v22, %v1460_v23  ;;  %v1484_v29 = vld [vmem:[%s9328_s27 + $0x1290] sm:$0xff]  ;;  %v8190_v36 = vcombine.low %v1437_v4, %v1461_v9 }
 0x50a   : > { %6529 = vmatprep.subr.bf16.mxu0 %v8045_v30  ;;  %6570 = vmatprep.subr.bf16.mxu1 %v8047_v31  ;;  %v1508_v30 = vld [vmem:[%s9328_s27 + $0x1350] sm:$0xff]  ;;  %v1485_v31 = vld [vmem:[%s9328_s27 + $0x1298] sm:$0xff] }
 0x50b   : > { %v8237_v24 = vcombine.high %v1484_v29, %v1508_v30  ;;  %v8239_v42 = vcombine.high %v1485_v31, %v1509_v32  ;;  %v8236_v38 = vcombine.low %v1484_v29, %v1508_v30  ;;  %v8238_v19 = vcombine.low %v1485_v31, %v1509_v32 }
 0x50d   : > { %6530 = vmatpush1.bf16.msra.mxu0 %v8044_v54  ;;  %6571 = vmatpush1.bf16.msra.mxu1 %v8046_v33  ;;  %v1532_v54 = vld [vmem:[%s9328_s27 + $0x1410] sm:$0xff] }
 0x50e   : > { %6531 = vmatprep.subr.bf16.mxu0 %v8093_v34  ;;  %6572 = vmatprep.subr.bf16.mxu1 %v8095_v37  ;;  %v1556_v33 = vld [vmem:[%s9328_s27 + $0x14d0] sm:$0xff]  ;;  %v1533_v34 = vld [vmem:[%s9328_s27 + $0x1418] sm:$0xff] }
 0x50f   : > { %v1557_v37 = vld [vmem:[%s9328_s27 + $0x14d8] sm:$0xff]  ;;  %v8285_v47 = vcombine.high %v1532_v54, %v1556_v33  ;;  %v8284_v22 = vcombine.low %v1532_v54, %v1556_v33 }
 0x510   : > { %v8287_v58 = vcombine.high %v1533_v34, %v1557_v37  ;;  %v8286_v23 = vcombine.low %v1533_v34, %v1557_v37 }
 0x511   : > { %6532 = vmatpush1.bf16.msra.mxu0 %v8092_v59  ;;  %6573 = vmatpush1.bf16.msra.mxu1 %v8094_v2  ;;  %v1580_v59 = vld [vmem:[%s9328_s27 + $0x1590] sm:$0xff] }
 0x512   : > { %6533 = vmatprep.subr.bf16.mxu0 %v8141_v3  ;;  %6574 = vmatprep.subr.bf16.mxu1 %v8143_v11  ;;  %v1604_v2 = vld [vmem:[%s9328_s27 + $0x1650] sm:$0xff]  ;;  %v1581_v3 = vld [vmem:[%s9328_s27 + $0x1598] sm:$0xff] }
 0x513   : > { %v1605_v11 = vld [vmem:[%s9328_s27 + $0x1658] sm:$0xff]  ;;  %v8333_v4 = vcombine.high %v1580_v59, %v1604_v2  ;;  %v8332_v29 = vcombine.low %v1580_v59, %v1604_v2 }
 0x514   : > { %v8335_v9 = vcombine.high %v1581_v3, %v1605_v11  ;;  %v8334_v30 = vcombine.low %v1581_v3, %v1605_v11 }
 0x515   : > { %6534 = vmatpush1.bf16.msra.mxu0 %v8140_v27  ;;  %6575 = vmatpush1.bf16.msra.mxu1 %v8142_v13  ;;  %v1628_v27 = vld [vmem:[%s9328_s27 + $0x1710] sm:$0xff] }
 0x516   : > { %6535 = vmatprep.subr.bf16.mxu0 %v8189_v17  ;;  %6576 = vmatprep.subr.bf16.mxu1 %v8191_v28  ;;  %v1652_v13 = vld [vmem:[%s9328_s27 + $0x17d0] sm:$0xff]  ;;  %v1629_v17 = vld [vmem:[%s9328_s27 + $0x1718] sm:$0xff] }
 0x517   : > { %v1653_v28 = vld [vmem:[%s9328_s27 + $0x17d8] sm:$0xff]  ;;  %v8381_v31 = vcombine.high %v1628_v27, %v1652_v13  ;;  %v8380_v54 = vcombine.low %v1628_v27, %v1652_v13 }
 0x518   : > { %v8383_v32 = vcombine.high %v1629_v17, %v1653_v28  ;;  %v8382_v33 = vcombine.low %v1629_v17, %v1653_v28 }
 0x519   : > { %6536 = vmatpush1.bf16.msra.mxu0 %v8188_v35  ;;  %6577 = vmatpush1.bf16.msra.mxu1 %v8190_v36  ;;  %v910_v35 = vld [vmem:[%s9328_s27 + $0xa0] sm:$0xff] }
 0x51a   : > { %6537 = vmatprep.subr.bf16.mxu0 %v8237_v24  ;;  %6578 = vmatprep.subr.bf16.mxu1 %v8239_v42  ;;  %v934_v36 = vld [vmem:[%s9328_s27 + $0x160] sm:$0xff]  ;;  %v911_v24 = vld [vmem:[%s9328_s27 + $0xa8] sm:$0xff] }
 0x51b   : > { %v935_v42 = vld [vmem:[%s9328_s27 + $0x168] sm:$0xff]  ;;  %v7665_v34 = vcombine.high %v910_v35, %v934_v36  ;;  %v7664_v59 = vcombine.low %v910_v35, %v934_v36 }
 0x51c   : > { %v7667_v37 = vcombine.high %v911_v24, %v935_v42  ;;  %v7666_v2 = vcombine.low %v911_v24, %v935_v42 }
 0x51d   : > { %6538 = vmatpush1.bf16.msra.mxu0 %v8236_v38  ;;  %6579 = vmatpush1.bf16.msra.mxu1 %v8238_v19  ;;  %v958_v38 = vld [vmem:[%s9328_s27 + $0x220] sm:$0xff] }
 0x51e   : > { %6539 = vmatprep.subr.bf16.mxu0 %v8285_v47  ;;  %6580 = vmatprep.subr.bf16.mxu1 %v8287_v58  ;;  %v982_v19 = vld [vmem:[%s9328_s27 + $0x2e0] sm:$0xff]  ;;  %v959_v47 = vld [vmem:[%s9328_s27 + $0x228] sm:$0xff] }
 0x51f   : > { %v983_v58 = vld [vmem:[%s9328_s27 + $0x2e8] sm:$0xff]  ;;  %v7713_v3 = vcombine.high %v958_v38, %v982_v19  ;;  %v7712_v27 = vcombine.low %v958_v38, %v982_v19 }
 0x520   : > { %v7715_v11 = vcombine.high %v959_v47, %v983_v58  ;;  %v7714_v13 = vcombine.low %v959_v47, %v983_v58 }
 0x521   : > { %6540 = vmatpush1.bf16.msra.mxu0 %v8284_v22  ;;  %6581 = vmatpush1.bf16.msra.mxu1 %v8286_v23  ;;  %v1006_v22 = vld [vmem:[%s9328_s27 + $0x3a0] sm:$0xff] }
 0x522   : > { %6541 = vmatprep.subr.bf16.mxu0 %v8333_v4  ;;  %6582 = vmatprep.subr.bf16.mxu1 %v8335_v9  ;;  %v1030_v23 = vld [vmem:[%s9328_s27 + $0x460] sm:$0xff]  ;;  %v1007_v4 = vld [vmem:[%s9328_s27 + $0x3a8] sm:$0xff] }
 0x523   : > { %v1031_v9 = vld [vmem:[%s9328_s27 + $0x468] sm:$0xff]  ;;  %v7761_v17 = vcombine.high %v1006_v22, %v1030_v23  ;;  %v7760_v35 = vcombine.low %v1006_v22, %v1030_v23 }
 0x524   : > { %v7763_v28 = vcombine.high %v1007_v4, %v1031_v9  ;;  %v7762_v36 = vcombine.low %v1007_v4, %v1031_v9  ;;  %v10240_v23 = vld [vmem:[%s9334_s15 + $0x18] sm:$0xff] }
 0x525   : > { %6542 = vmatpush1.bf16.msra.mxu0 %v8332_v29  ;;  %6583 = vmatpush1.bf16.msra.mxu1 %v8334_v30  ;;  %v1054_v29 = vld [vmem:[%s9328_s27 + $0x520] sm:$0xff] }
 0x526   : > { %6543 = vmatprep.subr.bf16.mxu0 %v8381_v31  ;;  %6584 = vmatprep.subr.bf16.mxu1 %v8383_v32  ;;  %v1078_v30 = vld [vmem:[%s9328_s27 + $0x5e0] sm:$0xff]  ;;  %v1055_v31 = vld [vmem:[%s9328_s27 + $0x528] sm:$0xff] }
 0x527   : > { %v1079_v32 = vld [vmem:[%s9328_s27 + $0x5e8] sm:$0xff]  ;;  %v7809_v24 = vcombine.high %v1054_v29, %v1078_v30  ;;  %v7808_v38 = vcombine.low %v1054_v29, %v1078_v30 }
 0x528   : > { %v7811_v42 = vcombine.high %v1055_v31, %v1079_v32  ;;  %v7810_v19 = vcombine.low %v1055_v31, %v1079_v32  ;;  %v1199_v29 = vld [vmem:[%s9328_s27 + $0x9a8] sm:$0xff]  ;;  %v1777_v31 = vrot.slane %v10240_v23, %v9661_v20  ;;  %v1773_v32 = vrot.slane %v10240_v23, %v9664_v21 }
 0x529   : > { %6544 = vmatpush1.bf16.msra.mxu0 %v8380_v54  ;;  %6585 = vmatpush1.bf16.msra.mxu1 %v8382_v33  ;;  %v1102_v54 = vld [vmem:[%s9328_s27 + $0x6a0] sm:$0xff]  ;;  %v1223_v30 = vld [vmem:[%s9328_s27 + $0xa68] sm:$0xff] }
 0x52a   : > { %6595 = vmatprep.subr.bf16.mxu0 %v7665_v34  ;;  %6636 = vmatprep.subr.bf16.mxu1 %v7667_v37  ;;  %v1126_v33 = vld [vmem:[%s9328_s27 + $0x760] sm:$0xff]  ;;  %v1103_v34 = vld [vmem:[%s9328_s27 + $0x6a8] sm:$0xff] }
 0x52b   : > { %v1127_v37 = vld [vmem:[%s9328_s27 + $0x768] sm:$0xff]  ;;  %v7857_v47 = vcombine.high %v1102_v54, %v1126_v33  ;;  %v7856_v22 = vcombine.low %v1102_v54, %v1126_v33  ;;  %v7955_v33 = vcombine.high %v1199_v29, %v1223_v30 }
 0x52c   : > { %6546 = vmatmul.mubr.bf16.vlgmr.msra.gmra.mrb[36].mxu0 %v9426_v26  ;;  %6587 = vmatmul.mubr.bf16.vlgmr.msra.gmra.mrb[36].mxu1 %v9426_v26  ;;  %v7859_v58 = vcombine.high %v1103_v34, %v1127_v37  ;;  %v7858_v4 = vcombine.low %v1103_v34, %v1127_v37  ;;  %v1246_v34 = vld [vmem:[%s9328_s27 + $0xb20] sm:$0xff] }
 0x52d   : > { %6596 = vmatpush1.bf16.msra.mxu0 %v7664_v59  ;;  %6637 = vmatpush1.bf16.msra.mxu1 %v7666_v2  ;;  %v1150_v59 = vld [vmem:[%s9328_s27 + $0x820] sm:$0xff] }
 0x52e   : > { %6597 = vmatprep.subr.bf16.mxu0 %v7713_v3  ;;  %6638 = vmatprep.subr.bf16.mxu1 %v7715_v11  ;;  %v1174_v2 = vld [vmem:[%s9328_s27 + $0x8e0] sm:$0xff]  ;;  %v1151_v3 = vld [vmem:[%s9328_s27 + $0x828] sm:$0xff] }
 0x52f   : > { %6627 = vmatprep.mubr.bf16.mxu0 %v9382_v8  ;;  %6668 = vmatprep.mubr.bf16.mxu1 %v9382_v8  ;;  %v1175_v11 = vld [vmem:[%s9328_s27 + $0x8e8] sm:$0xff]  ;;  %v7905_v9 = vcombine.high %v1150_v59, %v1174_v2  ;;  %v1270_v37 = vld [vmem:[%s9328_s27 + $0xbe0] sm:$0xff] }
 0x531   : > { %6598 = vmatpush1.bf16.msra.mxu0 %v7712_v27  ;;  %6639 = vmatpush1.bf16.msra.mxu1 %v7714_v13  ;;  %v7907_v27 = vcombine.high %v1151_v3, %v1175_v11  ;;  %v1198_v13 = vld [vmem:[%s9328_s27 + $0x9a0] sm:$0xff] }
 0x532   : > { %6599 = vmatprep.subr.bf16.mxu0 %v7761_v17  ;;  %6640 = vmatprep.subr.bf16.mxu1 %v7763_v28  ;;  %v1222_v17 = vld [vmem:[%s9328_s27 + $0xa60] sm:$0xff]  ;;  %v1769_v28 = vrot.slane %v10240_v23, %v9653_v15 }
 0x535   : > { %6600 = vmatpush1.bf16.msra.mxu0 %v7760_v35  ;;  %6641 = vmatpush1.bf16.msra.mxu1 %v7762_v36  ;;  %v7904_v35 = vcombine.low %v1150_v59, %v1174_v2  ;;  %v1781_v36 = vrot.slane %v10240_v23, %v9667_v25 }
 0x536   : > { %6601 = vmatprep.subr.bf16.mxu0 %v7809_v24  ;;  %6642 = vmatprep.subr.bf16.mxu1 %v7811_v42  ;;  %v7906_v24 = vcombine.low %v1151_v3, %v1175_v11  ;;  %v7953_v42 = vcombine.high %v1198_v13, %v1222_v17  ;;  %v7952_v11 = vcombine.low %v1198_v13, %v1222_v17  ;;  %v1295_v17 = vld [vmem:[%s9328_s27 + $0xca8] sm:$0xff] }
 0x539   : > { %6602 = vmatpush1.bf16.msra.mxu0 %v7808_v38  ;;  %6643 = vmatpush1.bf16.msra.mxu1 %v7810_v19 }
 0x53a   : > { %6603 = vmatprep.subr.bf16.mxu0 %v7857_v47  ;;  %6644 = vmatprep.subr.bf16.mxu1 %v7859_v58  ;;  %v1247_v58 = vld [vmem:[%s9328_s27 + $0xb28] sm:$0xff] }
 0x53d   : > { %6604 = vmatpush1.bf16.msra.mxu0 %v7856_v22  ;;  %6645 = vmatpush1.bf16.msra.mxu1 %v7858_v4  ;;  %v1271_v22 = vld [vmem:[%s9328_s27 + $0xbe8] sm:$0xff] }
 0x53e   : > { %6605 = vmatprep.subr.bf16.mxu0 %v7905_v9  ;;  %6646 = vmatprep.subr.bf16.mxu1 %v7907_v27 }
 0x53f   : > { %v6301_v54 = vpop.f32.mrb[24].mxu0  ;;  %v6342_v19 = vpop.f32.mrb[24].mxu1 }
 0x540   : > { %v10256_v38 = vadd.f32 %v6301_v54, %v1769_v28  ;;  %v6303_v47 = vpop.f32.mrb[25].mxu0  ;;  %v10260_v51 = vadd.f32 %v6342_v19, %v1777_v31  ;;  %v6344_v2 = vpop.f32.mrb[25].mxu1  ;;  %v7954_v28 = vcombine.low %v1199_v29, %v1223_v30  ;;  %v8001_v54 = vcombine.high %v1246_v34, %v1270_v37 }
 0x541   : > { %v10262_v59 = vadd.f32 %v6303_v47, %v1773_v32  ;;  %v6305_v3 = vpop.f32.mrb[26].mxu0  ;;  %6606 = vmatpush1.bf16.msra.mxu0 %v7904_v35  ;;  %v10264_v4 = vadd.f32 %v6344_v2, %v1781_v36  ;;  %v6346_v9 = vpop.f32.mrb[26].mxu1  ;;  %6647 = vmatpush1.bf16.msra.mxu1 %v7906_v24  ;;  %v8003_v19 = vcombine.high %v1247_v58, %v1271_v22  ;;  %v1294_v47 = vld [vmem:[%s9328_s27 + $0xca0] sm:$0xff]  ;;  %v1319_v36 = vld [vmem:[%s9328_s27 + $0xd68] sm:$0xff] }
 0x542   : > { %10922 = vst [vmem:[#allocation23_spill] sm:$0xff] %v10260_v51  ;;  %v6306_v27 = vpop.f32.mrb[27].mxu0  ;;  %6607 = vmatprep.subr.bf16.mxu0 %v7953_v42  ;;  %v6347_v32 = vpop.f32.mrb[27].mxu1  ;;  %6648 = vmatprep.subr.bf16.mxu1 %v7955_v33  ;;  %v1318_v35 = vld [vmem:[%s9328_s27 + $0xd60] sm:$0xff]  ;;  %v8000_v30 = vcombine.low %v1246_v34, %v1270_v37  ;;  %v8002_v42 = vcombine.low %v1247_v58, %v1271_v22 }
 0x543   : > { %10923 = vst [vmem:[#allocation24_spill] sm:$0xff] %v10262_v59  ;;  %10924 = vst [vmem:[#allocation25_spill] sm:$0xff] %v10264_v4  ;;  %v6909_v31 = vcombine.low %v10256_v38, %v10262_v59  ;;  %v6910_v13 = vcombine.low %v10260_v51, %v10264_v4  ;;  %v8049_v33 = vcombine.high %v1294_v47, %v1318_v35  ;;  %v1342_v3 = vld [vmem:[%s9328_s27 + $0xe20] sm:$0xff]  ;;  %v1343_v32 = vld [vmem:[%s9328_s27 + $0xe28] sm:$0xff] }
 0x544   : > { %v8051_v2 = vcombine.high %v1295_v17, %v1319_v36  ;;  %v1366_v9 = vld [vmem:[%s9328_s27 + $0xee0] sm:$0xff]  ;;  %v8050_v34 = vcombine.low %v1295_v17, %v1319_v36  ;;  %v1249_v4 = vld [vmem:[%s9328_s27 + $0xb38] sm:$0xff] }
 0x545   : > { %v6917_v29 = vrot.slane %v6909_v31, %v9692_v50  ;;  %6608 = vmatpush1.bf16.msra.mxu0 %v7952_v11  ;;  %v6924_v24 = vrot.slane %v6910_v13, %v9692_v50  ;;  %6649 = vmatpush1.bf16.msra.mxu1 %v7954_v28  ;;  %v1367_v31 = vld [vmem:[%s9328_s27 + $0xee8] sm:$0xff]  ;;  %v8048_v11 = vcombine.low %v1294_v47, %v1318_v35  ;;  %v1390_v22 = vld [vmem:[%s9328_s27 + $0xfa0] sm:$0xff]  ;;  %v1273_v59 = vld [vmem:[%s9328_s27 + $0xbf8] sm:$0xff] }
 0x546   : > { %6609 = vmatprep.subr.bf16.mxu0 %v8001_v54  ;;  %6650 = vmatprep.subr.bf16.mxu1 %v8003_v19  ;;  %v8097_v37 = vcombine.high %v1342_v3, %v1366_v9  ;;  %v8099_v58 = vcombine.high %v1343_v32, %v1367_v31  ;;  %v1414_v28 = vld [vmem:[%s9328_s27 + $0x1060] sm:$0xff]  ;;  %v1391_v54 = vld [vmem:[%s9328_s27 + $0xfa8] sm:$0xff]  ;;  %v8096_v13 = vcombine.low %v1342_v3, %v1366_v9 }
 0x547   : > { %v6925_v27 = vcombine.low %v6917_v29, %v6924_v24  ;;  %v1415_v19 = vld [vmem:[%s9328_s27 + $0x1068] sm:$0xff]  ;;  %v8098_v47 = vcombine.low %v1343_v32, %v1367_v31  ;;  %v8145_v35 = vcombine.high %v1390_v22, %v1414_v28  ;;  %v1438_v36 = vld [vmem:[%s9328_s27 + $0x1120] sm:$0xff] }
 0x548   : > { %v8147_v17 = vcombine.high %v1391_v54, %v1415_v19  ;;  %v1462_v29 = vld [vmem:[%s9328_s27 + $0x11e0] sm:$0xff]  ;;  %v1463_v24 = vld [vmem:[%s9328_s27 + $0x11e8] sm:$0xff] }
 0x549   : > { %6610 = vmatpush1.bf16.msra.mxu0 %v8000_v30  ;;  %7032 = vst [vmem:[%s9711_s20 + $0x30] sm:$0xff] %v6925_v27  ;;  %6651 = vmatpush1.bf16.msra.mxu1 %v8002_v42  ;;  %v1439_v30 = vld [vmem:[%s9328_s27 + $0x1128] sm:$0xff]  ;;  %v8144_v42 = vcombine.low %v1390_v22, %v1414_v28  ;;  %v1486_v9 = vld [vmem:[%s9328_s27 + $0x12a0] sm:$0xff] }
 0x54a   : > { %6611 = vmatprep.subr.bf16.mxu0 %v8049_v33  ;;  %6652 = vmatprep.subr.bf16.mxu1 %v8051_v2  ;;  %v8146_v33 = vcombine.low %v1391_v54, %v1415_v19  ;;  %v8193_v2 = vcombine.high %v1438_v36, %v1462_v29  ;;  %v8195_v3 = vcombine.high %v1439_v30, %v1463_v24  ;;  %v1510_v27 = vld [vmem:[%s9328_s27 + $0x1360] sm:$0xff]  ;;  %v1487_v32 = vld [vmem:[%s9328_s27 + $0x12a8] sm:$0xff] }
 0x54b   : > { %v1511_v31 = vld [vmem:[%s9328_s27 + $0x1368] sm:$0xff]  ;;  %v1534_v22 = vld [vmem:[%s9328_s27 + $0x1420] sm:$0xff] }
 0x54c   : > { %v1558_v28 = vld [vmem:[%s9328_s27 + $0x14e0] sm:$0xff]  ;;  %v1535_v54 = vld [vmem:[%s9328_s27 + $0x1428] sm:$0xff] }
 0x54d   : > { %6612 = vmatpush1.bf16.msra.mxu0 %v8048_v11  ;;  %6653 = vmatpush1.bf16.msra.mxu1 %v8050_v34  ;;  %v8192_v11 = vcombine.low %v1438_v36, %v1462_v29  ;;  %v8194_v34 = vcombine.low %v1439_v30, %v1463_v24  ;;  %v1559_v19 = vld [vmem:[%s9328_s27 + $0x14e8] sm:$0xff]  ;;  %v1582_v36 = vld [vmem:[%s9328_s27 + $0x15a0] sm:$0xff] }
 0x54e   : > { %6613 = vmatprep.subr.bf16.mxu0 %v8097_v37  ;;  %6654 = vmatprep.subr.bf16.mxu1 %v8099_v58  ;;  %v8241_v37 = vcombine.high %v1486_v9, %v1510_v27  ;;  %v8243_v58 = vcombine.high %v1487_v32, %v1511_v31  ;;  %v1606_v29 = vld [vmem:[%s9328_s27 + $0x1660] sm:$0xff]  ;;  %v1583_v30 = vld [vmem:[%s9328_s27 + $0x15a8] sm:$0xff] }
 0x54f   : > { %v1607_v24 = vld [vmem:[%s9328_s27 + $0x1668] sm:$0xff] }
 0x551   : > { %6614 = vmatpush1.bf16.msra.mxu0 %v8096_v13  ;;  %6655 = vmatpush1.bf16.msra.mxu1 %v8098_v47  ;;  %v8240_v13 = vcombine.low %v1486_v9, %v1510_v27  ;;  %v8242_v47 = vcombine.low %v1487_v32, %v1511_v31  ;;  %v1630_v9 = vld [vmem:[%s9328_s27 + $0x1720] sm:$0xff]  ;;  %v1631_v32 = vld [vmem:[%s9328_s27 + $0x1728] sm:$0xff] }
 0x552   : > { %6615 = vmatprep.subr.bf16.mxu0 %v8145_v35  ;;  %6656 = vmatprep.subr.bf16.mxu1 %v8147_v17  ;;  %v8289_v35 = vcombine.high %v1534_v22, %v1558_v28  ;;  %v8291_v17 = vcombine.high %v1535_v54, %v1559_v19  ;;  %v1654_v27 = vld [vmem:[%s9328_s27 + $0x17e0] sm:$0xff]  ;;  %v1655_v31 = vld [vmem:[%s9328_s27 + $0x17e8] sm:$0xff] }
 0x555   : > { %6616 = vmatpush1.bf16.msra.mxu0 %v8144_v42  ;;  %6657 = vmatpush1.bf16.msra.mxu1 %v8146_v33  ;;  %v8288_v42 = vcombine.low %v1534_v22, %v1558_v28  ;;  %v8290_v33 = vcombine.low %v1535_v54, %v1559_v19  ;;  %v912_v22 = vld [vmem:[%s9328_s27 + $0xb0] sm:$0xff]  ;;  %v913_v54 = vld [vmem:[%s9328_s27 + $0xb8] sm:$0xff] }
 0x556   : > { %6617 = vmatprep.subr.bf16.mxu0 %v8193_v2  ;;  %6658 = vmatprep.subr.bf16.mxu1 %v8195_v3  ;;  %v8337_v2 = vcombine.high %v1582_v36, %v1606_v29  ;;  %v8339_v3 = vcombine.high %v1583_v30, %v1607_v24  ;;  %v936_v28 = vld [vmem:[%s9328_s27 + $0x170] sm:$0xff]  ;;  %v937_v19 = vld [vmem:[%s9328_s27 + $0x178] sm:$0xff] }
 0x559   : > { %6618 = vmatpush1.bf16.msra.mxu0 %v8192_v11  ;;  %6659 = vmatpush1.bf16.msra.mxu1 %v8194_v34  ;;  %v8336_v11 = vcombine.low %v1582_v36, %v1606_v29  ;;  %v8338_v34 = vcombine.low %v1583_v30, %v1607_v24  ;;  %v960_v36 = vld [vmem:[%s9328_s27 + $0x230] sm:$0xff]  ;;  %v961_v30 = vld [vmem:[%s9328_s27 + $0x238] sm:$0xff] }
 0x55a   : > { %6619 = vmatprep.subr.bf16.mxu0 %v8241_v37  ;;  %6660 = vmatprep.subr.bf16.mxu1 %v8243_v58  ;;  %v8385_v37 = vcombine.high %v1630_v9, %v1654_v27  ;;  %v8387_v58 = vcombine.high %v1631_v32, %v1655_v31  ;;  %v984_v29 = vld [vmem:[%s9328_s27 + $0x2f0] sm:$0xff]  ;;  %v985_v24 = vld [vmem:[%s9328_s27 + $0x2f8] sm:$0xff] }
 0x55d   : > { %6620 = vmatpush1.bf16.msra.mxu0 %v8240_v13  ;;  %6661 = vmatpush1.bf16.msra.mxu1 %v8242_v47  ;;  %v8384_v13 = vcombine.low %v1630_v9, %v1654_v27  ;;  %v8386_v47 = vcombine.low %v1631_v32, %v1655_v31  ;;  %v1008_v9 = vld [vmem:[%s9328_s27 + $0x3b0] sm:$0xff]  ;;  %v1009_v32 = vld [vmem:[%s9328_s27 + $0x3b8] sm:$0xff] }
 0x55e   : > { %6621 = vmatprep.subr.bf16.mxu0 %v8289_v35  ;;  %6662 = vmatprep.subr.bf16.mxu1 %v8291_v17  ;;  %v7669_v35 = vcombine.high %v912_v22, %v936_v28  ;;  %v7671_v17 = vcombine.high %v913_v54, %v937_v19  ;;  %v1032_v27 = vld [vmem:[%s9328_s27 + $0x470] sm:$0xff]  ;;  %v1033_v31 = vld [vmem:[%s9328_s27 + $0x478] sm:$0xff] }
 0x561   : > { %6622 = vmatpush1.bf16.msra.mxu0 %v8288_v42  ;;  %6663 = vmatpush1.bf16.msra.mxu1 %v8290_v33  ;;  %v7668_v42 = vcombine.low %v912_v22, %v936_v28  ;;  %v7670_v33 = vcombine.low %v913_v54, %v937_v19  ;;  %v1056_v22 = vld [vmem:[%s9328_s27 + $0x530] sm:$0xff]  ;;  %v1057_v54 = vld [vmem:[%s9328_s27 + $0x538] sm:$0xff] }
 0x562   : > { %6623 = vmatprep.subr.bf16.mxu0 %v8337_v2  ;;  %6664 = vmatprep.subr.bf16.mxu1 %v8339_v3  ;;  %v7717_v2 = vcombine.high %v960_v36, %v984_v29  ;;  %v7719_v3 = vcombine.high %v961_v30, %v985_v24  ;;  %v1080_v28 = vld [vmem:[%s9328_s27 + $0x5f0] sm:$0xff]  ;;  %v1081_v19 = vld [vmem:[%s9328_s27 + $0x5f8] sm:$0xff] }
 0x565   : > { %6624 = vmatpush1.bf16.msra.mxu0 %v8336_v11  ;;  %6665 = vmatpush1.bf16.msra.mxu1 %v8338_v34  ;;  %v7716_v11 = vcombine.low %v960_v36, %v984_v29  ;;  %v7718_v34 = vcombine.low %v961_v30, %v985_v24  ;;  %v1104_v36 = vld [vmem:[%s9328_s27 + $0x6b0] sm:$0xff]  ;;  %v1105_v30 = vld [vmem:[%s9328_s27 + $0x6b8] sm:$0xff] }
 0x566   : > { %6625 = vmatprep.subr.bf16.mxu0 %v8385_v37  ;;  %6666 = vmatprep.subr.bf16.mxu1 %v8387_v58  ;;  %v7765_v37 = vcombine.high %v1008_v9, %v1032_v27  ;;  %v7767_v58 = vcombine.high %v1009_v32, %v1033_v31  ;;  %v1128_v29 = vld [vmem:[%s9328_s27 + $0x770] sm:$0xff]  ;;  %v1129_v24 = vld [vmem:[%s9328_s27 + $0x778] sm:$0xff] }
 0x569   : > { %6626 = vmatpush1.bf16.msra.mxu0 %v8384_v13  ;;  %6667 = vmatpush1.bf16.msra.mxu1 %v8386_v47  ;;  %v7764_v13 = vcombine.low %v1008_v9, %v1032_v27  ;;  %v7766_v47 = vcombine.low %v1009_v32, %v1033_v31  ;;  %v1176_v9 = vld [vmem:[%s9328_s27 + $0x8f0] sm:$0xff]  ;;  %v1153_v27 = vld [vmem:[%s9328_s27 + $0x838] sm:$0xff]  ;;  %v7860_v31 = vcombine.low %v1104_v36, %v1128_v29 }
 0x56a   : > { %6677 = vmatprep.subr.bf16.mxu0 %v7669_v35  ;;  %6718 = vmatprep.subr.bf16.mxu1 %v7671_v17  ;;  %v7813_v35 = vcombine.high %v1056_v22, %v1080_v28  ;;  %v7815_v17 = vcombine.high %v1057_v54, %v1081_v19  ;;  %v1177_v32 = vld [vmem:[%s9328_s27 + $0x8f8] sm:$0xff] }
 0x56c   : > { %6628 = vmatmul.mubr.bf16.vlgmr.msra.gmra.mrb[40].mxu0 %v9426_v26  ;;  %6669 = vmatmul.mubr.bf16.vlgmr.msra.gmra.mrb[40].mxu1 %v9426_v26 }
 0x56d   : > { %6678 = vmatpush1.bf16.msra.mxu0 %v7668_v42  ;;  %6719 = vmatpush1.bf16.msra.mxu1 %v7670_v33  ;;  %v7812_v42 = vcombine.low %v1056_v22, %v1080_v28  ;;  %v7861_v33 = vcombine.high %v1104_v36, %v1128_v29  ;;  %v1224_v22 = vld [vmem:[%s9328_s27 + $0xa70] sm:$0xff]  ;;  %v1785_v28 = vrot.slane %v10240_v23, %v9765_v10 }
 0x56e   : > { %6679 = vmatprep.subr.bf16.mxu0 %v7717_v2  ;;  %6720 = vmatprep.subr.bf16.mxu1 %v7719_v3  ;;  %v7863_v2 = vcombine.high %v1105_v30, %v1129_v24  ;;  %v1152_v3 = vld [vmem:[%s9328_s27 + $0x830] sm:$0xff]  ;;  %v7910_v36 = vcombine.low %v1153_v27, %v1177_v32 }
 0x56f   : > { %6709 = vmatprep.mubr.bf16.mxu0 %v9382_v8  ;;  %6750 = vmatprep.mubr.bf16.mxu1 %v9382_v8  ;;  %v7814_v8 = vcombine.low %v1057_v54, %v1081_v19  ;;  %v1201_v54 = vld [vmem:[%s9328_s27 + $0x9b8] sm:$0xff] }
 0x570   : > { %v1225_v19 = vld [vmem:[%s9328_s27 + $0xa78] sm:$0xff] }
 0x571   : > { %6680 = vmatpush1.bf16.msra.mxu0 %v7716_v11  ;;  %6721 = vmatpush1.bf16.msra.mxu1 %v7718_v34  ;;  %v7862_v11 = vcombine.low %v1105_v30, %v1129_v24  ;;  %v7909_v34 = vcombine.high %v1152_v3, %v1176_v9  ;;  %v7959_v24 = vcombine.high %v1201_v54, %v1225_v19 }
 0x572   : > { %6681 = vmatprep.subr.bf16.mxu0 %v7765_v37  ;;  %6722 = vmatprep.subr.bf16.mxu1 %v7767_v58  ;;  %v7911_v37 = vcombine.high %v1153_v27, %v1177_v32  ;;  %v1200_v58 = vld [vmem:[%s9328_s27 + $0x9b0] sm:$0xff] }
 0x573   : > { %v7957_v29 = vcombine.high %v1200_v58, %v1224_v22  ;;  %v7956_v27 = vcombine.low %v1200_v58, %v1224_v22  ;;  %v1297_v22 = vld [vmem:[%s9328_s27 + $0xcb8] sm:$0xff] }
 0x575   : > { %6682 = vmatpush1.bf16.msra.mxu0 %v7764_v13  ;;  %6723 = vmatpush1.bf16.msra.mxu1 %v7766_v47  ;;  %v1793_v13 = vrot.slane %v10240_v23, %v9770_v14  ;;  %v1789_v47 = vrot.slane %v10240_v23, %v9773_v16 }
 0x576   : > { %6683 = vmatprep.subr.bf16.mxu0 %v7813_v35  ;;  %6724 = vmatprep.subr.bf16.mxu1 %v7815_v17  ;;  %v7908_v35 = vcombine.low %v1152_v3, %v1176_v9  ;;  %v1797_v17 = vrot.slane %v10240_v23, %v9776_v18 }
 0x579   : > { %6684 = vmatpush1.bf16.msra.mxu0 %v7812_v42  ;;  %6725 = vmatpush1.bf16.msra.mxu1 %v7814_v8  ;;  %v1248_v42 = vld [vmem:[%s9328_s27 + $0xb30] sm:$0xff] }
 0x57a   : > { %6685 = vmatprep.subr.bf16.mxu0 %v7861_v33  ;;  %6726 = vmatprep.subr.bf16.mxu1 %v7863_v2  ;;  %v1272_v8 = vld [vmem:[%s9328_s27 + $0xbf0] sm:$0xff] }
 0x57d   : > { %6686 = vmatpush1.bf16.msra.mxu0 %v7860_v31  ;;  %6727 = vmatpush1.bf16.msra.mxu1 %v7862_v11 }
 0x57e   : > { %6687 = vmatprep.subr.bf16.mxu0 %v7909_v34  ;;  %6728 = vmatprep.subr.bf16.mxu1 %v7911_v37  ;;  %v7958_v37 = vcombine.low %v1201_v54, %v1225_v19  ;;  %v8004_v19 = vcombine.low %v1248_v42, %v1272_v8 }
 0x57f   : > { %v6383_v30 = vpop.f32.mrb[28].mxu0  ;;  %v6424_v2 = vpop.f32.mrb[28].mxu1 }
 0x580   : > { %v10347_v33 = vadd.f32 %v6383_v30, %v1785_v28  ;;  %v6385_v31 = vpop.f32.mrb[29].mxu0  ;;  %v10351_v51 = vadd.f32 %v6424_v2, %v1793_v13  ;;  %v6426_v23 = vpop.f32.mrb[29].mxu1  ;;  %v8005_v28 = vcombine.high %v1248_v42, %v1272_v8  ;;  %v8007_v30 = vcombine.high %v1249_v4, %v1273_v59  ;;  %v1296_v2 = vld [vmem:[%s9328_s27 + $0xcb0] sm:$0xff] }
 0x581   : > { %v10353_v3 = vadd.f32 %v6385_v31, %v1789_v47  ;;  %v6387_v9 = vpop.f32.mrb[30].mxu0  ;;  %6688 = vmatpush1.bf16.msra.mxu0 %v7908_v35  ;;  %v10355_v32 = vadd.f32 %v6426_v23, %v1797_v17  ;;  %v6428_v11 = vpop.f32.mrb[30].mxu1  ;;  %6729 = vmatpush1.bf16.msra.mxu1 %v7910_v36  ;;  %v1320_v35 = vld [vmem:[%s9328_s27 + $0xd70] sm:$0xff]  ;;  %v1321_v17 = vld [vmem:[%s9328_s27 + $0xd78] sm:$0xff] }
 0x582   : > { %10925 = vst [vmem:[#allocation26_spill] sm:$0xff] %v10347_v33  ;;  %v6388_v34 = vpop.f32.mrb[31].mxu0  ;;  %6689 = vmatprep.subr.bf16.mxu0 %v7957_v29  ;;  %v6429_v47 = vpop.f32.mrb[31].mxu1  ;;  %6730 = vmatprep.subr.bf16.mxu1 %v7959_v24  ;;  %v8006_v29 = vcombine.low %v1249_v4, %v1273_v59  ;;  %v8053_v24 = vcombine.high %v1296_v2, %v1320_v35  ;;  %v1344_v23 = vld [vmem:[%s9328_s27 + $0xe30] sm:$0xff] }
 0x583   : > { %v6926_v13 = vcombine.low %v10347_v33, %v10353_v3  ;;  %v6927_v58 = vcombine.low %v10351_v51, %v10355_v32  ;;  %v8055_v31 = vcombine.high %v1297_v22, %v1321_v17  ;;  %v1368_v9 = vld [vmem:[%s9328_s27 + $0xef0] sm:$0xff]  ;;  %v1345_v34 = vld [vmem:[%s9328_s27 + $0xe38] sm:$0xff]  ;;  %v8054_v42 = vcombine.low %v1297_v22, %v1321_v17 }
 0x584   : > { %v8101_v59 = vcombine.high %v1344_v23, %v1368_v9  ;;  %v1392_v8 = vld [vmem:[%s9328_s27 + $0xfb0] sm:$0xff]  ;;  %v1417_v47 = vld [vmem:[%s9328_s27 + $0x1078] sm:$0xff] }
 0x585   : > { %v6934_v54 = vrot.slane %v6926_v13, %v9692_v50  ;;  %6690 = vmatpush1.bf16.msra.mxu0 %v7956_v27  ;;  %v6941_v36 = vrot.slane %v6927_v58, %v9692_v50  ;;  %6731 = vmatpush1.bf16.msra.mxu1 %v7958_v37  ;;  %v1369_v13 = vld [vmem:[%s9328_s27 + $0xef8] sm:$0xff]  ;;  %v8052_v27 = vcombine.low %v1296_v2, %v1320_v35  ;;  %v1416_v37 = vld [vmem:[%s9328_s27 + $0x1070] sm:$0xff] }
 0x586   : > { %6691 = vmatprep.subr.bf16.mxu0 %v8005_v28  ;;  %6732 = vmatprep.subr.bf16.mxu1 %v8007_v30  ;;  %v8103_v4 = vcombine.high %v1345_v34, %v1369_v13  ;;  %v1393_v28 = vld [vmem:[%s9328_s27 + $0xfb8] sm:$0xff]  ;;  %v8100_v30 = vcombine.low %v1344_v23, %v1368_v9  ;;  %v8102_v2 = vcombine.low %v1345_v34, %v1369_v13  ;;  %v1440_v22 = vld [vmem:[%s9328_s27 + $0x1130] sm:$0xff] }
 0x587   : > { %v6942_v11 = vcombine.low %v6934_v54, %v6941_v36  ;;  %v8149_v35 = vcombine.high %v1392_v8, %v1416_v37  ;;  %v8151_v58 = vcombine.high %v1393_v28, %v1417_v47  ;;  %v1464_v17 = vld [vmem:[%s9328_s27 + $0x11f0] sm:$0xff]  ;;  %v1441_v54 = vld [vmem:[%s9328_s27 + $0x1138] sm:$0xff]  ;;  %v8148_v36 = vcombine.low %v1392_v8, %v1416_v37 }
 0x588   : > { %v1488_v23 = vld [vmem:[%s9328_s27 + $0x12b0] sm:$0xff]  ;;  %v1513_v34 = vld [vmem:[%s9328_s27 + $0x1378] sm:$0xff]  ;;  %v8196_v13 = vcombine.low %v1440_v22, %v1464_v17 }
 0x589   : > { %6692 = vmatpush1.bf16.msra.mxu0 %v8004_v19  ;;  %7033 = vst [vmem:[%s9711_s20 + $0x38] sm:$0xff] %v6942_v11  ;;  %6733 = vmatpush1.bf16.msra.mxu1 %v8006_v29  ;;  %v1465_v19 = vld [vmem:[%s9328_s27 + $0x11f8] sm:$0xff]  ;;  %v8150_v29 = vcombine.low %v1393_v28, %v1417_v47  ;;  %v1512_v9 = vld [vmem:[%s9328_s27 + $0x1370] sm:$0xff] }
 0x58a   : > { %6693 = vmatprep.subr.bf16.mxu0 %v8053_v24  ;;  %6734 = vmatprep.subr.bf16.mxu1 %v8055_v31  ;;  %v8197_v24 = vcombine.high %v1440_v22, %v1464_v17  ;;  %v8199_v31 = vcombine.high %v1441_v54, %v1465_v19  ;;  %v1489_v11 = vld [vmem:[%s9328_s27 + $0x12b8] sm:$0xff]  ;;  %v1560_v8 = vld [vmem:[%s9328_s27 + $0x14f0] sm:$0xff]  ;;  %v8244_v47 = vcombine.low %v1488_v23, %v1512_v9 }
 0x58b   : > { %v1537_v37 = vld [vmem:[%s9328_s27 + $0x1438] sm:$0xff]  ;;  %v1608_v22 = vld [vmem:[%s9328_s27 + $0x1670] sm:$0xff] }
 0x58c   : > { %v1561_v28 = vld [vmem:[%s9328_s27 + $0x14f8] sm:$0xff] }
 0x58d   : > { %6694 = vmatpush1.bf16.msra.mxu0 %v8052_v27  ;;  %6735 = vmatpush1.bf16.msra.mxu1 %v8054_v42  ;;  %v8198_v27 = vcombine.low %v1441_v54, %v1465_v19  ;;  %v8245_v42 = vcombine.high %v1488_v23, %v1512_v9  ;;  %v1585_v17 = vld [vmem:[%s9328_s27 + $0x15b8] sm:$0xff]  ;;  %v1656_v23 = vld [vmem:[%s9328_s27 + $0x17f0] sm:$0xff] }
 0x58e   : > { %6695 = vmatprep.subr.bf16.mxu0 %v8101_v59  ;;  %6736 = vmatprep.subr.bf16.mxu1 %v8103_v4  ;;  %v8247_v59 = vcombine.high %v1489_v11, %v1513_v34  ;;  %v1536_v4 = vld [vmem:[%s9328_s27 + $0x1430] sm:$0xff]  ;;  %v1609_v54 = vld [vmem:[%s9328_s27 + $0x1678] sm:$0xff] }
 0x58f   : > { %v8292_v19 = vcombine.low %v1536_v4, %v1560_v8  ;;  %v1633_v9 = vld [vmem:[%s9328_s27 + $0x1738] sm:$0xff] }
 0x591   : > { %6696 = vmatpush1.bf16.msra.mxu0 %v8100_v30  ;;  %6737 = vmatpush1.bf16.msra.mxu1 %v8102_v2  ;;  %v8246_v30 = vcombine.low %v1489_v11, %v1513_v34  ;;  %v8293_v2 = vcombine.high %v1536_v4, %v1560_v8  ;;  %v1657_v11 = vld [vmem:[%s9328_s27 + $0x17f8] sm:$0xff]  ;;  %v1662_v8 = vld [vmem:[%s9334_s15 + $0x20] sm:$0xff] }
 0x592   : > { %6697 = vmatprep.subr.bf16.mxu0 %v8149_v35  ;;  %6738 = vmatprep.subr.bf16.mxu1 %v8151_v58  ;;  %v8295_v35 = vcombine.high %v1537_v37, %v1561_v28  ;;  %v1584_v58 = vld [vmem:[%s9328_s27 + $0x15b0] sm:$0xff]  ;;  %v8390_v4 = vcombine.low %v1633_v9, %v1657_v11 }
 0x593   : > { %v8340_v34 = vcombine.low %v1584_v58, %v1608_v22 }
 0x595   : > { %6698 = vmatpush1.bf16.msra.mxu0 %v8148_v36  ;;  %6739 = vmatpush1.bf16.msra.mxu1 %v8150_v29  ;;  %v8294_v36 = vcombine.low %v1537_v37, %v1561_v28  ;;  %v8341_v29 = vcombine.high %v1584_v58, %v1608_v22  ;;  %v1801_v37 = vrot.slane %v1662_v8, %v9653_v15 }
 0x596   : > { %6699 = vmatprep.subr.bf16.mxu0 %v8197_v24  ;;  %6740 = vmatprep.subr.bf16.mxu1 %v8199_v31  ;;  %v8343_v24 = vcombine.high %v1585_v17, %v1609_v54  ;;  %v1632_v31 = vld [vmem:[%s9328_s27 + $0x1730] sm:$0xff]  ;;  %v1809_v28 = vrot.slane %v1662_v8, %v9661_v20 }
 0x599   : > { %6700 = vmatpush1.bf16.msra.mxu0 %v8196_v13  ;;  %6741 = vmatpush1.bf16.msra.mxu1 %v8198_v27  ;;  %v8342_v13 = vcombine.low %v1585_v17, %v1609_v54  ;;  %v8389_v27 = vcombine.high %v1632_v31, %v1656_v23 }
 0x59a   : > { %6701 = vmatprep.subr.bf16.mxu0 %v8245_v42  ;;  %6742 = vmatprep.subr.bf16.mxu1 %v8247_v59  ;;  %v8391_v42 = vcombine.high %v1633_v9, %v1657_v11  ;;  %v8388_v59 = vcombine.low %v1632_v31, %v1656_v23 }
 0x59d   : > { %6702 = vmatpush1.bf16.msra.mxu0 %v8244_v47  ;;  %6743 = vmatpush1.bf16.msra.mxu1 %v8246_v30  ;;  %v1805_v47 = vrot.slane %v1662_v8, %v9664_v21  ;;  %v1813_v30 = vrot.slane %v1662_v8, %v9667_v25 }
 0x59e   : > { %6703 = vmatprep.subr.bf16.mxu0 %v8293_v2  ;;  %6744 = vmatprep.subr.bf16.mxu1 %v8295_v35 }
 0x5a1   : > { %6704 = vmatpush1.bf16.msra.mxu0 %v8292_v19  ;;  %6745 = vmatpush1.bf16.msra.mxu1 %v8294_v36 }
 0x5a2   : > { %6705 = vmatprep.subr.bf16.mxu0 %v8341_v29  ;;  %6746 = vmatprep.subr.bf16.mxu1 %v8343_v24 }
 0x5a5   : > { %6706 = vmatpush1.bf16.msra.mxu0 %v8340_v34  ;;  %6747 = vmatpush1.bf16.msra.mxu1 %v8342_v13 }
 0x5a6   : > { %6707 = vmatprep.subr.bf16.mxu0 %v8389_v27  ;;  %6748 = vmatprep.subr.bf16.mxu1 %v8391_v42  ;;  %v7040_v27 = vsel %vm7039_vm2, %v9683_v43, -inf  ;;  %v7042_v42 = vsel %vm7039_vm2, %v9687_v48, -inf }
 0x5a9   : > { %6708 = vmatpush1.bf16.msra.mxu0 %v8388_v59  ;;  %6749 = vmatpush1.bf16.msra.mxu1 %v8390_v4  ;;  %v7045_v59 = vmax.f32 %v7040_v27, %v7042_v42  ;;  %v7041_v4 = vsel %vm7039_vm2, %v9689_v49, -inf }
 0x5ac   : > { %6710 = vmatmul.mubr.bf16.vlgmr.msra.gmra.mrb[44].mxu0 %v9426_v26  ;;  %6751 = vmatmul.mubr.bf16.vlgmr.msra.gmra.mrb[44].mxu1 %v9426_v26 }
 0x5bf   : > { %v6465_v2 = vpop.f32.mrb[32].mxu0  ;;  %v6506_v58 = vpop.f32.mrb[32].mxu1 }
 0x5c0   : > { %v10403_v35 = vadd.f32 %v6465_v2, %v1801_v37  ;;  %v6467_v22 = vpop.f32.mrb[33].mxu0  ;;  %v10405_v17 = vadd.f32 %v6506_v58, %v1809_v28  ;;  %v6508_v26 = vpop.f32.mrb[33].mxu1  ;;  %v7049_v37 = vmax.f32 %v7041_v4, %v7045_v59  ;;  %v7043_v28 = vsel %vm7039_vm2, %v9694_v55, -inf }
 0x5c1   : > { %v10407_v54 = vadd.f32 %v6467_v22, %v1805_v47  ;;  %v6469_v19 = vpop.f32.mrb[34].mxu0  ;;  %v10409_v36 = vadd.f32 %v6508_v26, %v1813_v30  ;;  %v6510_v29 = vpop.f32.mrb[34].mxu1  ;;  %v7044_v47 = vsel %vm7039_vm2, %v9792_v39, -inf  ;;  %v7048_v58 = vsel %vm7039_vm2, %v9796_v45, -inf }
 0x5c2   : > { %v6470_v24 = vpop.f32.mrb[35].mxu0  ;;  %v6511_v23 = vpop.f32.mrb[35].mxu1  ;;  %v7047_v30 = vmax.f32 %v7043_v28, %v7049_v37  ;;  %v1817_v26 = vrot.slane %v1662_v8, %v9765_v10  ;;  %v1825_v19 = vrot.slane %v1662_v8, %v9770_v14  ;;  %v1821_v29 = vrot.slane %v1662_v8, %v9773_v16 }
 0x5c3   : > { %v6943_v31 = vcombine.low %v10403_v35, %v10407_v54  ;;  %v6944_v9 = vcombine.low %v10405_v17, %v10409_v36  ;;  %v7046_v24 = vsel %vm7039_vm2, %v9798_v46, -inf  ;;  %v7052_v28 = vsel %vm7039_vm2, %v9886_v63, -inf }
 0x5c4   : > { %v7051_v2 = vmax.f32 %v7044_v47, %v7047_v30 }
 0x5c5   : > { %v6951_v11 = vrot.slane %v6943_v31, %v9692_v50  ;;  %v6958_v34 = vrot.slane %v6944_v9, %v9692_v50  ;;  %v1829_v31 = vrot.slane %v1662_v8, %v9776_v18 }
 0x5c6   : > { %v7053_v22 = vmax.f32 %v7048_v58, %v7051_v2 }
 0x5c7   : > { %v6959_v13 = vcombine.low %v6951_v11, %v6958_v34  ;;  %v7050_v11 = vsel %vm7039_vm2, %v9800_v53, -inf }
 0x5c8   : > { %v7057_v23 = vmax.f32 %v7046_v24, %v7053_v22  ;;  %v7056_v24 = vsel %vm7039_vm2, %v9890_v5, -inf }
 0x5c9   : > { %7034 = vst [vmem:[%s9711_s20 + $0x40] sm:$0xff] %v6959_v13 }
 0x5ca   : > { %v7055_v2 = vmax.f32 %v7050_v11, %v7057_v23  ;;  %v7054_v23 = vsel %vm7039_vm2, %v9892_v6, -inf }
 0x5ff   : > { %v6547_v9 = vpop.f32.mrb[36].mxu0  ;;  %v6588_v13 = vpop.f32.mrb[36].mxu1 }
 0x600   : > { %v10438_v34 = vadd.f32 %v6547_v9, %v1817_v26  ;;  %v6549_v27 = vpop.f32.mrb[37].mxu0  ;;  %v10440_v42 = vadd.f32 %v6588_v13, %v1825_v19  ;;  %v6590_v4 = vpop.f32.mrb[37].mxu1  ;;  %v7059_v19 = vmax.f32 %v7052_v28, %v7055_v2  ;;  %v7062_v2 = vsel %vm7039_vm2, %v9983_v57, -inf }
 0x601   : > { %v10442_v59 = vadd.f32 %v6549_v27, %v1821_v29  ;;  %v6551_v37 = vpop.f32.mrb[38].mxu0  ;;  %v10446_v8 = vadd.f32 %v6590_v4, %v1829_v31  ;;  %v6592_v47 = vpop.f32.mrb[38].mxu1  ;;  %v7058_v27 = vsel %vm7039_vm2, %v9894_v12, -inf  ;;  %v7060_v4 = vsel %vm7039_vm2, %v9977_v44, -inf }
 0x602   : > { %v6552_v30 = vpop.f32.mrb[39].mxu0  ;;  %v6593_v22 = vpop.f32.mrb[39].mxu1  ;;  %v7061_v13 = vmax.f32 %v7056_v24, %v7059_v19  ;;  %v7064_v47 = vsel %vm7039_vm2, %v9981_v56, -inf  ;;  %v7072_v24 = vsel %vm7039_vm2, %v10075_v62, -inf }
 0x603   : > { %v6960_v58 = vcombine.low %v10438_v34, %v10442_v59  ;;  %v6961_v26 = vcombine.low %v10440_v42, %v10446_v8  ;;  %v7066_v22 = vsel %vm7039_vm2, %v9985_v60, -inf }
 0x604   : > { %v7065_v11 = vmax.f32 %v7054_v23, %v7061_v13  ;;  %v7074_v23 = vsel %vm7039_vm2, %v10079_v7, -inf }
 0x605   : > { %v6968_v29 = vrot.slane %v6960_v58, %v9692_v50  ;;  %v6975_v9 = vrot.slane %v6961_v26, %v9692_v50  ;;  %v7068_v26 = vsel %vm7039_vm2, %v10071_v52, -inf }
 0x606   : > { %v7063_v37 = vmax.f32 %v7058_v27, %v7065_v11  ;;  %v7076_v11 = vsel %vm7039_vm2, %v10162_v61, -inf }
 0x607   : > { %v6976_v31 = vcombine.low %v6968_v29, %v6975_v9 }
 0x608   : > { %v7067_v28 = vmax.f32 %v7060_v4, %v7063_v37  ;;  %v7080_v37 = vsel %vm7039_vm2, %v10166_v40, -inf }
 0x609   : > { %7035 = vst [vmem:[%s9711_s20 + $0x48] sm:$0xff] %v6976_v31  ;;  %v7070_v31 = vsel %vm7039_vm2, %v10077_v1, -inf }
 0x60a   : > { %v7069_v30 = vmax.f32 %v7064_v47, %v7067_v28  ;;  %v7078_v47 = vsel %vm7039_vm2, %v10168_v41, -inf }
 0x60c   : > { %v7073_v58 = vmax.f32 %v7062_v2, %v7069_v30  ;;  %v7082_v2 = vsel %vm7039_vm2, %v10170_v0, -inf }
 0x60e   : > { %v7071_v19 = vmax.f32 %v7066_v22, %v7073_v58  ;;  %v10486_v58 = vld [vmem:[%s9334_s15 + $0x28] sm:$0xff]  ;;  %v7084_v22 = vsel %vm7039_vm2, %v10256_v38, -inf }
 0x610   : > { %v7075_v29 = vmax.f32 %v7068_v26, %v7071_v19  ;;  %v1833_v19 = vrot.slane %v10486_v58, %v9653_v15 }
 0x612   : > { %v7077_v9 = vmax.f32 %v7072_v24, %v7075_v29  ;;  %v1841_v24 = vrot.slane %v10486_v58, %v9661_v20 }
 0x614   : > { %v7081_v13 = vmax.f32 %v7070_v31, %v7077_v9  ;;  %v1837_v9 = vrot.slane %v10486_v58, %v9664_v21  ;;  %v10926_v31 = vld [vmem:[#allocation23_spill] sm:$0xff] }
 0x616   : > { %v7079_v27 = vmax.f32 %v7074_v23, %v7081_v13  ;;  %v7088_v13 = vsel %vm7039_vm2, %v10926_v31, -inf  ;;  %v1845_v23 = vrot.slane %v10486_v58, %v9667_v25 }
 0x618   : > { %v7083_v4 = vmax.f32 %v7076_v11, %v7079_v27 }
 0x61a   : > { %v7085_v28 = vmax.f32 %v7080_v37, %v7083_v4 }
 0x61c   : > { %v7089_v30 = vmax.f32 %v7078_v47, %v7085_v28 }
 0x61e   : > { %v7087_v26 = vmax.f32 %v7082_v2, %v7089_v30 }
 0x620   : > { %v7091_v29 = vmax.f32 %v7084_v22, %v7087_v26 }
 0x622   : > { %v7093_v28 = vmax.f32 %v7088_v13, %v7091_v29  ;;  %v10928_v13 = vld [vmem:[#allocation25_spill] sm:$0xff] }
 0x63f   : > { %v6629_v11 = vpop.f32.mrb[40].mxu0  ;;  %v6670_v4 = vpop.f32.mrb[40].mxu1 }
 0x640   : > { %v10500_v27 = vadd.f32 %v6629_v11, %v1833_v19  ;;  %v6631_v37 = vpop.f32.mrb[41].mxu0  ;;  %v10502_v15 = vadd.f32 %v6670_v4, %v1841_v24  ;;  %v6672_v20 = vpop.f32.mrb[41].mxu1  ;;  %v10927_v19 = vld [vmem:[#allocation24_spill] sm:$0xff]  ;;  %v7090_v4 = vsel %vm7039_vm2, %v10928_v13, -inf }
 0x641   : > { %v10504_v47 = vadd.f32 %v6631_v37, %v1837_v9  ;;  %v6633_v30 = vpop.f32.mrb[42].mxu0  ;;  %v10506_v21 = vadd.f32 %v6672_v20, %v1845_v23  ;;  %v6674_v2 = vpop.f32.mrb[42].mxu1  ;;  %v7086_v11 = vsel %vm7039_vm2, %v10927_v19, -inf  ;;  %v7092_v37 = vsel %vm7039_vm2, %v10347_v33, -inf }
 0x642   : > { %v6634_v22 = vpop.f32.mrb[43].mxu0  ;;  %v6675_v26 = vpop.f32.mrb[43].mxu1  ;;  %v7097_v24 = vmax.f32 %v7086_v11, %v7093_v28  ;;  %v7094_v28 = vsel %vm7039_vm2, %v10353_v3, -inf  ;;  %v7098_v11 = vsel %vm7039_vm2, %v10355_v32, -inf }
 0x643   : > { %v6977_v25 = vcombine.low %v10500_v27, %v10504_v47  ;;  %v6978_v29 = vcombine.low %v10502_v15, %v10506_v21  ;;  %v7096_v22 = vsel %vm7039_vm2, %v10351_v51, -inf }
 0x644   : > { %v7095_v30 = vmax.f32 %v7090_v4, %v7097_v24  ;;  %v7104_v24 = vsel %vm7039_vm2, %v10405_v17, -inf  ;;  %v7102_v4 = vsel %vm7039_vm2, %v10407_v54, -inf }
 0x645   : > { %v6985_v9 = vrot.slane %v6977_v25, %v9692_v50  ;;  %v6992_v23 = vrot.slane %v6978_v29, %v9692_v50  ;;  %v7100_v29 = vsel %vm7039_vm2, %v10403_v35, -inf }
 0x646   : > { %v7099_v2 = vmax.f32 %v7092_v37, %v7095_v30  ;;  %v7106_v37 = vsel %vm7039_vm2, %v10409_v36, -inf }
 0x647   : > { %v6993_v20 = vcombine.low %v6985_v9, %v6992_v23 }
 0x648   : > { %v7101_v26 = vmax.f32 %v7096_v22, %v7099_v2  ;;  %v7112_v22 = vsel %vm7039_vm2, %v10440_v42, -inf }
 0x649   : > { %7036 = vst [vmem:[%s9711_s20 + $0x50] sm:$0xff] %v6993_v20  ;;  %v7108_v20 = vsel %vm7039_vm2, %v10438_v34, -inf }
 0x64a   : > { %v7105_v25 = vmax.f32 %v7094_v28, %v7101_v26  ;;  %v7110_v26 = vsel %vm7039_vm2, %v10442_v59, -inf  ;;  %v7114_v28 = vsel %vm7039_vm2, %v10446_v8, -inf }
 0x64c   : > { %v7103_v13 = vmax.f32 %v7098_v11, %v7105_v25  ;;  %v7116_v25 = vsel %vm7039_vm2, %v10500_v27, -inf }
 0x64e   : > { %v7107_v33 = vmax.f32 %v7100_v29, %v7103_v13 }
 0x650   : > { %v7109_v9 = vmax.f32 %v7104_v24, %v7107_v33  ;;  %v7120_v24 = vsel %vm7039_vm2, %v10502_v15, -inf }
 0x652   : > { %v7113_v23 = vmax.f32 %v7102_v4, %v7109_v9  ;;  %v7118_v4 = vsel %vm7039_vm2, %v10504_v47, -inf }
 0x654   : > { %v7111_v30 = vmax.f32 %v7106_v37, %v7113_v23  ;;  %v1849_v23 = vrot.slane %v10486_v58, %v9765_v10 }
 0x656   : > { %v7115_v2 = vmax.f32 %v7108_v20, %v7111_v30  ;;  %v1857_v20 = vrot.slane %v10486_v58, %v9770_v14  ;;  %v1853_v30 = vrot.slane %v10486_v58, %v9773_v16 }
 0x658   : > { %v7117_v13 = vmax.f32 %v7112_v22, %v7115_v2  ;;  %v7122_v2 = vsel %vm7039_vm2, %v10506_v21, -inf  ;;  %v1861_v22 = vrot.slane %v10486_v58, %v9776_v18 }
 0x65a   : > { %v7119_v33 = vmax.f32 %v7110_v26, %v7117_v13 }
 0x65c   : > { %v7121_v11 = vmax.f32 %v7114_v28, %v7119_v33 }
 0x65e   : > { %v7123_v29 = vmax.f32 %v7116_v25, %v7121_v11 }
 0x660   : > { %v7125_v9 = vmax.f32 %v7120_v24, %v7123_v29 }
 0x662   : > { %v7127_v37 = vmax.f32 %v7118_v4, %v7125_v9 }
 0x664   : > { %v7129_v25 = vmax.f32 %v7122_v2, %v7127_v37 }
 0x67f   : > { %v6711_v13 = vpop.f32.mrb[44].mxu0  ;;  %v6752_v33 = vpop.f32.mrb[44].mxu1 }
 0x680   : > { %v10559_v26 = vadd.f32 %v6711_v13, %v1849_v23  ;;  %v6713_v28 = vpop.f32.mrb[45].mxu0  ;;  %v10561_v10 = vadd.f32 %v6752_v33, %v1857_v20  ;;  %v6754_v14 = vpop.f32.mrb[45].mxu1 }
 0x681   : > { %v10563_v11 = vadd.f32 %v6713_v28, %v1853_v30  ;;  %v6715_v29 = vpop.f32.mrb[46].mxu0  ;;  %v10565_v24 = vadd.f32 %v6754_v14, %v1861_v22  ;;  %v6756_v16 = vpop.f32.mrb[46].mxu1 }
 0x682   : > { %v6716_v9 = vpop.f32.mrb[47].mxu0  ;;  %v7124_v18 = vsel %vm7039_vm2, %v10559_v26, -inf  ;;  %v6757_v4 = vpop.f32.mrb[47].mxu1  ;;  %v7128_v30 = vsel %vm7039_vm2, %v10561_v10, -inf  ;;  %v9030_v29 = vmov 0  }
 0x683   : > { %v6994_v58 = vcombine.low %v10559_v26, %v10563_v11  ;;  %v7131_v23 = vmax.f32 %v7124_v18, %v7129_v25  ;;  %v7126_v37 = vsel %vm7039_vm2, %v10563_v11, -inf  ;;  %v6995_v20 = vcombine.low %v10561_v10, %v10565_v24  ;;  %8661 = vset.pattern.permute.xlu0 %v9030_v29  ;;  %v10582_v16 = vld [vmem:[#allocation4] sm:$0x3] }
 0x684   : > { %v7130_v14 = vsel %vm7039_vm2, %v10565_v24, -inf }
 0x685   : > { %v7002_v2 = vrot.slane %v6994_v58, %v9692_v50  ;;  %v7132_v22 = vmax.f32 %v7126_v37, %v7131_v23  ;;  %v7009_v13 = vrot.slane %v6995_v20, %v9692_v50 }
 0x687   : > { %v7133_v33 = vmax.f32 %v7128_v30, %v7132_v22  ;;  %v7010_v28 = vcombine.low %v7002_v2, %v7009_v13 }
 0x689   : > { %v7134_v25 = vmax.f32 %v7130_v14, %v7133_v33  ;;  %7037 = vst [vmem:[%s9711_s20 + $0x58] sm:$0xff] %v7010_v28 }
 0x68b   : > { %7135 = vmax.xlane.f32.xlu0 %v7134_v25 }
 0x718   : > { %v7136_v9 = vpop.xlane.xlu0 %7135 }
 0x719   : > { %v10585_v18 = vmax.f32 %v10582_v16, %v7136_v9 }
 0x71b   : > { %v7139_v50 = vsub.f32 %v10582_v16, %v10585_v18  ;;  %7392 = vst.msk [vmem:[#allocation4] sm:$0x3] %vm7390_vm3, %v10585_v18  ;;  %7145 = vperm.xlu0 %8661, %v10585_v18   ;;  %v9032_v18 = vmov (!%p8393_p10), 269488144  }
 0x79a   : > { %v10592_v58 = vpop.permute.xlu0 %7145 }
 0x79b   : > { %v7148_v4 = vsub.f32 %v9683_v43, %v10592_v58  ;;  %v7149_v23 = vsub.f32 %v9689_v49, %v10592_v58  ;;  %v7150_v37 = vsub.f32 %v9687_v48, %v10592_v58  ;;  %v7151_v20 = vsub.f32 %v9694_v55, %v10592_v58 }
 0x79c   : > { %v7152_v22 = vsub.f32 %v9792_v39, %v10592_v58  ;;  %v7153_v33 = vsub.f32 %v9798_v46, %v10592_v58  ;;  %v7154_v49 = vsub.f32 %v9796_v45, %v10592_v58  ;;  %v7155_v55 = vsub.f32 %v9800_v53, %v10592_v58 }
 0x79d   : > { %v7196_v30 = vmul.f32 1.442695, %v7148_v4  ;;  %v7198_v2 = vmul.f32 1.442695, %v7149_v23  ;;  %v7200_v13 = vmul.f32 1.442695, %v7150_v37  ;;  %v7156_v39 = vsub.f32 %v9886_v63, %v10592_v58 }
 0x79e   : > { %v7202_v43 = vmul.f32 1.442695, %v7151_v20  ;;  %v7204_v48 = vmul.f32 1.442695, %v7152_v22  ;;  %v7206_v28 = vmul.f32 1.442695, %v7153_v33  ;;  %v7157_v46 = vsub.f32 %v9892_v6, %v10592_v58 }
 0x79f   : > { %8662 = vpow2.f32 %v7196_v30  ;;  %v7208_v14 = vmul.f32 1.442695, %v7154_v49  ;;  %v7210_v25 = vmul.f32 1.442695, %v7155_v55  ;;  %v7158_v45 = vsub.f32 %v9890_v5, %v10592_v58 }
 0x7a0   : > { %8664 = vpow2.f32 %v7198_v2  ;;  %v7212_v4 = vmul.f32 1.442695, %v7156_v39  ;;  %v7159_v23 = vsub.f32 %v9894_v12, %v10592_v58  ;;  %v7214_v63 = vmul.f32 1.442695, %v7157_v46 }
 0x7a1   : > { %8666 = vpow2.f32 %v7200_v13  ;;  %v7160_v30 = vsub.f32 %v9977_v44, %v10592_v58  ;;  %v7216_v2 = vmul.f32 1.442695, %v7158_v45  ;;  %v7161_v33 = vsub.f32 %v9983_v57, %v10592_v58 }
 0x7a2   : > { %8668 = vpow2.f32 %v7202_v43  ;;  %v7218_v12 = vmul.f32 1.442695, %v7159_v23  ;;  %v7162_v55 = vsub.f32 %v9981_v56, %v10592_v58  ;;  %v7163_v46 = vsub.f32 %v9985_v60, %v10592_v58 }
 0x7a3   : > { %8670 = vpow2.f32 %v7204_v48  ;;  %v7220_v44 = vmul.f32 1.442695, %v7160_v30  ;;  %v7222_v57 = vmul.f32 1.442695, %v7161_v33  ;;  %v7164_v45 = vsub.f32 %v10071_v52, %v10592_v58 }
 0x7a4   : > { %8672 = vpow2.f32 %v7206_v28  ;;  %v7224_v56 = vmul.f32 1.442695, %v7162_v55  ;;  %v7226_v60 = vmul.f32 1.442695, %v7163_v46  ;;  %v7166_v30 = vsub.f32 %v10075_v62, %v10592_v58 }
 0x7a5   : > { %8674 = vpow2.f32 %v7208_v14  ;;  %v7228_v52 = vmul.f32 1.442695, %v7164_v45  ;;  %v7171_v45 = vsub.f32 %v10170_v0, %v10592_v58 }
 0x7a6   : > { %8676 = vpow2.f32 %v7210_v25  ;;  %v7232_v62 = vmul.f32 1.442695, %v7166_v30 }
 0x7a7   : > { %8678 = vpow2.f32 %v7212_v4  ;;  %v7242_v0 = vmul.f32 1.442695, %v7171_v45 }
 0x7a8   : > { %8680 = vpow2.f32 %v7214_v63  ;;  %v7165_v63 = vsub.f32 %v10077_v1, %v10592_v58 }
 0x7a9   : > { %v8663_v29 = vpop.eup %8662  ;;  %8682 = vpow2.f32 %v7216_v2 }
 0x7aa   : > { %v8665_v9 = vpop.eup %8664  ;;  %v7292_v37 = vsel %vm7039_vm2, %v8663_v29, 0.0  ;;  %8684 = vpow2.f32 %v7218_v12  ;;  %v7230_v1 = vmul.f32 1.442695, %v7165_v63 }
 0x7ab   : > { %v8667_v53 = vpop.eup %8666  ;;  %v7293_v20 = vsel %vm7039_vm2, %v8665_v9, 0.0  ;;  %8686 = vpow2.f32 %v7220_v44 }
 0x7ac   : > { %v8669_v6 = vpop.eup %8668  ;;  %v7294_v22 = vadd.f32 %v7293_v20, %v7292_v37  ;;  %v7295_v5 = vsel %vm7039_vm2, %v8667_v53, 0.0  ;;  %8688 = vpow2.f32 %v7222_v57  ;;  %v7170_v57 = vsub.f32 %v10166_v40, %v10592_v58 }
 0x7ad   : > { %v8671_v13 = vpop.eup %8670  ;;  %v7297_v49 = vsel %vm7039_vm2, %v8669_v6, 0.0  ;;  %8690 = vpow2.f32 %v7224_v56 }
 0x7ae   : > { %v7296_v43 = vadd.f32 %v7295_v5, %v7294_v22  ;;  %v8673_v48 = vpop.eup %8672  ;;  %v7299_v39 = vsel %vm7039_vm2, %v8671_v13, 0.0  ;;  %v7167_v13 = vsub.f32 %v10079_v7, %v10592_v58  ;;  %8692 = vpow2.f32 %v7226_v60 }
 0x7af   : > { %v8675_v14 = vpop.eup %8674  ;;  %v7301_v29 = vsel %vm7039_vm2, %v8673_v48, 0.0  ;;  %8694 = vpow2.f32 %v7228_v52  ;;  %v7240_v40 = vmul.f32 1.442695, %v7170_v57 }
 0x7b0   : > { %v7298_v28 = vadd.f32 %v7297_v49, %v7296_v43  ;;  %v8677_v9 = vpop.eup %8676  ;;  %v7303_v53 = vsel %vm7039_vm2, %v8675_v14, 0.0  ;;  %v7168_v49 = vsub.f32 %v10162_v61, %v10592_v58  ;;  %8696 = vpow2.f32 %v7230_v1  ;;  %v10929_v1 = vld [vmem:[#allocation25_spill] sm:$0xff] }
 0x7b1   : > { %v8679_v23 = vpop.eup %8678  ;;  %v7305_v20 = vsel %vm7039_vm2, %v8677_v9, 0.0  ;;  %v7234_v7 = vmul.f32 1.442695, %v7167_v13  ;;  %8698 = vpow2.f32 %v7232_v62  ;;  %v10930_v62 = vld [vmem:[#allocation26_spill] sm:$0xff] }
 0x7b2   : > { %v7300_v25 = vadd.f32 %v7299_v39, %v7298_v28  ;;  %v8681_v6 = vpop.eup %8680  ;;  %v7307_v22 = vsel %vm7039_vm2, %v8679_v23, 0.0  ;;  %v7169_v28 = vsub.f32 %v10168_v41, %v10592_v58  ;;  %v7236_v61 = vmul.f32 1.442695, %v7168_v49 }
 0x7b3   : > { %v8683_v5 = vpop.eup %8682  ;;  %v7309_v12 = vsel %vm7039_vm2, %v8681_v6, 0.0  ;;  %8700 = vpow2.f32 %v7234_v7  ;;  %v7172_v23 = vsub.f32 %v10256_v38, %v10592_v58  ;;  %v7177_v7 = vsub.f32 %v10353_v3, %v10592_v58 }
 0x7b4   : > { %v7302_v4 = vadd.f32 %v7301_v29, %v7300_v25  ;;  %v8685_v43 = vpop.eup %8684  ;;  %v7311_v55 = vsel %vm7039_vm2, %v8683_v5, 0.0  ;;  %v7238_v41 = vmul.f32 1.442695, %v7169_v28  ;;  %8702 = vpow2.f32 %v7236_v61 }
 0x7b5   : > { %v8687_v44 = vpop.eup %8686  ;;  %v7313_v14 = vsel %vm7039_vm2, %v8685_v43, 0.0  ;;  %v7244_v38 = vmul.f32 1.442695, %v7172_v23  ;;  %v7178_v61 = vsub.f32 %v10351_v51, %v10592_v58  ;;  %v7254_v3 = vmul.f32 1.442695, %v7177_v7 }
 0x7b6   : > { %v7304_v37 = vadd.f32 %v7303_v53, %v7302_v4  ;;  %v8689_v46 = vpop.eup %8688  ;;  %v7315_v29 = vsel %vm7039_vm2, %v8687_v44, 0.0  ;;  %8704 = vpow2.f32 %v7238_v41  ;;  %v7179_v41 = vsub.f32 %v10355_v32, %v10592_v58 }
 0x7b7   : > { %v8691_v9 = vpop.eup %8690  ;;  %v7317_v4 = vsel %vm7039_vm2, %v8689_v46, 0.0  ;;  %8706 = vpow2.f32 %v7240_v40  ;;  %v7180_v23 = vsub.f32 %v10403_v35, %v10592_v58  ;;  %v7256_v51 = vmul.f32 1.442695, %v7178_v61 }
 0x7b8   : > { %v7306_v2 = vadd.f32 %v7305_v20, %v7304_v37  ;;  %v8693_v53 = vpop.eup %8692  ;;  %v7319_v60 = vsel %vm7039_vm2, %v8691_v9, 0.0  ;;  %v7173_v20 = vsub.f32 %v10927_v19, %v10592_v58  ;;  %8708 = vpow2.f32 %v7242_v0 }
 0x7b9   : > { %v8695_v37 = vpop.eup %8694  ;;  %v7321_v30 = vsel %vm7039_vm2, %v8693_v53, 0.0  ;;  %8710 = vpow2.f32 %v7244_v38  ;;  %v7258_v32 = vmul.f32 1.442695, %v7179_v41  ;;  %v7260_v35 = vmul.f32 1.442695, %v7180_v23 }
 0x7ba   : > { %v7308_v33 = vadd.f32 %v7307_v22, %v7306_v2  ;;  %v8697_v52 = vpop.eup %8696  ;;  %v7174_v2 = vsub.f32 %v10926_v31, %v10592_v58  ;;  %v7323_v5 = vsel %vm7039_vm2, %v8695_v37, 0.0  ;;  %v7246_v19 = vmul.f32 1.442695, %v7173_v20 }
 0x7bb   : > { %v8699_v13 = vpop.eup %8698  ;;  %v7325_v43 = vsel %vm7039_vm2, %v8697_v52, 0.0  ;;  %v7181_v37 = vsub.f32 %v10407_v54, %v10592_v58  ;;  %v7188_v61 = vsub.f32 %v10500_v27, %v10592_v58 }
 0x7bc   : > { %v7310_v48 = vadd.f32 %v7309_v12, %v7308_v33  ;;  %v7175_v33 = vsub.f32 %v10929_v1, %v10592_v58  ;;  %v7248_v31 = vmul.f32 1.442695, %v7174_v2  ;;  %v7327_v44 = vsel %vm7039_vm2, %v8699_v13, 0.0 }
 0x7bd   : > { %v8701_v49 = vpop.eup %8700  ;;  %8712 = vpow2.f32 %v7246_v19  ;;  %v7262_v54 = vmul.f32 1.442695, %v7181_v37  ;;  %v7276_v27 = vmul.f32 1.442695, %v7188_v61 }
 0x7be   : > { %v7312_v39 = vadd.f32 %v7311_v55, %v7310_v48  ;;  %v7176_v48 = vsub.f32 %v10930_v62, %v10592_v58  ;;  %v8703_v28 = vpop.eup %8702  ;;  %v7329_v46 = vsel %vm7039_vm2, %v8701_v49, 0.0  ;;  %8714 = vpow2.f32 %v7248_v31 }
 0x7bf   : > { %v7331_v9 = vsel %vm7039_vm2, %v8703_v28, 0.0  ;;  %v7185_v49 = vsub.f32 %v10442_v59, %v10592_v58 }
 0x7c0   : > { %v7314_v25 = vadd.f32 %v7313_v14, %v7312_v39  ;;  %v7250_v39 = vmul.f32 1.442695, %v7175_v33  ;;  %v8705_v57 = vpop.eup %8704  ;;  %v7184_v33 = vsub.f32 %v10438_v34, %v10592_v58 }
 0x7c1   : > { %v8707_v45 = vpop.eup %8706  ;;  %v7270_v59 = vmul.f32 1.442695, %v7185_v49 }
 0x7c2   : > { %v7316_v56 = vadd.f32 %v7315_v29, %v7314_v25  ;;  %v7252_v25 = vmul.f32 1.442695, %v7176_v48  ;;  %8716 = vpow2.f32 %v7250_v39  ;;  %v8709_v53 = vpop.eup %8708  ;;  %v7268_v34 = vmul.f32 1.442695, %v7184_v33 }
 0x7c3   : > { %v7337_v0 = vsel %vm7039_vm2, %v8709_v53, 0.0  ;;  %v7187_v39 = vsub.f32 %v10446_v8, %v10592_v58 }
 0x7c4   : > { %v7318_v63 = vadd.f32 %v7317_v4, %v7316_v56  ;;  %v7333_v4 = vsel %vm7039_vm2, %v8705_v57, 0.0  ;;  %8718 = vpow2.f32 %v7252_v25 }
 0x7c5   : > { %8720 = vpow2.f32 %v7254_v3  ;;  %v7274_v8 = vmul.f32 1.442695, %v7187_v39 }
 0x7c6   : > { %v7320_v6 = vadd.f32 %v7319_v60, %v7318_v63  ;;  %v7335_v63 = vsel %vm7039_vm2, %v8707_v45, 0.0  ;;  %v8711_v60 = vpop.eup %8710  ;;  %8722 = vpow2.f32 %v7256_v51  ;;  %v7189_v45 = vsub.f32 %v10504_v47, %v10592_v58 }
 0x7c7   : > { %v7339_v2 = vsel %vm7039_vm2, %v8711_v60, 0.0  ;;  %8724 = vpow2.f32 %v7258_v32  ;;  %v7192_v32 = vsub.f32 %v10559_v26, %v10592_v58 }
 0x7c8   : > { %v7322_v22 = vadd.f32 %v7321_v30, %v7320_v6  ;;  %v8713_v6 = vpop.eup %8712  ;;  %v7182_v30 = vsub.f32 %v10405_v17, %v10592_v58  ;;  %8726 = vpow2.f32 %v7260_v35  ;;  %v7278_v47 = vmul.f32 1.442695, %v7189_v45 }
 0x7c9   : > { %v8715_v38 = vpop.eup %8714  ;;  %v7341_v13 = vsel %vm7039_vm2, %v8713_v6, 0.0  ;;  %8728 = vpow2.f32 %v7262_v54  ;;  %v7284_v26 = vmul.f32 1.442695, %v7192_v32 }
 0x7ca   : > { %v7324_v12 = vadd.f32 %v7323_v5, %v7322_v22  ;;  %v7183_v22 = vsub.f32 %v10409_v36, %v10592_v58  ;;  %v7264_v17 = vmul.f32 1.442695, %v7182_v30  ;;  %v7193_v30 = vsub.f32 %v10563_v11, %v10592_v58 }
 0x7cc   : > { %v7326_v55 = vadd.f32 %v7325_v43, %v7324_v12  ;;  %v8717_v1 = vpop.eup %8716  ;;  %v7343_v12 = vsel %vm7039_vm2, %v8715_v38, 0.0  ;;  %v7266_v36 = vmul.f32 1.442695, %v7183_v22  ;;  %8730 = vpow2.f32 %v7264_v17 }
 0x7cd   : > { %v7345_v48 = vsel %vm7039_vm2, %v8717_v1, 0.0  ;;  %v7194_v38 = vsub.f32 %v10561_v10, %v10592_v58  ;;  %v7286_v11 = vmul.f32 1.442695, %v7193_v30  ;;  %v7403_v30 = vld [vmem:[#allocation2 + $0x8] sm:$0xff] (!%p8393_p10) }
 0x7ce   : > { %v7328_v14 = vadd.f32 %v7327_v44, %v7326_v55  ;;  %v8719_v43 = vpop.eup %8718  ;;  %v7186_v55 = vsub.f32 %v10440_v42, %v10592_v58  ;;  %8732 = vpow2.f32 %v7266_v36 }
 0x7cf   : > { %v8721_v31 = vpop.eup %8720  ;;  %v7347_v28 = vsel %vm7039_vm2, %v8719_v43, 0.0  ;;  %8734 = vpow2.f32 %v7268_v34 }
 0x7d0   : > { %v7330_v29 = vadd.f32 %v7329_v46, %v7328_v14  ;;  %v8723_v7 = vpop.eup %8722  ;;  %v7349_v46 = vsel %vm7039_vm2, %v8721_v31, 0.0  ;;  %v7272_v42 = vmul.f32 1.442695, %v7186_v55  ;;  %8736 = vpow2.f32 %v7270_v59 }
 0x7d1   : > { %v8725_v57 = vpop.eup %8724 }
 0x7d2   : > { %v7332_v56 = vadd.f32 %v7331_v9, %v7330_v29  ;;  %v7351_v29 = vsel %vm7039_vm2, %v8723_v7, 0.0  ;;  %v8727_v9 = vpop.eup %8726  ;;  %v7353_v3 = vsel %vm7039_vm2, %v8725_v57, 0.0  ;;  %8738 = vpow2.f32 %v7272_v42 }
 0x7d3   : > { %v7355_v23 = vsel %vm7039_vm2, %v8727_v9, 0.0  ;;  %8740 = vpow2.f32 %v7274_v8 }
 0x7d4   : > { %v7334_v40 = vadd.f32 %v7333_v4, %v7332_v56  ;;  %v8729_v56 = vpop.eup %8728  ;;  %v7190_v4 = vsub.f32 %v10502_v15, %v10592_v58  ;;  %8742 = vpow2.f32 %v7276_v27 }
 0x7d5   : > { %v7357_v60 = vsel %vm7039_vm2, %v8729_v56, 0.0  ;;  %8744 = vpow2.f32 %v7278_v47 }
 0x7d6   : > { %v7336_v20 = vadd.f32 %v7335_v63, %v7334_v40  ;;  %v8731_v51 = vpop.eup %8730  ;;  %v7191_v40 = vsub.f32 %v10506_v21, %v10592_v58  ;;  %v7280_v15 = vmul.f32 1.442695, %v7190_v4  ;;  %v7140_v4 = vmul.f32 1.442695, %v7139_v50 }
 0x7d7   : > { %v7419_v50 = vunpack.c.l.s4 (!%p8393_p10), %v9032_v18 }
 0x7d8   : > { %v7338_v52 = vadd.f32 %v7337_v0, %v7336_v20  ;;  %v8733_v37 = vpop.eup %8732  ;;  %v7359_v0 = vsel %vm7039_vm2, %v8731_v51, 0.0  ;;  %v7282_v21 = vmul.f32 1.442695, %v7191_v40  ;;  %8746 = vpow2.f32 %v7280_v15 }
 0x7d9   : > { %v8735_v6 = vpop.eup %8734  ;;  %v7420_v15 = vunpack.c.0.s8 (!%p8393_p10), %v7419_v50 }
 0x7da   : > { %v7340_v5 = vadd.f32 %v7339_v2, %v7338_v52  ;;  %v7361_v52 = vsel %vm7039_vm2, %v8733_v37, 0.0  ;;  %v8737_v2 = vpop.eup %8736  ;;  %v7363_v54 = vsel %vm7039_vm2, %v8735_v6, 0.0  ;;  %8748 = vpow2.f32 %v7282_v21  ;;  %v7397_v37 = vld [vmem:[#allocation4] sm:$0x3] (!%p8393_p10)  ;;  %v7404_v21 = vld [vmem:[#allocation2 + $0x10] sm:$0xff] (!%p8393_p10) }
 0x7db   : > { %v7365_v33 = vsel %vm7039_vm2, %v8737_v2, 0.0  ;;  %8750 = vpow2.f32 %v7284_v26  ;;  %v7402_v6 = vld [vmem:[#allocation2] sm:$0xff] (!%p8393_p10)  ;;  %v7407_v2 = vld [vmem:[#allocation2 + $0x28] sm:$0xff] (!%p8393_p10)  ;;  %v7409_v26 = vld [vmem:[#allocation2 + $0x38] sm:$0xff] (!%p8393_p10) }
 0x7dc   : > { %v7342_v19 = vadd.f32 %v7341_v13, %v7340_v5  ;;  %v8739_v5 = vpop.eup %8738  ;;  %v7195_v13 = vsub.f32 %v10565_v24, %v10592_v58  ;;  %8752 = vpow2.f32 %v7286_v11  ;;  %v7413_v11 = vld [vmem:[#allocation2 + $0x58] sm:$0xff] (!%p8393_p10) }
 0x7dd   : > { %v8741_v17 = vpop.eup %8740  ;;  %v7367_v10 = vsel %vm7039_vm2, %v8739_v5, 0.0 }
 0x7de   : > { %v7344_v62 = vadd.f32 %v7343_v12, %v7342_v19  ;;  %v7288_v19 = vmul.f32 1.442695, %v7194_v38  ;;  %v8743_v43 = vpop.eup %8742  ;;  %v7290_v49 = vmul.f32 1.442695, %v7195_v13  ;;  %v7408_v38 = vld [vmem:[#allocation2 + $0x30] sm:$0xff] (!%p8393_p10) }
 0x7df   : > { %v7371_v58 = vsel %vm7039_vm2, %v8743_v43, 0.0  ;;  %v7412_v13 = vld [vmem:[#allocation2 + $0x50] sm:$0xff] (!%p8393_p10)  ;;  %v7456_v43 = vld [vmem:[#allocation2 + $0x88] sm:$0xff] (!%p8393_p10) }
 0x7e0   : > { %v7346_v44 = vadd.f32 %v7345_v48, %v7344_v62  ;;  %v7369_v62 = vsel %vm7039_vm2, %v8741_v17, 0.0  ;;  %v8745_v48 = vpop.eup %8744  ;;  %8754 = vpow2.f32 %v7288_v19  ;;  %v7452_v17 = vld [vmem:[#allocation2 + $0x68] sm:$0xff] (!%p8393_p10)  ;;  %v7453_v19 = vld [vmem:[#allocation2 + $0x70] sm:$0xff] (!%p8393_p10) }
 0x7e1   : > { %8756 = vpow2.f32 %v7290_v49  ;;  %v7373_v34 = vsel %vm7039_vm2, %v8745_v48, 0.0  ;;  %v7457_v49 = vld [vmem:[#allocation2 + $0x90] sm:$0xff] (!%p8393_p10) }
 0x7e2   : > { %v7348_v14 = vadd.f32 %v7347_v28, %v7346_v44  ;;  %v8747_v31 = vpop.eup %8746  ;;  %8758 = vpow2.f32 %v7140_v4 }
 0x7e3   : > { %v7375_v7 = vsel %vm7039_vm2, %v8747_v31, 0.0  ;;  %v7459_v31 = vld [vmem:[#allocation2 + $0xa0] sm:$0xff] (!%p8393_p10) }
 0x7e4   : > { %v7350_v25 = vadd.f32 %v7349_v46, %v7348_v14  ;;  %v8749_v44 = vpop.eup %8748 }
 0x7e5   : > { %v8751_v39 = vpop.eup %8750  ;;  %v7377_v14 = vsel %vm7039_vm2, %v8749_v44, 0.0 }
 0x7e6   : > { %v7352_v41 = vadd.f32 %v7351_v29, %v7350_v25  ;;  %v8753_v46 = vpop.eup %8752  ;;  %v7379_v61 = vsel %vm7039_vm2, %v8751_v39, 0.0  ;;  %v7460_v39 = vld [vmem:[#allocation2 + $0xa8] sm:$0xff] (!%p8393_p10) }
 0x7e7   : > { %v7381_v29 = vsel %vm7039_vm2, %v8753_v46, 0.0 }
 0x7e8   : > { %v7354_v53 = vadd.f32 %v7353_v3, %v7352_v41 }
 0x7ea   : > { %v7356_v63 = vadd.f32 %v7355_v23, %v7354_v53  ;;  %v8755_v42 = vpop.eup %8754  ;;  %v7138_v53 = vld [vmem:[#allocation5] sm:$0x3] }
 0x7eb   : > { %v8757_v9 = vpop.eup %8756  ;;  %v7383_v8 = vsel %vm7039_vm2, %v8755_v42, 0.0 }
 0x7ec   : > { %v7358_v20 = vadd.f32 %v7357_v60, %v7356_v63  ;;  %v7385_v3 = vsel %vm7039_vm2, %v8757_v9, 0.0  ;;  %v8759_v27 = vpop.eup %8758  ;;  %v9031_v63 = vmov (!%p8393_p10), 0  }
 0x7ed   : > { %v7142_v23 = vmul.f32 %v8759_v27, %v7138_v53  ;;  %8760 = vset.pattern.permute.xlu0 (!%p8393_p10), %v9031_v63 }
 0x7ee   : > { %v7360_v35 = vadd.f32 %v7359_v0, %v7358_v20  ;;  %v10931_v20 = vld [vmem:[#allocation22_spill] sm:$0xff] (!%p8393_p10) }
 0x7ef   : > { %v7423_v0 = vsub.s32 (!%p8393_p10), %v7420_v15, %v10931_v20 }
 0x7f0   : > { %v7362_v22 = vadd.f32 %v7361_v52, %v7360_v35  ;;  %v7405_v35 = vld [vmem:[#allocation2 + $0x18] sm:$0xff] (!%p8393_p10)  ;;  %v7406_v52 = vld [vmem:[#allocation2 + $0x20] sm:$0xff] (!%p8393_p10) }
 0x7f2   : > { %v7364_v1 = vadd.f32 %v7363_v54, %v7362_v22  ;;  %v7410_v22 = vld [vmem:[#allocation2 + $0x40] sm:$0xff] (!%p8393_p10)  ;;  %v7411_v54 = vld [vmem:[#allocation2 + $0x48] sm:$0xff] (!%p8393_p10) }
 0x7f4   : > { %v7366_v12 = vadd.f32 %v7365_v33, %v7364_v1  ;;  %v7451_v1 = vld [vmem:[#allocation2 + $0x60] sm:$0xff] (!%p8393_p10) }
 0x7f6   : > { %v7368_v36 = vadd.f32 %v7367_v10, %v7366_v12  ;;  %v7454_v12 = vld [vmem:[#allocation2 + $0x78] sm:$0xff] (!%p8393_p10)  ;;  %v7455_v10 = vld [vmem:[#allocation2 + $0x80] sm:$0xff] (!%p8393_p10) }
 0x7f8   : > { %v7370_v24 = vadd.f32 %v7369_v62, %v7368_v36 }
 0x7fa   : > { %v7372_v55 = vadd.f32 %v7371_v58, %v7370_v24  ;;  %v7458_v58 = vld [vmem:[#allocation2 + $0x98] sm:$0xff] (!%p8393_p10) }
 0x7fc   : > { %v7374_v28 = vadd.f32 %v7373_v34, %v7372_v55 }
 0x7fe   : > { %v7376_v59 = vadd.f32 %v7375_v7, %v7374_v28 }
 0x800   : > { %v7378_v57 = vadd.f32 %v7377_v14, %v7376_v59  ;;  %v7461_v59 = vld [vmem:[#allocation2 + $0xb0] sm:$0xff] (!%p8393_p10)  ;;  %v7462_v14 = vld [vmem:[#allocation2 + $0xb8] sm:$0x3f] (!%p8393_p10) }
 0x802   : > { %v7380_v25 = vadd.f32 %v7379_v61, %v7378_v57 }
 0x804   : > { %v7382_v45 = vadd.f32 %v7381_v29, %v7380_v25 }
 0x806   : > { %v7384_v41 = vadd.f32 %v7383_v8, %v7382_v45 }
 0x808   : > { %v7386_v56 = vadd.f32 %v7385_v3, %v7384_v41 }
 0x80a   : > { %7387 = vadd.xlane.f32.xlu1 %v7386_v56 }
 0x894   : > { %7396 = sbr.rel (%p8393_p10) target bundleno = 2370 (0x942), region = 84 }
 0x897   : > { %v7388_v51 = vpop.xlane.xlu1 %7387 }
 0x898   : > { %v7389_v40 = vadd.f32 %v7388_v51, %v7142_v23 }
 0x89a   : > { %7391 = vst.msk [vmem:[#allocation5] sm:$0x3] %vm7390_vm3, %v7389_v40 }
 0x8a1   : > { %v7398_v47 = vld [vmem:[#allocation5] sm:$0x3] }
 0x8a2   : > { %8761 = vlog2.f32 %v7398_v47 }
 0x8ac   : > { %v8762_v60 = vpop.eup %8761 }
 0x8ad   : > { %v7400_v32 = vmul.f32 0.6931472, %v8762_v60 }
 0x8af   : > { %v7401_v16 = vadd.f32 %v7400_v32, %v7397_v37 }
 0x8b1   : > { %7416 = vperm.xlu0 %8760, %v7401_v16  }
 0x930   : > { %v7417_v5 = vpop.permute.xlu0 %7416 }
 0x931   : > { %v10744_v33 = vrot.slane %v7417_v5, %v7423_v0 }
 0x933   : > { %v7426_v36 = vsub.f32 %v7402_v6, %v10744_v33  ;;  %v7427_v62 = vsub.f32 %v7403_v30, %v10744_v33  ;;  %v7428_v48 = vsub.f32 %v7404_v21, %v10744_v33  ;;  %v7429_v24 = vsub.f32 %v7405_v35, %v10744_v33 }
 0x934   : > { %v7430_v34 = vsub.f32 %v7406_v52, %v10744_v33  ;;  %v7431_v44 = vsub.f32 %v7407_v2, %v10744_v33  ;;  %v7432_v28 = vsub.f32 %v7408_v38, %v10744_v33  ;;  %v7433_v7 = vsub.f32 %v7409_v26, %v10744_v33 }
 0x935   : > { %v7434_v46 = vsub.f32 %v7410_v22, %v10744_v33  ;;  %v7435_v57 = vsub.f32 %v7411_v54, %v10744_v33  ;;  %v7436_v61 = vsub.f32 %v7412_v13, %v10744_v33  ;;  %v7437_v42 = vsub.f32 %v7413_v11, %v10744_v33  ;;  %7438 = vst [vmem:[%s10877_s7] sm:$0xff] %v7426_v36 }
 0x936   : > { %7439 = vst [vmem:[%s10877_s7 + $0x8] sm:$0xff] %v7427_v62  ;;  %7440 = vst [vmem:[%s10877_s7 + $0x10] sm:$0xff] %v7428_v48  ;;  %v7463_v25 = vsub.f32 %v7451_v1, %v10744_v33  ;;  %v7464_v29 = vsub.f32 %v7452_v17, %v10744_v33  ;;  %v7465_v9 = vsub.f32 %v7453_v19, %v10744_v33 }
 0x937   : > { %7441 = vst [vmem:[%s10877_s7 + $0x18] sm:$0xff] %v7429_v24  ;;  %7442 = vst [vmem:[%s10877_s7 + $0x20] sm:$0xff] %v7430_v34  ;;  %v7466_v45 = vsub.f32 %v7454_v12, %v10744_v33  ;;  %v7467_v41 = vsub.f32 %v7455_v10, %v10744_v33  ;;  %v7468_v3 = vsub.f32 %v7456_v43, %v10744_v33 }
 0x938   : > { %7443 = vst [vmem:[%s10877_s7 + $0x28] sm:$0xff] %v7431_v44  ;;  %7444 = vst [vmem:[%s10877_s7 + $0x30] sm:$0xff] %v7432_v28  ;;  %v7469_v56 = vsub.f32 %v7457_v49, %v10744_v33  ;;  %v7470_v4 = vsub.f32 %v7458_v58, %v10744_v33  ;;  %v7471_v27 = vsub.f32 %v7459_v31, %v10744_v33 }
 0x939   : > { %7445 = vst [vmem:[%s10877_s7 + $0x38] sm:$0xff] %v7433_v7  ;;  %7446 = vst [vmem:[%s10877_s7 + $0x40] sm:$0xff] %v7434_v46  ;;  %v7472_v53 = vsub.f32 %v7460_v39, %v10744_v33  ;;  %v7473_v23 = vsub.f32 %v7461_v59, %v10744_v33  ;;  %v7474_v51 = vsub.f32 %v7462_v14, %v10744_v33 }
 0x93a   : > { %7447 = vst [vmem:[%s10877_s7 + $0x48] sm:$0xff] %v7435_v57  ;;  %7448 = vst [vmem:[%s10877_s7 + $0x50] sm:$0xff] %v7436_v61 }
 0x93b   : > { %7449 = vst [vmem:[%s10877_s7 + $0x58] sm:$0xff] %v7437_v42  ;;  %7475 = vst [vmem:[%s10877_s7 + $0x60] sm:$0xff] %v7463_v25 }
 0x93c   : > { %7476 = vst [vmem:[%s10877_s7 + $0x68] sm:$0xff] %v7464_v29  ;;  %7477 = vst [vmem:[%s10877_s7 + $0x70] sm:$0xff] %v7465_v9 }
 0x93d   : > { %7478 = vst [vmem:[%s10877_s7 + $0x78] sm:$0xff] %v7466_v45  ;;  %7479 = vst [vmem:[%s10877_s7 + $0x80] sm:$0xff] %v7467_v41 }
 0x93e   : > { %7480 = vst [vmem:[%s10877_s7 + $0x88] sm:$0xff] %v7468_v3  ;;  %7481 = vst [vmem:[%s10877_s7 + $0x90] sm:$0xff] %v7469_v56 }
 0x93f   : > { %7482 = vst [vmem:[%s10877_s7 + $0x98] sm:$0xff] %v7470_v4  ;;  %7483 = vst [vmem:[%s10877_s7 + $0xa0] sm:$0xff] %v7471_v27 }
 0x940   : > { %7484 = vst [vmem:[%s10877_s7 + $0xa8] sm:$0xff] %v7472_v53  ;;  %7485 = vst [vmem:[%s10877_s7 + $0xb0] sm:$0xff] %v7473_v23 }
 0x941   : > { %7490 = vst.msk [vmem:[%s10877_s7 + $0xb8] sm:$0x3f] %vm10795_vm7, %v7474_v51 }
 0x942 PF: > { %s10936_s18 = sld [smem:[#allocation21_spill]]  ;;  %s10937_s8 = smov %s9167_s24 }
 0x943   : > { %p20_p1 = scmp.ge.s32.totalorder %s9167_s24, 4   ;;  %s10938_s24 = smov %s9001_s25 }
 0x944   : > { %s10939_s25 = smov %s9005_s26  ;;  %s10941_s27 = smov %s10937_s8 }
 0x945   :  { %22 = sbr.rel (!%p20_p1) target bundleno = 10 (0xa), region = 126 }
 0x948   : > { %s10940_s26 = smov %s10936_s18 }
 0x94c   :  { %7502 = vsyncpa [#allocation7], 1 }
 0x94d   :  { %7504 = vsyncpa [#allocation7 + $0x1], 1 }
 0x94e   :  { %7505 = vsyncpa [#allocation9], 1 }
 0x94f   :  { %7506 = vsyncpa [#allocation12], 1 }
 0x950   :  { %7507 = vsyncpa [#allocation15], 1 }
 0x951   :  { %7509 = vsyncpa [#allocation15 + $0x1], 1 }

</bundles_post_ra>
